<compile_context>
chip_gen: v6e
topology: v6e:2x2x1
jax: 0.10.0
libtpu: 0.0.40
codegen_flags: <defaults>
</compile_context>

<pallas_src>
import functools

import numpy as np
import jax
import jax.numpy as jnp
from jax import lax
from jax.experimental import pallas as pl
from jax.experimental.pallas import tpu as pltpu


# ------------------------------- Pallas kernel -------------------------------

def _wd_lstm_kernel(*refs, T, B, H, p, inv_keep, apply_dropout):
    """Fused WeightDrop-LSTM forward (single invocation, no grid).

    refs (training): u, x2d, w_ih_t, w_hh_t, b | hs, h_n, c_n | xg_sc, w_sc
    refs (eval):        x2d, w_ih_t, w_hh_t, b | hs, h_n, c_n | xg_sc, w_sc

    x2d is time-major (T*B, In); hs is time-major (T*B, H) (reshaped outside).
    Gate order i, f, g, o matches PyTorch.
    """
    if apply_dropout:
        (u_ref, x_ref, wih_t_ref, whh_t_ref, b_ref,
         hs_ref, hn_ref, cn_ref, xg_sc, w_sc) = refs
    else:
        (x_ref, wih_t_ref, whh_t_ref, b_ref,
         hs_ref, hn_ref, cn_ref, xg_sc, w_sc) = refs

    # --- Prologue 1: DropConnect on W_hh^T (functional.dropout semantics:
    # drop with prob p, scale survivors by 1/(1-p)).  Single select, then cast
    # to bf16 once -> resident MXU operand in VMEM scratch.
    w = whh_t_ref[...]
    if apply_dropout:
        w = jnp.where(u_ref[...] >= jnp.float32(p),
                      w * jnp.float32(inv_keep), jnp.float32(0.0))
    w_sc[...] = w.astype(jnp.bfloat16)

    # --- Prologue 2: whole-sequence input projection as one MXU matmul,
    # hoisted out of the recurrence; both biases folded in.
    xg_sc[...] = (jnp.dot(x_ref[...], wih_t_ref[...],
                          preferred_element_type=jnp.float32) + b_ref[...])

    # --- Recurrence: fully unrolled time loop (T is static under jit), so all
    # slices are static, h/c stay in vregs, and the LLO scheduler can overlap
    # step t's gate math with step t+1's xg loads / MXU weight pushes.
    h = jnp.zeros((B, H), jnp.float32)
    c = jnp.zeros((B, H), jnp.float32)
    for t in range(T):
        gates = xg_sc[t * B:(t + 1) * B, :] + jnp.dot(
            h.astype(jnp.bfloat16), w_sc[...],
            preferred_element_type=jnp.float32)
        i = jax.nn.sigmoid(gates[:, 0:H])
        f = jax.nn.sigmoid(gates[:, H:2 * H])
        g = jnp.tanh(gates[:, 2 * H:3 * H])
        o = jax.nn.sigmoid(gates[:, 3 * H:4 * H])
        c = f * c + i * g
        h = o * jnp.tanh(c)
        hs_ref[t * B:(t + 1) * B, :] = h          # lane-dense store (H = 128)

    # Final states written exactly once.
    hn_ref[...] = h
    cn_ref[...] = c


# ------------------------------- host wrapper --------------------------------

@functools.partial(jax.jit, static_argnames=("p", "training"))
def weight_drop_lstm_forward(params, x, dropout_key, *, p=0.5, training=True):
    """WeightDrop.forward: dropout(weight_hh_l0_raw) -> wrapped LSTM forward.

    x: (B, T, In), batch_first dense input.
    Returns (output (B, T, H), (h_n (1,B,H), c_n (1,B,H))).
    """
    # TODO(synk): PackedSequence inputs not supported; dense batch_first only.
    B, T, In = x.shape
    w_ih_t = params["w_ih_t"]            # (In, 4H), stored pre-transposed
    w_hh_t = params["w_hh_raw_t"]        # (H, 4H),  weight_hh_l0_raw (transposed)
    H = w_hh_t.shape[0]
    G = 4 * H
    b = (params["b_ih"] + params["b_hh"]).reshape(1, G)

    # Time-major rows so the per-step slice of xg is a contiguous sublane block.
    x2d = jnp.swapaxes(x, 0, 1).reshape(T * B, In)

    apply_dropout = bool(training) and p > 0.0
    if apply_dropout:
        assert p < 1.0, "dropout p must be < 1"
    inv_keep = (1.0 / (1.0 - float(p))) if apply_dropout else 1.0

    kern = functools.partial(_wd_lstm_kernel, T=T, B=B, H=H, p=float(p),
                             inv_keep=inv_keep, apply_dropout=apply_dropout)
    out_shapes = (jax.ShapeDtypeStruct((T * B, H), jnp.float32),   # hs (time-major)
                  jax.ShapeDtypeStruct((B, H), jnp.float32),       # h_n
                  jax.ShapeDtypeStruct((B, H), jnp.float32))       # c_n
    scratch = [pltpu.VMEM((T * B, G), jnp.float32),     # xg: hoisted input proj
               pltpu.VMEM((H, G), jnp.bfloat16)]        # masked W_hh^T (bf16 MXU)

    call = pl.pallas_call(kern, out_shape=out_shapes, scratch_shapes=scratch)
    if apply_dropout:
        # RNG stream generated with jax.random (will not match PyTorch's, as
        # expected); the mask application itself is fused in-kernel.
        u = jax.random.uniform(dropout_key, (H, G), jnp.float32)
        hs, h_n, c_n = call(u, x2d, w_ih_t, w_hh_t, b)
    else:
        hs, h_n, c_n = call(x2d, w_ih_t, w_hh_t, b)

    out = jnp.swapaxes(hs.reshape(T, B, H), 0, 1)       # back to batch_first
    return out, (h_n[None], c_n[None])


# ----------------------------- reference / init ------------------------------

def _lstm_ref(x, w_ih_t, w_hh_t, b_ih, b_hh):
    """Pure-JAX f32 reference LSTM (eval mode) for correctness check."""
    B, T, _ = x.shape
    H = w_hh_t.shape[0]

    def step(carry, xt):
        h, c = carry
        gts = xt @ w_ih_t + h @ w_hh_t + b_ih + b_hh
        i, f, g, o = jnp.split(gts, 4, axis=-1)
        c = jax.nn.sigmoid(f) * c + jax.nn.sigmoid(i) * jnp.tanh(g)
        h = jax.nn.sigmoid(o) * jnp.tanh(c)
        return (h, c), h

    init = (jnp.zeros((B, H), jnp.float32), jnp.zeros((B, H), jnp.float32))
    (h, c), hs = lax.scan(step, init, jnp.swapaxes(x, 0, 1))
    return jnp.swapaxes(hs, 0, 1), (h[None], c[None])


def init_params(key, input_size, hidden_size):
    """nn.LSTM-style U(-1/sqrt(H), 1/sqrt(H)) init; weights stored already
    transposed ((In,4H)/(H,4H)) so no per-forward transpose is needed
    (DropConnect is elementwise, so it commutes with the transpose)."""
    bound = 1.0 / float(np.sqrt(hidden_size))
    ks = jax.random.split(key, 4)

    def u(k, shape):
        return jax.random.uniform(k, shape, jnp.float32, -bound, bound)

    return {
        "w_ih_t": u(ks[0], (input_size, 4 * hidden_size)),
        "w_hh_raw_t": u(ks[1], (hidden_size, 4 * hidden_size)),  # weight_hh_l0_raw^T
        "b_ih": u(ks[2], (4 * hidden_size,)),
        "b_hh": u(ks[3], (4 * hidden_size,)),
    }


# ----------------------------------- main ------------------------------------

if __name__ == "__main__":
    B, T, IN, H = 8, 16, 64, 128          # lane/sublane-dense small shapes
    p = 0.5

    root = jax.random.PRNGKey(0)
    kx, kp, kd = jax.random.split(root, 3)
    x = jax.random.normal(kx, (B, T, IN), jnp.float32)
    params = init_params(kp, IN, H)

    # Training-mode forward: DropConnect applied to weight_hh_l0 (WeightDrop).
    out_tr, (hn_tr, cn_tr) = weight_drop_lstm_forward(params, x, kd,
                                                      p=p, training=True)
    out_tr = jax.block_until_ready(out_tr)
    assert out_tr.shape == (B, T, H), out_tr.shape
    assert hn_tr.shape == (1, B, H) and cn_tr.shape == (1, B, H)
    assert bool(jnp.all(jnp.isfinite(out_tr)))

    # Eval-mode forward (dropout is identity): check against pure-JAX reference.
    out_ev, (hn_ev, cn_ev) = weight_drop_lstm_forward(params, x, kd,
                                                      p=p, training=False)
    out_rf, (hn_rf, cn_rf) = _lstm_ref(x, params["w_ih_t"], params["w_hh_raw_t"],
                                       params["b_ih"], params["b_hh"])
    out_ev = jax.block_until_ready(out_ev)
    assert bool(jnp.allclose(out_ev, out_rf, atol=3e-2, rtol=3e-2))
    assert bool(jnp.allclose(hn_ev, hn_rf, atol=3e-2, rtol=3e-2))
    assert bool(jnp.allclose(cn_ev, cn_rf, atol=3e-2, rtol=3e-2))

    # DropConnect must actually perturb the training-mode output.
    assert not bool(jnp.allclose(out_tr, out_ev, atol=1e-3, rtol=1e-3))

    print("KERNEL_OK")
</pallas_src>

<mosaic_0001>
module attributes {stable_mosaic.version = 11 : i64} {
  func.func @_wd_lstm_kernel(%arg0: memref<128x512xf32, #tpu.memory_space<vmem>>, %arg1: memref<128x64xf32, #tpu.memory_space<vmem>>, %arg2: memref<64x512xf32, #tpu.memory_space<vmem>>, %arg3: memref<128x512xf32, #tpu.memory_space<vmem>>, %arg4: memref<1x512xf32, #tpu.memory_space<vmem>>, %arg5: memref<128x128xf32, #tpu.memory_space<vmem>>, %arg6: memref<8x128xf32, #tpu.memory_space<vmem>>, %arg7: memref<8x128xf32, #tpu.memory_space<vmem>>, %arg8: memref<128x512xf32, #tpu.memory_space<vmem>>, %arg9: memref<128x512xbf16, #tpu.memory_space<vmem>>) attributes {dimension_semantics = [], scalar_prefetch = 0 : i64, scratch_operands = 2 : i64, tpu.core_type = #tpu.core_type<tc>} {
    %c0 = arith.constant 0 : index
    %c0_0 = arith.constant 0 : index
    %0 = vector.load %arg3[%c0, %c0_0] : memref<128x512xf32, #tpu.memory_space<vmem>>, vector<128x512xf32>
    %c0_1 = arith.constant 0 : index
    %c0_2 = arith.constant 0 : index
    %1 = vector.load %arg0[%c0_1, %c0_2] : memref<128x512xf32, #tpu.memory_space<vmem>>, vector<128x512xf32>
    %cst = arith.constant 5.000000e-01 : f32
    %2 = vector.broadcast %cst : f32 to vector<128x512xf32>
    %3 = arith.cmpf oge, %1, %2 : vector<128x512xf32>
    %cst_3 = arith.constant 2.000000e+00 : f32
    %4 = vector.broadcast %cst_3 : f32 to vector<128x512xf32>
    %5 = arith.mulf %0, %4 : vector<128x512xf32>
    %cst_4 = arith.constant 0.000000e+00 : f32
    %6 = vector.broadcast %cst_4 : f32 to vector<128x512xf32>
    %7 = arith.select %3, %5, %6 : vector<128x512xi1>, vector<128x512xf32>
    %8 = arith.truncf %7 : vector<128x512xf32> to vector<128x512xbf16>
    %c0_5 = arith.constant 0 : index
    %c0_6 = arith.constant 0 : index
    %9 = vector.load %arg9[%c0_5, %c0_6] : memref<128x512xbf16, #tpu.memory_space<vmem>>, vector<128x512xbf16>
    tpu.vector_store %arg9[%c0_5, %c0_6], %8 {strides = array<i32>} : memref<128x512xbf16, #tpu.memory_space<vmem>>, vector<128x512xbf16>,
    %c0_7 = arith.constant 0 : index
    %c0_8 = arith.constant 0 : index
    %10 = vector.load %arg1[%c0_7, %c0_8] : memref<128x64xf32, #tpu.memory_space<vmem>>, vector<128x64xf32>
    %c0_9 = arith.constant 0 : index
    %c0_10 = arith.constant 0 : index
    %11 = vector.load %arg2[%c0_9, %c0_10] : memref<64x512xf32, #tpu.memory_space<vmem>>, vector<64x512xf32>
    %cst_11 = arith.constant dense<0.000000e+00> : vector<128x512xf32>
    %12 = tpu.matmul %10, %11, %cst_11 {dimension_numbers = #tpu.dot_dimension_numbers<[1], [0], [0], [1], [0, 0, 1, 1], [], []>} : vector<128x64xf32>, vector<64x512xf32>, vector<128x512xf32> -> vector<128x512xf32>
    %c0_12 = arith.constant 0 : index
    %c0_13 = arith.constant 0 : index
    %13 = vector.load %arg4[%c0_12, %c0_13] : memref<1x512xf32, #tpu.memory_space<vmem>>, vector<1x512xf32>
    %14 = vector.broadcast %13 : vector<1x512xf32> to vector<128x512xf32>
    %15 = arith.addf %12, %14 : vector<128x512xf32>
    %c0_14 = arith.constant 0 : index
    %c0_15 = arith.constant 0 : index
    %16 = vector.load %arg8[%c0_14, %c0_15] : memref<128x512xf32, #tpu.memory_space<vmem>>, vector<128x512xf32>
    tpu.vector_store %arg8[%c0_14, %c0_15], %15 {strides = array<i32>} : memref<128x512xf32, #tpu.memory_space<vmem>>, vector<128x512xf32>,
    %cst_16 = arith.constant 0.000000e+00 : f32
    %17 = vector.broadcast %cst_16 : f32 to vector<8x128xf32>
    %cst_17 = arith.constant 0.000000e+00 : f32
    %18 = vector.broadcast %cst_17 : f32 to vector<8x128xf32>
    %c0_18 = arith.constant 0 : index
    %c0_19 = arith.constant 0 : index
    %19 = vector.load %arg8[%c0_18, %c0_19] : memref<128x512xf32, #tpu.memory_space<vmem>>, vector<8x512xf32>
    %20 = arith.truncf %17 : vector<8x128xf32> to vector<8x128xbf16>
    %c0_20 = arith.constant 0 : index
    %c0_21 = arith.constant 0 : index
    %21 = vector.load %arg9[%c0_20, %c0_21] : memref<128x512xbf16, #tpu.memory_space<vmem>>, vector<128x512xbf16>
    %cst_22 = arith.constant dense<0.000000e+00> : vector<8x512xf32>
    %22 = tpu.matmul %20, %21, %cst_22 {dimension_numbers = #tpu.dot_dimension_numbers<[1], [0], [0], [1], [0, 0, 1, 1], [], []>} : vector<8x128xbf16>, vector<128x512xbf16>, vector<8x512xf32> -> vector<8x512xf32>
    %23 = arith.addf %19, %22 : vector<8x512xf32>
    %24 = vector.extract_strided_slice %23 {offsets = [0, 0], sizes = [8, 128], strides = [1, 1]} : vector<8x512xf32> to vector<8x128xf32>
    %25 = arith.negf %24 : vector<8x128xf32>
    %26 = math.exp %25 : vector<8x128xf32>
    %cst_23 = arith.constant 1.000000e+00 : f32
    %27 = vector.broadcast %cst_23 : f32 to vector<8x128xf32>
    %28 = arith.addf %27, %26 : vector<8x128xf32>
    %29 = arith.divf %27, %28 : vector<8x128xf32>
    %30 = vector.extract_strided_slice %23 {offsets = [0, 128], sizes = [8, 128], strides = [1, 1]} : vector<8x512xf32> to vector<8x128xf32>
    %31 = arith.negf %30 : vector<8x128xf32>
    %32 = math.exp %31 : vector<8x128xf32>
    %cst_24 = arith.constant 1.000000e+00 : f32
    %33 = vector.broadcast %cst_24 : f32 to vector<8x128xf32>
    %34 = arith.addf %33, %32 : vector<8x128xf32>
    %35 = arith.divf %33, %34 : vector<8x128xf32>
    %36 = vector.extract_strided_slice %23 {offsets = [0, 256], sizes = [8, 128], strides = [1, 1]} : vector<8x512xf32> to vector<8x128xf32>
    %37 = math.tanh %36 : vector<8x128xf32>
    %38 = vector.extract_strided_slice %23 {offsets = [0, 384], sizes = [8, 128], strides = [1, 1]} : vector<8x512xf32> to vector<8x128xf32>
    %39 = arith.negf %38 : vector<8x128xf32>
    %40 = math.exp %39 : vector<8x128xf32>
    %cst_25 = arith.constant 1.000000e+00 : f32
    %41 = vector.broadcast %cst_25 : f32 to vector<8x128xf32>
    %42 = arith.addf %41, %40 : vector<8x128xf32>
    %43 = arith.divf %41, %42 : vector<8x128xf32>
    %44 = arith.mulf %35, %18 : vector<8x128xf32>
    %45 = arith.mulf %29, %37 : vector<8x128xf32>
    %46 = arith.addf %44, %45 : vector<8x128xf32>
    %47 = math.tanh %46 : vector<8x128xf32>
    %48 = arith.mulf %43, %47 : vector<8x128xf32>
    %c0_26 = arith.constant 0 : index
    %c0_27 = arith.constant 0 : index
    %49 = vector.load %arg5[%c0_26, %c0_27] : memref<128x128xf32, #tpu.memory_space<vmem>>, vector<8x128xf32>
    tpu.vector_store %arg5[%c0_26, %c0_27], %48 {strides = array<i32>} : memref<128x128xf32, #tpu.memory_space<vmem>>, vector<8x128xf32>,
    %c8 = arith.constant 8 : index
    %c0_28 = arith.constant 0 : index
    %50 = vector.load %arg8[%c8, %c0_28] : memref<128x512xf32, #tpu.memory_space<vmem>>, vector<8x512xf32>
    %51 = arith.truncf %48 : vector<8x128xf32> to vector<8x128xbf16>
    %c0_29 = arith.constant 0 : index
    %c0_30 = arith.constant 0 : index
    %52 = vector.load %arg9[%c0_29, %c0_30] : memref<128x512xbf16, #tpu.memory_space<vmem>>, vector<128x512xbf16>
    %cst_31 = arith.constant dense<0.000000e+00> : vector<8x512xf32>
    %53 = tpu.matmul %51, %52, %cst_31 {dimension_numbers = #tpu.dot_dimension_numbers<[1], [0], [0], [1], [0, 0, 1, 1], [], []>} : vector<8x128xbf16>, vector<128x512xbf16>, vector<8x512xf32> -> vector<8x512xf32>
    %54 = arith.addf %50, %53 : vector<8x512xf32>
    %55 = vector.extract_strided_slice %54 {offsets = [0, 0], sizes = [8, 128], strides = [1, 1]} : vector<8x512xf32> to vector<8x128xf32>
    %56 = arith.negf %55 : vector<8x128xf32>
    %57 = math.exp %56 : vector<8x128xf32>
    %cst_32 = arith.constant 1.000000e+00 : f32
    %58 = vector.broadcast %cst_32 : f32 to vector<8x128xf32>
    %59 = arith.addf %58, %57 : vector<8x128xf32>
    %60 = arith.divf %58, %59 : vector<8x128xf32>
    %61 = vector.extract_strided_slice %54 {offsets = [0, 128], sizes = [8, 128], strides = [1, 1]} : vector<8x512xf32> to vector<8x128xf32>
    %62 = arith.negf %61 : vector<8x128xf32>
    %63 = math.exp %62 : vector<8x128xf32>
    %cst_33 = arith.constant 1.000000e+00 : f32
    %64 = vector.broadcast %cst_33 : f32 to vector<8x128xf32>
    %65 = arith.addf %64, %63 : vector<8x128xf32>
    %66 = arith.divf %64, %65 : vector<8x128xf32>
    %67 = vector.extract_strided_slice %54 {offsets = [0, 256], sizes = [8, 128], strides = [1, 1]} : vector<8x512xf32> to vector<8x128xf32>
    %68 = math.tanh %67 : vector<8x128xf32>
    %69 = vector.extract_strided_slice %54 {offsets = [0, 384], sizes = [8, 128], strides = [1, 1]} : vector<8x512xf32> to vector<8x128xf32>
    %70 = arith.negf %69 : vector<8x128xf32>
    %71 = math.exp %70 : vector<8x128xf32>
    %cst_34 = arith.constant 1.000000e+00 : f32
    %72 = vector.broadcast %cst_34 : f32 to vector<8x128xf32>
    %73 = arith.addf %72, %71 : vector<8x128xf32>
    %74 = arith.divf %72, %73 : vector<8x128xf32>
    %75 = arith.mulf %66, %46 : vector<8x128xf32>
    %76 = arith.mulf %60, %68 : vector<8x128xf32>
    %77 = arith.addf %75, %76 : vector<8x128xf32>
    %78 = math.tanh %77 : vector<8x128xf32>
    %79 = arith.mulf %74, %78 : vector<8x128xf32>
    %c8_35 = arith.constant 8 : index
    %c0_36 = arith.constant 0 : index
    %80 = vector.load %arg5[%c8_35, %c0_36] : memref<128x128xf32, #tpu.memory_space<vmem>>, vector<8x128xf32>
    tpu.vector_store %arg5[%c8_35, %c0_36], %79 {strides = array<i32>} : memref<128x128xf32, #tpu.memory_space<vmem>>, vector<8x128xf32>,
    %c16 = arith.constant 16 : index
    %c0_37 = arith.constant 0 : index
    %81 = vector.load %arg8[%c16, %c0_37] : memref<128x512xf32, #tpu.memory_space<vmem>>, vector<8x512xf32>
    %82 = arith.truncf %79 : vector<8x128xf32> to vector<8x128xbf16>
    %c0_38 = arith.constant 0 : index
    %c0_39 = arith.constant 0 : index
    %83 = vector.load %arg9[%c0_38, %c0_39] : memref<128x512xbf16, #tpu.memory_space<vmem>>, vector<128x512xbf16>
    %cst_40 = arith.constant dense<0.000000e+00> : vector<8x512xf32>
    %84 = tpu.matmul %82, %83, %cst_40 {dimension_numbers = #tpu.dot_dimension_numbers<[1], [0], [0], [1], [0, 0, 1, 1], [], []>} : vector<8x128xbf16>, vector<128x512xbf16>, vector<8x512xf32> -> vector<8x512xf32>
    %85 = arith.addf %81, %84 : vector<8x512xf32>
    %86 = vector.extract_strided_slice %85 {offsets = [0, 0], sizes = [8, 128], strides = [1, 1]} : vector<8x512xf32> to vector<8x128xf32>
    %87 = arith.negf %86 : vector<8x128xf32>
    %88 = math.exp %87 : vector<8x128xf32>
    %cst_41 = arith.constant 1.000000e+00 : f32
    %89 = vector.broadcast %cst_41 : f32 to vector<8x128xf32>
    %90 = arith.addf %89, %88 : vector<8x128xf32>
    %91 = arith.divf %89, %90 : vector<8x128xf32>
    %92 = vector.extract_strided_slice %85 {offsets = [0, 128], sizes = [8, 128], strides = [1, 1]} : vector<8x512xf32> to vector<8x128xf32>
    %93 = arith.negf %92 : vector<8x128xf32>
    %94 = math.exp %93 : vector<8x128xf32>
    %cst_42 = arith.constant 1.000000e+00 : f32
    %95 = vector.broadcast %cst_42 : f32 to vector<8x128xf32>
    %96 = arith.addf %95, %94 : vector<8x128xf32>
    %97 = arith.divf %95, %96 : vector<8x128xf32>
    %98 = vector.extract_strided_slice %85 {offsets = [0, 256], sizes = [8, 128], strides = [1, 1]} : vector<8x512xf32> to vector<8x128xf32>
    %99 = math.tanh %98 : vector<8x128xf32>
    %100 = vector.extract_strided_slice %85 {offsets = [0, 384], sizes = [8, 128], strides = [1, 1]} : vector<8x512xf32> to vector<8x128xf32>
    %101 = arith.negf %100 : vector<8x128xf32>
    %102 = math.exp %101 : vector<8x128xf32>
    %cst_43 = arith.constant 1.000000e+00 : f32
    %103 = vector.broadcast %cst_43 : f32 to vector<8x128xf32>
    %104 = arith.addf %103, %102 : vector<8x128xf32>
    %105 = arith.divf %103, %104 : vector<8x128xf32>
    %106 = arith.mulf %97, %77 : vector<8x128xf32>
    %107 = arith.mulf %91, %99 : vector<8x128xf32>
    %108 = arith.addf %106, %107 : vector<8x128xf32>
    %109 = math.tanh %108 : vector<8x128xf32>
    %110 = arith.mulf %105, %109 : vector<8x128xf32>
    %c16_44 = arith.constant 16 : index
    %c0_45 = arith.constant 0 : index
    %111 = vector.load %arg5[%c16_44, %c0_45] : memref<128x128xf32, #tpu.memory_space<vmem>>, vector<8x128xf32>
    tpu.vector_store %arg5[%c16_44, %c0_45], %110 {strides = array<i32>} : memref<128x128xf32, #tpu.memory_space<vmem>>, vector<8x128xf32>,
    %c24 = arith.constant 24 : index
    %c0_46 = arith.constant 0 : index
    %112 = vector.load %arg8[%c24, %c0_46] : memref<128x512xf32, #tpu.memory_space<vmem>>, vector<8x512xf32>
    %113 = arith.truncf %110 : vector<8x128xf32> to vector<8x128xbf16>
    %c0_47 = arith.constant 0 : index
    %c0_48 = arith.constant 0 : index
    %114 = vector.load %arg9[%c0_47, %c0_48] : memref<128x512xbf16, #tpu.memory_space<vmem>>, vector<128x512xbf16>
    %cst_49 = arith.constant dense<0.000000e+00> : vector<8x512xf32>
    %115 = tpu.matmul %113, %114, %cst_49 {dimension_numbers = #tpu.dot_dimension_numbers<[1], [0], [0], [1], [0, 0, 1, 1], [], []>} : vector<8x128xbf16>, vector<128x512xbf16>, vector<8x512xf32> -> vector<8x512xf32>
    %116 = arith.addf %112, %115 : vector<8x512xf32>
    %117 = vector.extract_strided_slice %116 {offsets = [0, 0], sizes = [8, 128], strides = [1, 1]} : vector<8x512xf32> to vector<8x128xf32>
    %118 = arith.negf %117 : vector<8x128xf32>
    %119 = math.exp %118 : vector<8x128xf32>
    %cst_50 = arith.constant 1.000000e+00 : f32
    %120 = vector.broadcast %cst_50 : f32 to vector<8x128xf32>
    %121 = arith.addf %120, %119 : vector<8x128xf32>
    %122 = arith.divf %120, %121 : vector<8x128xf32>
    %123 = vector.extract_strided_slice %116 {offsets = [0, 128], sizes = [8, 128], strides = [1, 1]} : vector<8x512xf32> to vector<8x128xf32>
    %124 = arith.negf %123 : vector<8x128xf32>
    %125 = math.exp %124 : vector<8x128xf32>
    %cst_51 = arith.constant 1.000000e+00 : f32
    %126 = vector.broadcast %cst_51 : f32 to vector<8x128xf32>
    %127 = arith.addf %126, %125 : vector<8x128xf32>
    %128 = arith.divf %126, %127 : vector<8x128xf32>
    %129 = vector.extract_strided_slice %116 {offsets = [0, 256], sizes = [8, 128], strides = [1, 1]} : vector<8x512xf32> to vector<8x128xf32>
    %130 = math.tanh %129 : vector<8x128xf32>
    %131 = vector.extract_strided_slice %116 {offsets = [0, 384], sizes = [8, 128], strides = [1, 1]} : vector<8x512xf32> to vector<8x128xf32>
    %132 = arith.negf %131 : vector<8x128xf32>
    %133 = math.exp %132 : vector<8x128xf32>
    %cst_52 = arith.constant 1.000000e+00 : f32
    %134 = vector.broadcast %cst_52 : f32 to vector<8x128xf32>
    %135 = arith.addf %134, %133 : vector<8x128xf32>
    %136 = arith.divf %134, %135 : vector<8x128xf32>
    %137 = arith.mulf %128, %108 : vector<8x128xf32>
    %138 = arith.mulf %122, %130 : vector<8x128xf32>
    %139 = arith.addf %137, %138 : vector<8x128xf32>
    %140 = math.tanh %139 : vector<8x128xf32>
    %141 = arith.mulf %136, %140 : vector<8x128xf32>
    %c24_53 = arith.constant 24 : index
    %c0_54 = arith.constant 0 : index
    %142 = vector.load %arg5[%c24_53, %c0_54] : memref<128x128xf32, #tpu.memory_space<vmem>>, vector<8x128xf32>
    tpu.vector_store %arg5[%c24_53, %c0_54], %141 {strides = array<i32>} : memref<128x128xf32, #tpu.memory_space<vmem>>, vector<8x128xf32>,
    %c32 = arith.constant 32 : index
    %c0_55 = arith.constant 0 : index
    %143 = vector.load %arg8[%c32, %c0_55] : memref<128x512xf32, #tpu.memory_space<vmem>>, vector<8x512xf32>
    %144 = arith.truncf %141 : vector<8x128xf32> to vector<8x128xbf16>
    %c0_56 = arith.constant 0 : index
    %c0_57 = arith.constant 0 : index
    %145 = vector.load %arg9[%c0_56, %c0_57] : memref<128x512xbf16, #tpu.memory_space<vmem>>, vector<128x512xbf16>
    %cst_58 = arith.constant dense<0.000000e+00> : vector<8x512xf32>
    %146 = tpu.matmul %144, %145, %cst_58 {dimension_numbers = #tpu.dot_dimension_numbers<[1], [0], [0], [1], [0, 0, 1, 1], [], []>} : vector<8x128xbf16>, vector<128x512xbf16>, vector<8x512xf32> -> vector<8x512xf32>
    %147 = arith.addf %143, %146 : vector<8x512xf32>
    %148 = vector.extract_strided_slice %147 {offsets = [0, 0], sizes = [8, 128], strides = [1, 1]} : vector<8x512xf32> to vector<8x128xf32>
    %149 = arith.negf %148 : vector<8x128xf32>
    %150 = math.exp %149 : vector<8x128xf32>
    %cst_59 = arith.constant 1.000000e+00 : f32
    %151 = vector.broadcast %cst_59 : f32 to vector<8x128xf32>
    %152 = arith.addf %151, %150 : vector<8x128xf32>
    %153 = arith.divf %151, %152 : vector<8x128xf32>
    %154 = vector.extract_strided_slice %147 {offsets = [0, 128], sizes = [8, 128], strides = [1, 1]} : vector<8x512xf32> to vector<8x128xf32>
    %155 = arith.negf %154 : vector<8x128xf32>
    %156 = math.exp %155 : vector<8x128xf32>
    %cst_60 = arith.constant 1.000000e+00 : f32
    %157 = vector.broadcast %cst_60 : f32 to vector<8x128xf32>
    %158 = arith.addf %157, %156 : vector<8x128xf32>
    %159 = arith.divf %157, %158 : vector<8x128xf32>
    %160 = vector.extract_strided_slice %147 {offsets = [0, 256], sizes = [8, 128], strides = [1, 1]} : vector<8x512xf32> to vector<8x128xf32>
    %161 = math.tanh %160 : vector<8x128xf32>
    %162 = vector.extract_strided_slice %147 {offsets = [0, 384], sizes = [8, 128], strides = [1, 1]} : vector<8x512xf32> to vector<8x128xf32>
    %163 = arith.negf %162 : vector<8x128xf32>
    %164 = math.exp %163 : vector<8x128xf32>
    %cst_61 = arith.constant 1.000000e+00 : f32
    %165 = vector.broadcast %cst_61 : f32 to vector<8x128xf32>
    %166 = arith.addf %165, %164 : vector<8x128xf32>
    %167 = arith.divf %165, %166 : vector<8x128xf32>
    %168 = arith.mulf %159, %139 : vector<8x128xf32>
    %169 = arith.mulf %153, %161 : vector<8x128xf32>
    %170 = arith.addf %168, %169 : vector<8x128xf32>
    %171 = math.tanh %170 : vector<8x128xf32>
    %172 = arith.mulf %167, %171 : vector<8x128xf32>
    %c32_62 = arith.constant 32 : index
    %c0_63 = arith.constant 0 : index
    %173 = vector.load %arg5[%c32_62, %c0_63] : memref<128x128xf32, #tpu.memory_space<vmem>>, vector<8x128xf32>
    tpu.vector_store %arg5[%c32_62, %c0_63], %172 {strides = array<i32>} : memref<128x128xf32, #tpu.memory_space<vmem>>, vector<8x128xf32>,
    %c40 = arith.constant 40 : index
    %c0_64 = arith.constant 0 : index
    %174 = vector.load %arg8[%c40, %c0_64] : memref<128x512xf32, #tpu.memory_space<vmem>>, vector<8x512xf32>
    %175 = arith.truncf %172 : vector<8x128xf32> to vector<8x128xbf16>
    %c0_65 = arith.constant 0 : index
    %c0_66 = arith.constant 0 : index
    %176 = vector.load %arg9[%c0_65, %c0_66] : memref<128x512xbf16, #tpu.memory_space<vmem>>, vector<128x512xbf16>
    %cst_67 = arith.constant dense<0.000000e+00> : vector<8x512xf32>
    %177 = tpu.matmul %175, %176, %cst_67 {dimension_numbers = #tpu.dot_dimension_numbers<[1], [0], [0], [1], [0, 0, 1, 1], [], []>} : vector<8x128xbf16>, vector<128x512xbf16>, vector<8x512xf32> -> vector<8x512xf32>
    %178 = arith.addf %174, %177 : vector<8x512xf32>
    %179 = vector.extract_strided_slice %178 {offsets = [0, 0], sizes = [8, 128], strides = [1, 1]} : vector<8x512xf32> to vector<8x128xf32>
    %180 = arith.negf %179 : vector<8x128xf32>
    %181 = math.exp %180 : vector<8x128xf32>
    %cst_68 = arith.constant 1.000000e+00 : f32
    %182 = vector.broadcast %cst_68 : f32 to vector<8x128xf32>
    %183 = arith.addf %182, %181 : vector<8x128xf32>
    %184 = arith.divf %182, %183 : vector<8x128xf32>
    %185 = vector.extract_strided_slice %178 {offsets = [0, 128], sizes = [8, 128], strides = [1, 1]} : vector<8x512xf32> to vector<8x128xf32>
    %186 = arith.negf %185 : vector<8x128xf32>
    %187 = math.exp %186 : vector<8x128xf32>
    %cst_69 = arith.constant 1.000000e+00 : f32
    %188 = vector.broadcast %cst_69 : f32 to vector<8x128xf32>
    %189 = arith.addf %188, %187 : vector<8x128xf32>
    %190 = arith.divf %188, %189 : vector<8x128xf32>
    %191 = vector.extract_strided_slice %178 {offsets = [0, 256], sizes = [8, 128], strides = [1, 1]} : vector<8x512xf32> to vector<8x128xf32>
    %192 = math.tanh %191 : vector<8x128xf32>
    %193 = vector.extract_strided_slice %178 {offsets = [0, 384], sizes = [8, 128], strides = [1, 1]} : vector<8x512xf32> to vector<8x128xf32>
    %194 = arith.negf %193 : vector<8x128xf32>
    %195 = math.exp %194 : vector<8x128xf32>
    %cst_70 = arith.constant 1.000000e+00 : f32
    %196 = vector.broadcast %cst_70 : f32 to vector<8x128xf32>
    %197 = arith.addf %196, %195 : vector<8x128xf32>
    %198 = arith.divf %196, %197 : vector<8x128xf32>
    %199 = arith.mulf %190, %170 : vector<8x128xf32>
    %200 = arith.mulf %184, %192 : vector<8x128xf32>
    %201 = arith.addf %199, %200 : vector<8x128xf32>
    %202 = math.tanh %201 : vector<8x128xf32>
    %203 = arith.mulf %198, %202 : vector<8x128xf32>
    %c40_71 = arith.constant 40 : index
    %c0_72 = arith.constant 0 : index
    %204 = vector.load %arg5[%c40_71, %c0_72] : memref<128x128xf32, #tpu.memory_space<vmem>>, vector<8x128xf32>
    tpu.vector_store %arg5[%c40_71, %c0_72], %203 {strides = array<i32>} : memref<128x128xf32, #tpu.memory_space<vmem>>, vector<8x128xf32>,
    %c48 = arith.constant 48 : index
    %c0_73 = arith.constant 0 : index
    %205 = vector.load %arg8[%c48, %c0_73] : memref<128x512xf32, #tpu.memory_space<vmem>>, vector<8x512xf32>
    %206 = arith.truncf %203 : vector<8x128xf32> to vector<8x128xbf16>
    %c0_74 = arith.constant 0 : index
    %c0_75 = arith.constant 0 : index
    %207 = vector.load %arg9[%c0_74, %c0_75] : memref<128x512xbf16, #tpu.memory_space<vmem>>, vector<128x512xbf16>
    %cst_76 = arith.constant dense<0.000000e+00> : vector<8x512xf32>
    %208 = tpu.matmul %206, %207, %cst_76 {dimension_numbers = #tpu.dot_dimension_numbers<[1], [0], [0], [1], [0, 0, 1, 1], [], []>} : vector<8x128xbf16>, vector<128x512xbf16>, vector<8x512xf32> -> vector<8x512xf32>
    %209 = arith.addf %205, %208 : vector<8x512xf32>
    %210 = vector.extract_strided_slice %209 {offsets = [0, 0], sizes = [8, 128], strides = [1, 1]} : vector<8x512xf32> to vector<8x128xf32>
    %211 = arith.negf %210 : vector<8x128xf32>
    %212 = math.exp %211 : vector<8x128xf32>
    %cst_77 = arith.constant 1.000000e+00 : f32
    %213 = vector.broadcast %cst_77 : f32 to vector<8x128xf32>
    %214 = arith.addf %213, %212 : vector<8x128xf32>
    %215 = arith.divf %213, %214 : vector<8x128xf32>
    %216 = vector.extract_strided_slice %209 {offsets = [0, 128], sizes = [8, 128], strides = [1, 1]} : vector<8x512xf32> to vector<8x128xf32>
    %217 = arith.negf %216 : vector<8x128xf32>
    %218 = math.exp %217 : vector<8x128xf32>
    %cst_78 = arith.constant 1.000000e+00 : f32
    %219 = vector.broadcast %cst_78 : f32 to vector<8x128xf32>
    %220 = arith.addf %219, %218 : vector<8x128xf32>
    %221 = arith.divf %219, %220 : vector<8x128xf32>
    %222 = vector.extract_strided_slice %209 {offsets = [0, 256], sizes = [8, 128], strides = [1, 1]} : vector<8x512xf32> to vector<8x128xf32>
    %223 = math.tanh %222 : vector<8x128xf32>
    %224 = vector.extract_strided_slice %209 {offsets = [0, 384], sizes = [8, 128], strides = [1, 1]} : vector<8x512xf32> to vector<8x128xf32>
    %225 = arith.negf %224 : vector<8x128xf32>
    %226 = math.exp %225 : vector<8x128xf32>
    %cst_79 = arith.constant 1.000000e+00 : f32
    %227 = vector.broadcast %cst_79 : f32 to vector<8x128xf32>
    %228 = arith.addf %227, %226 : vector<8x128xf32>
    %229 = arith.divf %227, %228 : vector<8x128xf32>
    %230 = arith.mulf %221, %201 : vector<8x128xf32>
    %231 = arith.mulf %215, %223 : vector<8x128xf32>
    %232 = arith.addf %230, %231 : vector<8x128xf32>
    %233 = math.tanh %232 : vector<8x128xf32>
    %234 = arith.mulf %229, %233 : vector<8x128xf32>
    %c48_80 = arith.constant 48 : index
    %c0_81 = arith.constant 0 : index
    %235 = vector.load %arg5[%c48_80, %c0_81] : memref<128x128xf32, #tpu.memory_space<vmem>>, vector<8x128xf32>
    tpu.vector_store %arg5[%c48_80, %c0_81], %234 {strides = array<i32>} : memref<128x128xf32, #tpu.memory_space<vmem>>, vector<8x128xf32>,
    %c56 = arith.constant 56 : index
    %c0_82 = arith.constant 0 : index
    %236 = vector.load %arg8[%c56, %c0_82] : memref<128x512xf32, #tpu.memory_space<vmem>>, vector<8x512xf32>
    %237 = arith.truncf %234 : vector<8x128xf32> to vector<8x128xbf16>
    %c0_83 = arith.constant 0 : index
    %c0_84 = arith.constant 0 : index
    %238 = vector.load %arg9[%c0_83, %c0_84] : memref<128x512xbf16, #tpu.memory_space<vmem>>, vector<128x512xbf16>
    %cst_85 = arith.constant dense<0.000000e+00> : vector<8x512xf32>
    %239 = tpu.matmul %237, %238, %cst_85 {dimension_numbers = #tpu.dot_dimension_numbers<[1], [0], [0], [1], [0, 0, 1, 1], [], []>} : vector<8x128xbf16>, vector<128x512xbf16>, vector<8x512xf32> -> vector<8x512xf32>
    %240 = arith.addf %236, %239 : vector<8x512xf32>
    %241 = vector.extract_strided_slice %240 {offsets = [0, 0], sizes = [8, 128], strides = [1, 1]} : vector<8x512xf32> to vector<8x128xf32>
    %242 = arith.negf %241 : vector<8x128xf32>
    %243 = math.exp %242 : vector<8x128xf32>
    %cst_86 = arith.constant 1.000000e+00 : f32
    %244 = vector.broadcast %cst_86 : f32 to vector<8x128xf32>
    %245 = arith.addf %244, %243 : vector<8x128xf32>
    %246 = arith.divf %244, %245 : vector<8x128xf32>
    %247 = vector.extract_strided_slice %240 {offsets = [0, 128], sizes = [8, 128], strides = [1, 1]} : vector<8x512xf32> to vector<8x128xf32>
    %248 = arith.negf %247 : vector<8x128xf32>
    %249 = math.exp %248 : vector<8x128xf32>
    %cst_87 = arith.constant 1.000000e+00 : f32
    %250 = vector.broadcast %cst_87 : f32 to vector<8x128xf32>
    %251 = arith.addf %250, %249 : vector<8x128xf32>
    %252 = arith.divf %250, %251 : vector<8x128xf32>
    %253 = vector.extract_strided_slice %240 {offsets = [0, 256], sizes = [8, 128], strides = [1, 1]} : vector<8x512xf32> to vector<8x128xf32>
    %254 = math.tanh %253 : vector<8x128xf32>
    %255 = vector.extract_strided_slice %240 {offsets = [0, 384], sizes = [8, 128], strides = [1, 1]} : vector<8x512xf32> to vector<8x128xf32>
    %256 = arith.negf %255 : vector<8x128xf32>
    %257 = math.exp %256 : vector<8x128xf32>
    %cst_88 = arith.constant 1.000000e+00 : f32
    %258 = vector.broadcast %cst_88 : f32 to vector<8x128xf32>
    %259 = arith.addf %258, %257 : vector<8x128xf32>
    %260 = arith.divf %258, %259 : vector<8x128xf32>
    %261 = arith.mulf %252, %232 : vector<8x128xf32>
    %262 = arith.mulf %246, %254 : vector<8x128xf32>
    %263 = arith.addf %261, %262 : vector<8x128xf32>
    %264 = math.tanh %263 : vector<8x128xf32>
    %265 = arith.mulf %260, %264 : vector<8x128xf32>
    %c56_89 = arith.constant 56 : index
    %c0_90 = arith.constant 0 : index
    %266 = vector.load %arg5[%c56_89, %c0_90] : memref<128x128xf32, #tpu.memory_space<vmem>>, vector<8x128xf32>
    tpu.vector_store %arg5[%c56_89, %c0_90], %265 {strides = array<i32>} : memref<128x128xf32, #tpu.memory_space<vmem>>, vector<8x128xf32>,
    %c64 = arith.constant 64 : index
    %c0_91 = arith.constant 0 : index
    %267 = vector.load %arg8[%c64, %c0_91] : memref<128x512xf32, #tpu.memory_space<vmem>>, vector<8x512xf32>
    %268 = arith.truncf %265 : vector<8x128xf32> to vector<8x128xbf16>
    %c0_92 = arith.constant 0 : index
    %c0_93 = arith.constant 0 : index
    %269 = vector.load %arg9[%c0_92, %c0_93] : memref<128x512xbf16, #tpu.memory_space<vmem>>, vector<128x512xbf16>
    %cst_94 = arith.constant dense<0.000000e+00> : vector<8x512xf32>
    %270 = tpu.matmul %268, %269, %cst_94 {dimension_numbers = #tpu.dot_dimension_numbers<[1], [0], [0], [1], [0, 0, 1, 1], [], []>} : vector<8x128xbf16>, vector<128x512xbf16>, vector<8x512xf32> -> vector<8x512xf32>
    %271 = arith.addf %267, %270 : vector<8x512xf32>
    %272 = vector.extract_strided_slice %271 {offsets = [0, 0], sizes = [8, 128], strides = [1, 1]} : vector<8x512xf32> to vector<8x128xf32>
    %273 = arith.negf %272 : vector<8x128xf32>
    %274 = math.exp %273 : vector<8x128xf32>
    %cst_95 = arith.constant 1.000000e+00 : f32
    %275 = vector.broadcast %cst_95 : f32 to vector<8x128xf32>
    %276 = arith.addf %275, %274 : vector<8x128xf32>
    %277 = arith.divf %275, %276 : vector<8x128xf32>
    %278 = vector.extract_strided_slice %271 {offsets = [0, 128], sizes = [8, 128], strides = [1, 1]} : vector<8x512xf32> to vector<8x128xf32>
    %279 = arith.negf %278 : vector<8x128xf32>
    %280 = math.exp %279 : vector<8x128xf32>
    %cst_96 = arith.constant 1.000000e+00 : f32
    %281 = vector.broadcast %cst_96 : f32 to vector<8x128xf32>
    %282 = arith.addf %281, %280 : vector<8x128xf32>
    %283 = arith.divf %281, %282 : vector<8x128xf32>
    %284 = vector.extract_strided_slice %271 {offsets = [0, 256], sizes = [8, 128], strides = [1, 1]} : vector<8x512xf32> to vector<8x128xf32>
    %285 = math.tanh %284 : vector<8x128xf32>
    %286 = vector.extract_strided_slice %271 {offsets = [0, 384], sizes = [8, 128], strides = [1, 1]} : vector<8x512xf32> to vector<8x128xf32>
    %287 = arith.negf %286 : vector<8x128xf32>
    %288 = math.exp %287 : vector<8x128xf32>
    %cst_97 = arith.constant 1.000000e+00 : f32
    %289 = vector.broadcast %cst_97 : f32 to vector<8x128xf32>
    %290 = arith.addf %289, %288 : vector<8x128xf32>
    %291 = arith.divf %289, %290 : vector<8x128xf32>
    %292 = arith.mulf %283, %263 : vector<8x128xf32>
    %293 = arith.mulf %277, %285 : vector<8x128xf32>
    %294 = arith.addf %292, %293 : vector<8x128xf32>
    %295 = math.tanh %294 : vector<8x128xf32>
    %296 = arith.mulf %291, %295 : vector<8x128xf32>
    %c64_98 = arith.constant 64 : index
    %c0_99 = arith.constant 0 : index
    %297 = vector.load %arg5[%c64_98, %c0_99] : memref<128x128xf32, #tpu.memory_space<vmem>>, vector<8x128xf32>
    tpu.vector_store %arg5[%c64_98, %c0_99], %296 {strides = array<i32>} : memref<128x128xf32, #tpu.memory_space<vmem>>, vector<8x128xf32>,
    %c72 = arith.constant 72 : index
    %c0_100 = arith.constant 0 : index
    %298 = vector.load %arg8[%c72, %c0_100] : memref<128x512xf32, #tpu.memory_space<vmem>>, vector<8x512xf32>
    %299 = arith.truncf %296 : vector<8x128xf32> to vector<8x128xbf16>
    %c0_101 = arith.constant 0 : index
    %c0_102 = arith.constant 0 : index
    %300 = vector.load %arg9[%c0_101, %c0_102] : memref<128x512xbf16, #tpu.memory_space<vmem>>, vector<128x512xbf16>
    %cst_103 = arith.constant dense<0.000000e+00> : vector<8x512xf32>
    %301 = tpu.matmul %299, %300, %cst_103 {dimension_numbers = #tpu.dot_dimension_numbers<[1], [0], [0], [1], [0, 0, 1, 1], [], []>} : vector<8x128xbf16>, vector<128x512xbf16>, vector<8x512xf32> -> vector<8x512xf32>
    %302 = arith.addf %298, %301 : vector<8x512xf32>
    %303 = vector.extract_strided_slice %302 {offsets = [0, 0], sizes = [8, 128], strides = [1, 1]} : vector<8x512xf32> to vector<8x128xf32>
    %304 = arith.negf %303 : vector<8x128xf32>
    %305 = math.exp %304 : vector<8x128xf32>
    %cst_104 = arith.constant 1.000000e+00 : f32
    %306 = vector.broadcast %cst_104 : f32 to vector<8x128xf32>
    %307 = arith.addf %306, %305 : vector<8x128xf32>
    %308 = arith.divf %306, %307 : vector<8x128xf32>
    %309 = vector.extract_strided_slice %302 {offsets = [0, 128], sizes = [8, 128], strides = [1, 1]} : vector<8x512xf32> to vector<8x128xf32>
    %310 = arith.negf %309 : vector<8x128xf32>
    %311 = math.exp %310 : vector<8x128xf32>
    %cst_105 = arith.constant 1.000000e+00 : f32
    %312 = vector.broadcast %cst_105 : f32 to vector<8x128xf32>
    %313 = arith.addf %312, %311 : vector<8x128xf32>
    %314 = arith.divf %312, %313 : vector<8x128xf32>
    %315 = vector.extract_strided_slice %302 {offsets = [0, 256], sizes = [8, 128], strides = [1, 1]} : vector<8x512xf32> to vector<8x128xf32>
    %316 = math.tanh %315 : vector<8x128xf32>
    %317 = vector.extract_strided_slice %302 {offsets = [0, 384], sizes = [8, 128], strides = [1, 1]} : vector<8x512xf32> to vector<8x128xf32>
    %318 = arith.negf %317 : vector<8x128xf32>
    %319 = math.exp %318 : vector<8x128xf32>
    %cst_106 = arith.constant 1.000000e+00 : f32
    %320 = vector.broadcast %cst_106 : f32 to vector<8x128xf32>
    %321 = arith.addf %320, %319 : vector<8x128xf32>
    %322 = arith.divf %320, %321 : vector<8x128xf32>
    %323 = arith.mulf %314, %294 : vector<8x128xf32>
    %324 = arith.mulf %308, %316 : vector<8x128xf32>
    %325 = arith.addf %323, %324 : vector<8x128xf32>
    %326 = math.tanh %325 : vector<8x128xf32>
    %327 = arith.mulf %322, %326 : vector<8x128xf32>
    %c72_107 = arith.constant 72 : index
    %c0_108 = arith.constant 0 : index
    %328 = vector.load %arg5[%c72_107, %c0_108] : memref<128x128xf32, #tpu.memory_space<vmem>>, vector<8x128xf32>
    tpu.vector_store %arg5[%c72_107, %c0_108], %327 {strides = array<i32>} : memref<128x128xf32, #tpu.memory_space<vmem>>, vector<8x128xf32>,
    %c80 = arith.constant 80 : index
    %c0_109 = arith.constant 0 : index
    %329 = vector.load %arg8[%c80, %c0_109] : memref<128x512xf32, #tpu.memory_space<vmem>>, vector<8x512xf32>
    %330 = arith.truncf %327 : vector<8x128xf32> to vector<8x128xbf16>
    %c0_110 = arith.constant 0 : index
    %c0_111 = arith.constant 0 : index
    %331 = vector.load %arg9[%c0_110, %c0_111] : memref<128x512xbf16, #tpu.memory_space<vmem>>, vector<128x512xbf16>
    %cst_112 = arith.constant dense<0.000000e+00> : vector<8x512xf32>
    %332 = tpu.matmul %330, %331, %cst_112 {dimension_numbers = #tpu.dot_dimension_numbers<[1], [0], [0], [1], [0, 0, 1, 1], [], []>} : vector<8x128xbf16>, vector<128x512xbf16>, vector<8x512xf32> -> vector<8x512xf32>
    %333 = arith.addf %329, %332 : vector<8x512xf32>
    %334 = vector.extract_strided_slice %333 {offsets = [0, 0], sizes = [8, 128], strides = [1, 1]} : vector<8x512xf32> to vector<8x128xf32>
    %335 = arith.negf %334 : vector<8x128xf32>
    %336 = math.exp %335 : vector<8x128xf32>
    %cst_113 = arith.constant 1.000000e+00 : f32
    %337 = vector.broadcast %cst_113 : f32 to vector<8x128xf32>
    %338 = arith.addf %337, %336 : vector<8x128xf32>
    %339 = arith.divf %337, %338 : vector<8x128xf32>
    %340 = vector.extract_strided_slice %333 {offsets = [0, 128], sizes = [8, 128], strides = [1, 1]} : vector<8x512xf32> to vector<8x128xf32>
    %341 = arith.negf %340 : vector<8x128xf32>
    %342 = math.exp %341 : vector<8x128xf32>
    %cst_114 = arith.constant 1.000000e+00 : f32
    %343 = vector.broadcast %cst_114 : f32 to vector<8x128xf32>
    %344 = arith.addf %343, %342 : vector<8x128xf32>
    %345 = arith.divf %343, %344 : vector<8x128xf32>
    %346 = vector.extract_strided_slice %333 {offsets = [0, 256], sizes = [8, 128], strides = [1, 1]} : vector<8x512xf32> to vector<8x128xf32>
    %347 = math.tanh %346 : vector<8x128xf32>
    %348 = vector.extract_strided_slice %333 {offsets = [0, 384], sizes = [8, 128], strides = [1, 1]} : vector<8x512xf32> to vector<8x128xf32>
    %349 = arith.negf %348 : vector<8x128xf32>
    %350 = math.exp %349 : vector<8x128xf32>
    %cst_115 = arith.constant 1.000000e+00 : f32
    %351 = vector.broadcast %cst_115 : f32 to vector<8x128xf32>
    %352 = arith.addf %351, %350 : vector<8x128xf32>
    %353 = arith.divf %351, %352 : vector<8x128xf32>
    %354 = arith.mulf %345, %325 : vector<8x128xf32>
    %355 = arith.mulf %339, %347 : vector<8x128xf32>
    %356 = arith.addf %354, %355 : vector<8x128xf32>
    %357 = math.tanh %356 : vector<8x128xf32>
    %358 = arith.mulf %353, %357 : vector<8x128xf32>
    %c80_116 = arith.constant 80 : index
    %c0_117 = arith.constant 0 : index
    %359 = vector.load %arg5[%c80_116, %c0_117] : memref<128x128xf32, #tpu.memory_space<vmem>>, vector<8x128xf32>
    tpu.vector_store %arg5[%c80_116, %c0_117], %358 {strides = array<i32>} : memref<128x128xf32, #tpu.memory_space<vmem>>, vector<8x128xf32>,
    %c88 = arith.constant 88 : index
    %c0_118 = arith.constant 0 : index
    %360 = vector.load %arg8[%c88, %c0_118] : memref<128x512xf32, #tpu.memory_space<vmem>>, vector<8x512xf32>
    %361 = arith.truncf %358 : vector<8x128xf32> to vector<8x128xbf16>
    %c0_119 = arith.constant 0 : index
    %c0_120 = arith.constant 0 : index
    %362 = vector.load %arg9[%c0_119, %c0_120] : memref<128x512xbf16, #tpu.memory_space<vmem>>, vector<128x512xbf16>
    %cst_121 = arith.constant dense<0.000000e+00> : vector<8x512xf32>
    %363 = tpu.matmul %361, %362, %cst_121 {dimension_numbers = #tpu.dot_dimension_numbers<[1], [0], [0], [1], [0, 0, 1, 1], [], []>} : vector<8x128xbf16>, vector<128x512xbf16>, vector<8x512xf32> -> vector<8x512xf32>
    %364 = arith.addf %360, %363 : vector<8x512xf32>
    %365 = vector.extract_strided_slice %364 {offsets = [0, 0], sizes = [8, 128], strides = [1, 1]} : vector<8x512xf32> to vector<8x128xf32>
    %366 = arith.negf %365 : vector<8x128xf32>
    %367 = math.exp %366 : vector<8x128xf32>
    %cst_122 = arith.constant 1.000000e+00 : f32
    %368 = vector.broadcast %cst_122 : f32 to vector<8x128xf32>
    %369 = arith.addf %368, %367 : vector<8x128xf32>
    %370 = arith.divf %368, %369 : vector<8x128xf32>
    %371 = vector.extract_strided_slice %364 {offsets = [0, 128], sizes = [8, 128], strides = [1, 1]} : vector<8x512xf32> to vector<8x128xf32>
    %372 = arith.negf %371 : vector<8x128xf32>
    %373 = math.exp %372 : vector<8x128xf32>
    %cst_123 = arith.constant 1.000000e+00 : f32
    %374 = vector.broadcast %cst_123 : f32 to vector<8x128xf32>
    %375 = arith.addf %374, %373 : vector<8x128xf32>
    %376 = arith.divf %374, %375 : vector<8x128xf32>
    %377 = vector.extract_strided_slice %364 {offsets = [0, 256], sizes = [8, 128], strides = [1, 1]} : vector<8x512xf32> to vector<8x128xf32>
    %378 = math.tanh %377 : vector<8x128xf32>
    %379 = vector.extract_strided_slice %364 {offsets = [0, 384], sizes = [8, 128], strides = [1, 1]} : vector<8x512xf32> to vector<8x128xf32>
    %380 = arith.negf %379 : vector<8x128xf32>
    %381 = math.exp %380 : vector<8x128xf32>
    %cst_124 = arith.constant 1.000000e+00 : f32
    %382 = vector.broadcast %cst_124 : f32 to vector<8x128xf32>
    %383 = arith.addf %382, %381 : vector<8x128xf32>
    %384 = arith.divf %382, %383 : vector<8x128xf32>
    %385 = arith.mulf %376, %356 : vector<8x128xf32>
    %386 = arith.mulf %370, %378 : vector<8x128xf32>
    %387 = arith.addf %385, %386 : vector<8x128xf32>
    %388 = math.tanh %387 : vector<8x128xf32>
    %389 = arith.mulf %384, %388 : vector<8x128xf32>
    %c88_125 = arith.constant 88 : index
    %c0_126 = arith.constant 0 : index
    %390 = vector.load %arg5[%c88_125, %c0_126] : memref<128x128xf32, #tpu.memory_space<vmem>>, vector<8x128xf32>
    tpu.vector_store %arg5[%c88_125, %c0_126], %389 {strides = array<i32>} : memref<128x128xf32, #tpu.memory_space<vmem>>, vector<8x128xf32>,
    %c96 = arith.constant 96 : index
    %c0_127 = arith.constant 0 : index
    %391 = vector.load %arg8[%c96, %c0_127] : memref<128x512xf32, #tpu.memory_space<vmem>>, vector<8x512xf32>
    %392 = arith.truncf %389 : vector<8x128xf32> to vector<8x128xbf16>
    %c0_128 = arith.constant 0 : index
    %c0_129 = arith.constant 0 : index
    %393 = vector.load %arg9[%c0_128, %c0_129] : memref<128x512xbf16, #tpu.memory_space<vmem>>, vector<128x512xbf16>
    %cst_130 = arith.constant dense<0.000000e+00> : vector<8x512xf32>
    %394 = tpu.matmul %392, %393, %cst_130 {dimension_numbers = #tpu.dot_dimension_numbers<[1], [0], [0], [1], [0, 0, 1, 1], [], []>} : vector<8x128xbf16>, vector<128x512xbf16>, vector<8x512xf32> -> vector<8x512xf32>
    %395 = arith.addf %391, %394 : vector<8x512xf32>
    %396 = vector.extract_strided_slice %395 {offsets = [0, 0], sizes = [8, 128], strides = [1, 1]} : vector<8x512xf32> to vector<8x128xf32>
    %397 = arith.negf %396 : vector<8x128xf32>
    %398 = math.exp %397 : vector<8x128xf32>
    %cst_131 = arith.constant 1.000000e+00 : f32
    %399 = vector.broadcast %cst_131 : f32 to vector<8x128xf32>
    %400 = arith.addf %399, %398 : vector<8x128xf32>
    %401 = arith.divf %399, %400 : vector<8x128xf32>
    %402 = vector.extract_strided_slice %395 {offsets = [0, 128], sizes = [8, 128], strides = [1, 1]} : vector<8x512xf32> to vector<8x128xf32>
    %403 = arith.negf %402 : vector<8x128xf32>
    %404 = math.exp %403 : vector<8x128xf32>
    %cst_132 = arith.constant 1.000000e+00 : f32
    %405 = vector.broadcast %cst_132 : f32 to vector<8x128xf32>
    %406 = arith.addf %405, %404 : vector<8x128xf32>
    %407 = arith.divf %405, %406 : vector<8x128xf32>
    %408 = vector.extract_strided_slice %395 {offsets = [0, 256], sizes = [8, 128], strides = [1, 1]} : vector<8x512xf32> to vector<8x128xf32>
    %409 = math.tanh %408 : vector<8x128xf32>
    %410 = vector.extract_strided_slice %395 {offsets = [0, 384], sizes = [8, 128], strides = [1, 1]} : vector<8x512xf32> to vector<8x128xf32>
    %411 = arith.negf %410 : vector<8x128xf32>
    %412 = math.exp %411 : vector<8x128xf32>
    %cst_133 = arith.constant 1.000000e+00 : f32
    %413 = vector.broadcast %cst_133 : f32 to vector<8x128xf32>
    %414 = arith.addf %413, %412 : vector<8x128xf32>
    %415 = arith.divf %413, %414 : vector<8x128xf32>
    %416 = arith.mulf %407, %387 : vector<8x128xf32>
    %417 = arith.mulf %401, %409 : vector<8x128xf32>
    %418 = arith.addf %416, %417 : vector<8x128xf32>
    %419 = math.tanh %418 : vector<8x128xf32>
    %420 = arith.mulf %415, %419 : vector<8x128xf32>
    %c96_134 = arith.constant 96 : index
    %c0_135 = arith.constant 0 : index
    %421 = vector.load %arg5[%c96_134, %c0_135] : memref<128x128xf32, #tpu.memory_space<vmem>>, vector<8x128xf32>
    tpu.vector_store %arg5[%c96_134, %c0_135], %420 {strides = array<i32>} : memref<128x128xf32, #tpu.memory_space<vmem>>, vector<8x128xf32>,
    %c104 = arith.constant 104 : index
    %c0_136 = arith.constant 0 : index
    %422 = vector.load %arg8[%c104, %c0_136] : memref<128x512xf32, #tpu.memory_space<vmem>>, vector<8x512xf32>
    %423 = arith.truncf %420 : vector<8x128xf32> to vector<8x128xbf16>
    %c0_137 = arith.constant 0 : index
    %c0_138 = arith.constant 0 : index
    %424 = vector.load %arg9[%c0_137, %c0_138] : memref<128x512xbf16, #tpu.memory_space<vmem>>, vector<128x512xbf16>
    %cst_139 = arith.constant dense<0.000000e+00> : vector<8x512xf32>
    %425 = tpu.matmul %423, %424, %cst_139 {dimension_numbers = #tpu.dot_dimension_numbers<[1], [0], [0], [1], [0, 0, 1, 1], [], []>} : vector<8x128xbf16>, vector<128x512xbf16>, vector<8x512xf32> -> vector<8x512xf32>
    %426 = arith.addf %422, %425 : vector<8x512xf32>
    %427 = vector.extract_strided_slice %426 {offsets = [0, 0], sizes = [8, 128], strides = [1, 1]} : vector<8x512xf32> to vector<8x128xf32>
    %428 = arith.negf %427 : vector<8x128xf32>
    %429 = math.exp %428 : vector<8x128xf32>
    %cst_140 = arith.constant 1.000000e+00 : f32
    %430 = vector.broadcast %cst_140 : f32 to vector<8x128xf32>
    %431 = arith.addf %430, %429 : vector<8x128xf32>
    %432 = arith.divf %430, %431 : vector<8x128xf32>
    %433 = vector.extract_strided_slice %426 {offsets = [0, 128], sizes = [8, 128], strides = [1, 1]} : vector<8x512xf32> to vector<8x128xf32>
    %434 = arith.negf %433 : vector<8x128xf32>
    %435 = math.exp %434 : vector<8x128xf32>
    %cst_141 = arith.constant 1.000000e+00 : f32
    %436 = vector.broadcast %cst_141 : f32 to vector<8x128xf32>
    %437 = arith.addf %436, %435 : vector<8x128xf32>
    %438 = arith.divf %436, %437 : vector<8x128xf32>
    %439 = vector.extract_strided_slice %426 {offsets = [0, 256], sizes = [8, 128], strides = [1, 1]} : vector<8x512xf32> to vector<8x128xf32>
    %440 = math.tanh %439 : vector<8x128xf32>
    %441 = vector.extract_strided_slice %426 {offsets = [0, 384], sizes = [8, 128], strides = [1, 1]} : vector<8x512xf32> to vector<8x128xf32>
    %442 = arith.negf %441 : vector<8x128xf32>
    %443 = math.exp %442 : vector<8x128xf32>
    %cst_142 = arith.constant 1.000000e+00 : f32
    %444 = vector.broadcast %cst_142 : f32 to vector<8x128xf32>
    %445 = arith.addf %444, %443 : vector<8x128xf32>
    %446 = arith.divf %444, %445 : vector<8x128xf32>
    %447 = arith.mulf %438, %418 : vector<8x128xf32>
    %448 = arith.mulf %432, %440 : vector<8x128xf32>
    %449 = arith.addf %447, %448 : vector<8x128xf32>
    %450 = math.tanh %449 : vector<8x128xf32>
    %451 = arith.mulf %446, %450 : vector<8x128xf32>
    %c104_143 = arith.constant 104 : index
    %c0_144 = arith.constant 0 : index
    %452 = vector.load %arg5[%c104_143, %c0_144] : memref<128x128xf32, #tpu.memory_space<vmem>>, vector<8x128xf32>
    tpu.vector_store %arg5[%c104_143, %c0_144], %451 {strides = array<i32>} : memref<128x128xf32, #tpu.memory_space<vmem>>, vector<8x128xf32>,
    %c112 = arith.constant 112 : index
    %c0_145 = arith.constant 0 : index
    %453 = vector.load %arg8[%c112, %c0_145] : memref<128x512xf32, #tpu.memory_space<vmem>>, vector<8x512xf32>
    %454 = arith.truncf %451 : vector<8x128xf32> to vector<8x128xbf16>
    %c0_146 = arith.constant 0 : index
    %c0_147 = arith.constant 0 : index
    %455 = vector.load %arg9[%c0_146, %c0_147] : memref<128x512xbf16, #tpu.memory_space<vmem>>, vector<128x512xbf16>
    %cst_148 = arith.constant dense<0.000000e+00> : vector<8x512xf32>
    %456 = tpu.matmul %454, %455, %cst_148 {dimension_numbers = #tpu.dot_dimension_numbers<[1], [0], [0], [1], [0, 0, 1, 1], [], []>} : vector<8x128xbf16>, vector<128x512xbf16>, vector<8x512xf32> -> vector<8x512xf32>
    %457 = arith.addf %453, %456 : vector<8x512xf32>
    %458 = vector.extract_strided_slice %457 {offsets = [0, 0], sizes = [8, 128], strides = [1, 1]} : vector<8x512xf32> to vector<8x128xf32>
    %459 = arith.negf %458 : vector<8x128xf32>
    %460 = math.exp %459 : vector<8x128xf32>
    %cst_149 = arith.constant 1.000000e+00 : f32
    %461 = vector.broadcast %cst_149 : f32 to vector<8x128xf32>
    %462 = arith.addf %461, %460 : vector<8x128xf32>
    %463 = arith.divf %461, %462 : vector<8x128xf32>
    %464 = vector.extract_strided_slice %457 {offsets = [0, 128], sizes = [8, 128], strides = [1, 1]} : vector<8x512xf32> to vector<8x128xf32>
    %465 = arith.negf %464 : vector<8x128xf32>
    %466 = math.exp %465 : vector<8x128xf32>
    %cst_150 = arith.constant 1.000000e+00 : f32
    %467 = vector.broadcast %cst_150 : f32 to vector<8x128xf32>
    %468 = arith.addf %467, %466 : vector<8x128xf32>
    %469 = arith.divf %467, %468 : vector<8x128xf32>
    %470 = vector.extract_strided_slice %457 {offsets = [0, 256], sizes = [8, 128], strides = [1, 1]} : vector<8x512xf32> to vector<8x128xf32>
    %471 = math.tanh %470 : vector<8x128xf32>
    %472 = vector.extract_strided_slice %457 {offsets = [0, 384], sizes = [8, 128], strides = [1, 1]} : vector<8x512xf32> to vector<8x128xf32>
    %473 = arith.negf %472 : vector<8x128xf32>
    %474 = math.exp %473 : vector<8x128xf32>
    %cst_151 = arith.constant 1.000000e+00 : f32
    %475 = vector.broadcast %cst_151 : f32 to vector<8x128xf32>
    %476 = arith.addf %475, %474 : vector<8x128xf32>
    %477 = arith.divf %475, %476 : vector<8x128xf32>
    %478 = arith.mulf %469, %449 : vector<8x128xf32>
    %479 = arith.mulf %463, %471 : vector<8x128xf32>
    %480 = arith.addf %478, %479 : vector<8x128xf32>
    %481 = math.tanh %480 : vector<8x128xf32>
    %482 = arith.mulf %477, %481 : vector<8x128xf32>
    %c112_152 = arith.constant 112 : index
    %c0_153 = arith.constant 0 : index
    %483 = vector.load %arg5[%c112_152, %c0_153] : memref<128x128xf32, #tpu.memory_space<vmem>>, vector<8x128xf32>
    tpu.vector_store %arg5[%c112_152, %c0_153], %482 {strides = array<i32>} : memref<128x128xf32, #tpu.memory_space<vmem>>, vector<8x128xf32>,
    %c120 = arith.constant 120 : index
    %c0_154 = arith.constant 0 : index
    %484 = vector.load %arg8[%c120, %c0_154] : memref<128x512xf32, #tpu.memory_space<vmem>>, vector<8x512xf32>
    %485 = arith.truncf %482 : vector<8x128xf32> to vector<8x128xbf16>
    %c0_155 = arith.constant 0 : index
    %c0_156 = arith.constant 0 : index
    %486 = vector.load %arg9[%c0_155, %c0_156] : memref<128x512xbf16, #tpu.memory_space<vmem>>, vector<128x512xbf16>
    %cst_157 = arith.constant dense<0.000000e+00> : vector<8x512xf32>
    %487 = tpu.matmul %485, %486, %cst_157 {dimension_numbers = #tpu.dot_dimension_numbers<[1], [0], [0], [1], [0, 0, 1, 1], [], []>} : vector<8x128xbf16>, vector<128x512xbf16>, vector<8x512xf32> -> vector<8x512xf32>
    %488 = arith.addf %484, %487 : vector<8x512xf32>
    %489 = vector.extract_strided_slice %488 {offsets = [0, 0], sizes = [8, 128], strides = [1, 1]} : vector<8x512xf32> to vector<8x128xf32>
    %490 = arith.negf %489 : vector<8x128xf32>
    %491 = math.exp %490 : vector<8x128xf32>
    %cst_158 = arith.constant 1.000000e+00 : f32
    %492 = vector.broadcast %cst_158 : f32 to vector<8x128xf32>
    %493 = arith.addf %492, %491 : vector<8x128xf32>
    %494 = arith.divf %492, %493 : vector<8x128xf32>
    %495 = vector.extract_strided_slice %488 {offsets = [0, 128], sizes = [8, 128], strides = [1, 1]} : vector<8x512xf32> to vector<8x128xf32>
    %496 = arith.negf %495 : vector<8x128xf32>
    %497 = math.exp %496 : vector<8x128xf32>
    %cst_159 = arith.constant 1.000000e+00 : f32
    %498 = vector.broadcast %cst_159 : f32 to vector<8x128xf32>
    %499 = arith.addf %498, %497 : vector<8x128xf32>
    %500 = arith.divf %498, %499 : vector<8x128xf32>
    %501 = vector.extract_strided_slice %488 {offsets = [0, 256], sizes = [8, 128], strides = [1, 1]} : vector<8x512xf32> to vector<8x128xf32>
    %502 = math.tanh %501 : vector<8x128xf32>
    %503 = vector.extract_strided_slice %488 {offsets = [0, 384], sizes = [8, 128], strides = [1, 1]} : vector<8x512xf32> to vector<8x128xf32>
    %504 = arith.negf %503 : vector<8x128xf32>
    %505 = math.exp %504 : vector<8x128xf32>
    %cst_160 = arith.constant 1.000000e+00 : f32
    %506 = vector.broadcast %cst_160 : f32 to vector<8x128xf32>
    %507 = arith.addf %506, %505 : vector<8x128xf32>
    %508 = arith.divf %506, %507 : vector<8x128xf32>
    %509 = arith.mulf %500, %480 : vector<8x128xf32>
    %510 = arith.mulf %494, %502 : vector<8x128xf32>
    %511 = arith.addf %509, %510 : vector<8x128xf32>
    %512 = math.tanh %511 : vector<8x128xf32>
    %513 = arith.mulf %508, %512 : vector<8x128xf32>
    %c120_161 = arith.constant 120 : index
    %c0_162 = arith.constant 0 : index
    %514 = vector.load %arg5[%c120_161, %c0_162] : memref<128x128xf32, #tpu.memory_space<vmem>>, vector<8x128xf32>
    tpu.vector_store %arg5[%c120_161, %c0_162], %513 {strides = array<i32>} : memref<128x128xf32, #tpu.memory_space<vmem>>, vector<8x128xf32>,
    %c0_163 = arith.constant 0 : index
    %c0_164 = arith.constant 0 : index
    %515 = vector.load %arg6[%c0_163, %c0_164] : memref<8x128xf32, #tpu.memory_space<vmem>>, vector<8x128xf32>
    tpu.vector_store %arg6[%c0_163, %c0_164], %513 {strides = array<i32>} : memref<8x128xf32, #tpu.memory_space<vmem>>, vector<8x128xf32>,
    %c0_165 = arith.constant 0 : index
    %c0_166 = arith.constant 0 : index
    %516 = vector.load %arg7[%c0_165, %c0_166] : memref<8x128xf32, #tpu.memory_space<vmem>>, vector<8x128xf32>
    tpu.vector_store %arg7[%c0_165, %c0_166], %511 {strides = array<i32>} : memref<8x128xf32, #tpu.memory_space<vmem>>, vector<8x128xf32>,
    return
  }
}

</mosaic_0001>

<bundles_post_ra>
// kernel: weight_drop_lstm_forward.1
= control target key start
LH: loop header
LB: loop body
LE: loop exit
PB: predicated region body
PF: predicated region fallthrough
CT: control target
= control target key end

     0   :  { %13 = vsyncpa [#allocation5], 0  ;;  %vm11358_vm4 = vcmask 523264   ;;  %v11538_v46 = vmov 0  ;;  %v11383_v51 = vmov 0.0   ;;  %v11542_v57 = vmov 0  ;;  %s11344_s0 = inlined_call_operand.vmem [shape: f32[128,512], index: 0, kind: input, shape index: {}]   ;;  %s11345_s1 = inlined_call_operand.vmem [shape: f32[128,64], index: 1, kind: input, shape index: {}]   ;;  %s11346_s2 = inlined_call_operand.vmem [shape: f32[64,512], index: 2, kind: input, shape index: {}]   ;;  %s11347_s3 = inlined_call_operand.vmem [shape: f32[128,512], index: 3, kind: input, shape index: {}]   ;;  %s11348_s4 = inlined_call_operand.vmem [shape: f32[1,512], index: 4, kind: input, shape index: {}]   ;;  %s11349_s5 = inlined_call_operand.vmem [shape: f32[128,128], index: 5, kind: output, shape index: {0}]   ;;  %s11350_s6 = inlined_call_operand.hbm [shape: f32[8,128], index: 6, kind: output, shape index: {1}]   ;;  %s11351_s7 = inlined_call_operand.hbm [shape: f32[8,128], index: 7, kind: output, shape index: {2}]  }
   0x1   :  { %v615_v0 = vld [vmem:[%s11346_s2 + $0xe8] sm:$0xff]  ;;  %v617_v1 = vld [vmem:[%s11346_s2 + $0xf8] sm:$0xff]  ;;  %v614_v2 = vld [vmem:[%s11346_s2 + $0xe0] sm:$0xff]  ;;  %753 = vmatprep.mubr.f32.mxu0 %v11383_v51  ;;  %914 = vmatprep.mubr.f32.mxu1 %v11383_v51  ;;  %v11544_v63 = vmov 0 }
   0x2   :  { %705 = vmatprep.subr.mxu0 %v615_v0  ;;  %866 = vmatprep.subr.mxu1 %v617_v1  ;;  %v616_v3 = vld [vmem:[%s11346_s2 + $0xf0] sm:$0xff]  ;;  %v611_v4 = vld [vmem:[%s11346_s2 + $0xc8] sm:$0xff]  ;;  %v613_v5 = vld [vmem:[%s11346_s2 + $0xd8] sm:$0xff] }
   0x3   :  { %706 = vmatpush1.msra.mxu0 %v614_v2  ;;  %867 = vmatpush1.msra.mxu1 %v616_v3  ;;  %v610_v6 = vld [vmem:[%s11346_s2 + $0xc0] sm:$0xff]  ;;  %v612_v7 = vld [vmem:[%s11346_s2 + $0xd0] sm:$0xff]  ;;  %v607_v8 = vld [vmem:[%s11346_s2 + $0xa8] sm:$0xff]  ;;  %v11546_v2 = vmov 0 }
   0x4   :  { %707 = vmatprep.subr.mxu0 %v611_v4  ;;  %868 = vmatprep.subr.mxu1 %v613_v5  ;;  %v609_v9 = vld [vmem:[%s11346_s2 + $0xb8] sm:$0xff]  ;;  %v606_v10 = vld [vmem:[%s11346_s2 + $0xa0] sm:$0xff]  ;;  %v608_v11 = vld [vmem:[%s11346_s2 + $0xb0] sm:$0xff] }
   0x5   :  { %708 = vmatpush1.msra.mxu0 %v610_v6  ;;  %869 = vmatpush1.msra.mxu1 %v612_v7  ;;  %v603_v12 = vld [vmem:[%s11346_s2 + $0x88] sm:$0xff]  ;;  %v605_v13 = vld [vmem:[%s11346_s2 + $0x98] sm:$0xff]  ;;  %v602_v14 = vld [vmem:[%s11346_s2 + $0x80] sm:$0xff] }
   0x6   :  { %709 = vmatprep.subr.mxu0 %v607_v8  ;;  %870 = vmatprep.subr.mxu1 %v609_v9  ;;  %v604_v15 = vld [vmem:[%s11346_s2 + $0x90] sm:$0xff]  ;;  %v599_v16 = vld [vmem:[%s11346_s2 + $0x68] sm:$0xff]  ;;  %v601_v17 = vld [vmem:[%s11346_s2 + $0x78] sm:$0xff] }
   0x7   :  { %710 = vmatpush1.msra.mxu0 %v606_v10  ;;  %871 = vmatpush1.msra.mxu1 %v608_v11  ;;  %v598_v18 = vld [vmem:[%s11346_s2 + $0x60] sm:$0xff]  ;;  %v600_v19 = vld [vmem:[%s11346_s2 + $0x70] sm:$0xff]  ;;  %v595_v20 = vld [vmem:[%s11346_s2 + $0x48] sm:$0xff] }
   0x8   :  { %711 = vmatprep.subr.mxu0 %v603_v12  ;;  %872 = vmatprep.subr.mxu1 %v605_v13  ;;  %v597_v21 = vld [vmem:[%s11346_s2 + $0x58] sm:$0xff]  ;;  %v594_v22 = vld [vmem:[%s11346_s2 + $0x40] sm:$0xff]  ;;  %v596_v23 = vld [vmem:[%s11346_s2 + $0x50] sm:$0xff] }
   0x9   :  { %712 = vmatpush1.msra.mxu0 %v602_v14  ;;  %873 = vmatpush1.msra.mxu1 %v604_v15  ;;  %v591_v24 = vld [vmem:[%s11346_s2 + $0x28] sm:$0xff]  ;;  %v593_v25 = vld [vmem:[%s11346_s2 + $0x38] sm:$0xff]  ;;  %v590_v26 = vld [vmem:[%s11346_s2 + $0x20] sm:$0xff] }
   0xa   :  { %713 = vmatprep.subr.mxu0 %v599_v16  ;;  %874 = vmatprep.subr.mxu1 %v601_v17  ;;  %v592_v27 = vld [vmem:[%s11346_s2 + $0x30] sm:$0xff]  ;;  %v587_v28 = vld [vmem:[%s11346_s2 + $0x8] sm:$0xff]  ;;  %v589_v29 = vld [vmem:[%s11346_s2 + $0x18] sm:$0xff]  ;;  %v11548_v17 = vmov 0 }
   0xb   :  { %714 = vmatpush1.msra.mxu0 %v598_v18  ;;  %875 = vmatpush1.msra.mxu1 %v600_v19  ;;  %v83_v30 = vld [vmem:[%s11347_s3 + $0x1c8] sm:$0xff]  ;;  %v82_v36 = vld [vmem:[%s11347_s3 + $0x1c0] sm:$0xff]  ;;  %v588_v43 = vld [vmem:[%s11346_s2 + $0x10] sm:$0xff] }
   0xc   :  { %715 = vmatprep.subr.mxu0 %v595_v20  ;;  %876 = vmatprep.subr.mxu1 %v597_v21  ;;  %v87_v31 = vld [vmem:[%s11347_s3 + $0x1e8] sm:$0xff]  ;;  %v275_v34 = vmul.f32 2.0, %v83_v30  ;;  %v86_v37 = vld [vmem:[%s11347_s3 + $0x1e0] sm:$0xff]  ;;  %v274_v41 = vmul.f32 2.0, %v82_v36  ;;  %v572_v11 = vld [vmem:[%s11345_s1 + $0x10] sm:$0xff] }
   0xd   :  { %v147_v32 = vld [vmem:[%s11344_s0 + $0x1c8] sm:$0xff]  ;;  %716 = vmatpush1.msra.mxu0 %v594_v22  ;;  %877 = vmatpush1.msra.mxu1 %v596_v23  ;;  %v279_v35 = vmul.f32 2.0, %v87_v31  ;;  %v586_v38 = vld [vmem:[%s11346_s2] sm:$0xff]  ;;  %v278_v42 = vmul.f32 2.0, %v86_v37  ;;  %v85_v16 = vld [vmem:[%s11347_s3 + $0x1d8] sm:$0xff]  ;;  %v11550_v22 = vmov 0 }
   0xe   :  { %v151_v33 = vld [vmem:[%s11344_s0 + $0x1e8] sm:$0xff]  ;;  %vm211_vm0 = vcmp.ge.f32.partialorder %v147_v32, 0.5  ;;  %717 = vmatprep.subr.mxu0 %v591_v24  ;;  %878 = vmatprep.subr.mxu1 %v593_v25  ;;  %v146_v39 = vld [vmem:[%s11344_s0 + $0x1c0] sm:$0xff]  ;;  %v89_v19 = vld [vmem:[%s11347_s3 + $0x1f8] sm:$0xff]  ;;  %v277_v21 = vmul.f32 2.0, %v85_v16  ;;  %v11552_v32 = vmov 0 }
   0xf   :  { %vm215_vm1 = vcmp.ge.f32.partialorder %v151_v33, 0.5  ;;  %v150_v40 = vld [vmem:[%s11344_s0 + $0x1e0] sm:$0xff]  ;;  %718 = vmatpush1.msra.mxu0 %v590_v26  ;;  %879 = vmatpush1.msra.mxu1 %v592_v27  ;;  %vm210_vm2 = vcmp.ge.f32.partialorder %v146_v39, 0.5  ;;  %v75_v45 = vld [vmem:[%s11347_s3 + $0x188] sm:$0xff]  ;;  %v8740_v47 = vpack.c.bf16 %v279_v35, %v275_v34  ;;  %v8749_v52 = vpack.c.bf16 %v278_v42, %v274_v41  ;;  %v149_v20 = vld [vmem:[%s11344_s0 + $0x1d8] sm:$0xff] }
  0x10   :  { %v570_v44 = vld [vmem:[%s11345_s1] sm:$0xff]  ;;  %vm214_vm3 = vcmp.ge.f32.partialorder %v150_v40, 0.5  ;;  %719 = vmatprep.subr.mxu0 %v587_v28  ;;  %880 = vmatprep.subr.mxu1 %v589_v29  ;;  %vm8736_vm5 = vmpackc.low %vm215_vm1, %vm211_vm0  ;;  %v79_v48 = vld [vmem:[%s11347_s3 + $0x1a8] sm:$0xff]  ;;  %v267_v50 = vmul.f32 2.0, %v75_v45  ;;  %v281_v24 = vmul.f32 2.0, %v89_v19  ;;  %v11556_v35 = vmov 0 }
  0x11   :  { %v11539_v46 = vsel %vm8736_vm5, 4294967295, %v11538_v46  ;;  %11541 = vst [vmem:[#allocation11_spill] sm:$0xff] %v8740_v47  ;;  %v139_v49 = vld [vmem:[%s11344_s0 + $0x188] sm:$0xff]  ;;  %720 = vmatpush1.msra.mxu0 %v586_v38  ;;  %v271_v54 = vmul.f32 2.0, %v79_v48  ;;  %v74_v55 = vld [vmem:[%s11347_s3 + $0x180] sm:$0xff]  ;;  %881 = vmatpush1.msra.mxu1 %v588_v43  ;;  %vm8763_vm7 = vmpackc.low %vm214_vm3, %vm210_vm2  ;;  %vm213_vm3 = vcmp.ge.f32.partialorder %v149_v20, 0.5 }
  0x12   :  { %11540 = vst [vmem:[#allocation10_spill] sm:$0xff] %v11539_v46  ;;  %v143_v53 = vld [vmem:[%s11344_s0 + $0x1a8] sm:$0xff]  ;;  %vm203_vm6 = vcmp.ge.f32.partialorder %v139_v49, 0.5  ;;  %v78_v56 = vld [vmem:[%s11347_s3 + $0x1a0] sm:$0xff]  ;;  %v11543_v57 = vsel %vm8763_vm7, 4294967295, %v11542_v57  ;;  %v266_v60 = vmul.f32 2.0, %v74_v55  ;;  %6068 = vmatmul.mubr.msk.f32.vlgmr.msra.gmra.mxu0 %vm11358_vm4, %v570_v44  ;;  %6084 = vmatmul.mubr.msk.f32.vlgmr.msra.gmra.mxu1 %vm11358_vm4, %v570_v44  ;;  %v8882_v33 = vpack.c.bf16 %v281_v24, %v277_v21 }
  0x13   :  { %vm207_vm8 = vcmp.ge.f32.partialorder %v143_v53, 0.5  ;;  %v138_v58 = vld [vmem:[%s11344_s0 + $0x180] sm:$0xff]  ;;  %v270_v61 = vmul.f32 2.0, %v78_v56  ;;  %v571_v62 = vld [vmem:[%s11345_s1 + $0x8] sm:$0xff]  ;;  %v8783_v0 = vpack.c.bf16 %v271_v54, %v267_v50  ;;  %6726 = vmatprep.subr.msk.bf16.mxu0 %vm8736_vm5, %v8740_v47  ;;  %759 = vmatprep.mubr.f32.mxu0 %v11383_v51  ;;  %v153_v23 = vld [vmem:[%s11344_s0 + $0x1f8] sm:$0xff]  ;;  %v11558_v53 = vmov 0 }
  0x14   :  { %v142_v59 = vld [vmem:[%s11344_s0 + $0x1a0] sm:$0xff]  ;;  %vm8779_vm9 = vmpackc.low %vm207_vm8, %vm203_vm6  ;;  %vm202_vm10 = vcmp.ge.f32.partialorder %v138_v58, 0.5  ;;  %v67_v1 = vld [vmem:[%s11347_s3 + $0x148] sm:$0xff]  ;;  %6729 = vmatpush1.bf16.msk.msra.mxu0 %vm8763_vm7, %v8749_v52  ;;  %920 = vmatprep.mubr.f32.mxu1 %v11383_v51  ;;  %vm217_vm6 = vcmp.ge.f32.partialorder %v153_v23, 0.5  ;;  %11555 = vst [vmem:[#allocation13_spill] sm:$0xff] %v8882_v33  ;;  %v11564_v16 = vmov 0 }
  0x15   :  { %v11545_v63 = vsel %vm8779_vm9, 4294967295, %v11544_v63  ;;  %vm206_vm11 = vcmp.ge.f32.partialorder %v142_v59, 0.5  ;;  %v71_v3 = vld [vmem:[%s11347_s3 + $0x168] sm:$0xff]  ;;  %v259_v5 = vmul.f32 2.0, %v67_v1  ;;  %v8806_v6 = vpack.c.bf16 %v270_v61, %v266_v60  ;;  %v66_v9 = vld [vmem:[%s11347_s3 + $0x140] sm:$0xff]  ;;  %6732 = vmatprep.subr.msk.bf16.mxu0 %vm8779_vm9, %v8783_v0  ;;  %v84_v25 = vld [vmem:[%s11347_s3 + $0x1d0] sm:$0xff] }
  0x16   :  { %vm8792_vm12 = vmpackc.low %vm206_vm11, %vm202_vm10  ;;  %v131_v4 = vld [vmem:[%s11344_s0 + $0x148] sm:$0xff]  ;;  %v263_v8 = vmul.f32 2.0, %v71_v3  ;;  %v70_v10 = vld [vmem:[%s11347_s3 + $0x160] sm:$0xff]  ;;  %v258_v14 = vmul.f32 2.0, %v66_v9  ;;  %6069 = vmatmul.mubr.msk.f32.gmra.mxu0 %vm11358_vm4, %v571_v62  ;;  %6085 = vmatmul.mubr.msk.f32.gmra.mxu1 %vm11358_vm4, %v571_v62  ;;  %v276_v30 = vmul.f32 2.0, %v84_v25  ;;  %v11560_v59 = vmov 0 }
  0x17   :  { %v11547_v2 = vsel %vm8792_vm12, 4294967295, %v11546_v2  ;;  %v135_v7 = vld [vmem:[%s11344_s0 + $0x168] sm:$0xff]  ;;  %vm195_vm13 = vcmp.ge.f32.partialorder %v131_v4, 0.5  ;;  %v130_v12 = vld [vmem:[%s11344_s0 + $0x140] sm:$0xff]  ;;  %v262_v15 = vmul.f32 2.0, %v70_v10  ;;  %765 = vmatprep.mubr.f32.mxu0 %v11383_v51  ;;  %926 = vmatprep.mubr.f32.mxu1 %v11383_v51  ;;  %v88_v27 = vld [vmem:[%s11347_s3 + $0x1f0] sm:$0xff] }
  0x18   :  { %vm199_vm14 = vcmp.ge.f32.partialorder %v135_v7, 0.5  ;;  %v134_v13 = vld [vmem:[%s11344_s0 + $0x160] sm:$0xff]  ;;  %v8838_v18 = vpack.c.bf16 %v263_v8, %v259_v5  ;;  %vm194_vm0 = vcmp.ge.f32.partialorder %v130_v12, 0.5  ;;  %6735 = vmatpush1.bf16.msk.msra.mxu0 %vm8792_vm12, %v8806_v6  ;;  %v148_v28 = vld [vmem:[%s11344_s0 + $0x1d0] sm:$0xff]  ;;  %v573_v31 = vld [vmem:[%s11345_s1 + $0x18] sm:$0xff]  ;;  %v280_v34 = vmul.f32 2.0, %v88_v27 }
  0x19   :  { %vm8834_vm15 = vmpackc.low %vm199_vm14, %vm195_vm13  ;;  %vm198_vm1 = vcmp.ge.f32.partialorder %v134_v13, 0.5  ;;  %v8861_v26 = vpack.c.bf16 %v262_v15, %v258_v14  ;;  %v152_v29 = vld [vmem:[%s11344_s0 + $0x1f0] sm:$0xff]  ;;  %vm212_vm10 = vcmp.ge.f32.partialorder %v148_v28, 0.5  ;;  %v59_v36 = vld [vmem:[%s11347_s3 + $0x108] sm:$0xff]  ;;  %v11562_v13 = vmov 0 }
  0x1a   :  { %v11549_v17 = vsel %vm8834_vm15, 4294967295, %v11548_v17  ;;  %vm8848_vm2 = vmpackc.low %vm198_vm1, %vm194_vm0  ;;  %6738 = vmatprep.subr.msk.bf16.mxu0 %vm8834_vm15, %v8838_v18  ;;  %vm216_vm11 = vcmp.ge.f32.partialorder %v152_v29, 0.5  ;;  %6070 = vmatmul.mubr.msk.f32.gmra.mxu0 %vm11358_vm4, %v572_v11  ;;  %v63_v37 = vld [vmem:[%s11347_s3 + $0x128] sm:$0xff]  ;;  %v8898_v38 = vpack.c.bf16 %v280_v34, %v276_v30  ;;  %v251_v41 = vmul.f32 2.0, %v59_v36  ;;  %v58_v43 = vld [vmem:[%s11347_s3 + $0x100] sm:$0xff] }
  0x1b   :  { %v11551_v22 = vsel %vm8848_vm2, 4294967295, %v11550_v22  ;;  %vm8878_vm8 = vmpackc.low %vm217_vm6, %vm213_vm3  ;;  %6086 = vmatmul.mubr.msk.f32.gmra.mxu1 %vm11358_vm4, %v572_v11  ;;  %771 = vmatprep.mubr.f32.mxu0 %v11383_v51  ;;  %v123_v39 = vld [vmem:[%s11344_s0 + $0x108] sm:$0xff]  ;;  %v255_v42 = vmul.f32 2.0, %v63_v37  ;;  %v62_v44 = vld [vmem:[%s11347_s3 + $0x120] sm:$0xff]  ;;  %v250_v49 = vmul.f32 2.0, %v58_v43  ;;  %v11566_v29 = vmov 0 }
  0x1c   :  { %v11553_v32 = vsel %vm8878_vm8, 4294967295, %v11552_v32  ;;  %vm8886_vm13 = vmpackc.low %vm216_vm11, %vm212_vm10  ;;  %932 = vmatprep.mubr.f32.mxu1 %v11383_v51  ;;  %v127_v40 = vld [vmem:[%s11344_s0 + $0x128] sm:$0xff]  ;;  %6741 = vmatpush1.bf16.msk.msra.mxu0 %vm8848_vm2, %v8861_v26  ;;  %vm187_vm14 = vcmp.ge.f32.partialorder %v123_v39, 0.5  ;;  %v122_v45 = vld [vmem:[%s11344_s0 + $0x100] sm:$0xff]  ;;  %v254_v55 = vmul.f32 2.0, %v62_v44  ;;  %v11568_v43 = vmov 0 }
  0x1d   :  { %11554 = vst [vmem:[#allocation12_spill] sm:$0xff] %v11553_v32  ;;  %v11557_v35 = vsel %vm8886_vm13, 4294967295, %v11556_v35  ;;  %6774 = vmatprep.subr.msk.bf16.mxu1 %vm8878_vm8, %v8882_v33  ;;  %vm191_vm0 = vcmp.ge.f32.partialorder %v127_v40, 0.5  ;;  %v126_v48 = vld [vmem:[%s11344_s0 + $0x120] sm:$0xff]  ;;  %v8934_v54 = vpack.c.bf16 %v255_v42, %v251_v41  ;;  %vm186_vm3 = vcmp.ge.f32.partialorder %v122_v45, 0.5  ;;  %v77_v56 = vld [vmem:[%s11347_s3 + $0x198] sm:$0xff] }
  0x1e   :  { %v574_v50 = vld [vmem:[%s11345_s1 + $0x20] sm:$0xff]  ;;  %6777 = vmatpush1.bf16.msk.msra.mxu1 %vm8886_vm13, %v8898_v38  ;;  %vm8930_vm1 = vmpackc.low %vm191_vm0, %vm187_vm14  ;;  %vm190_vm6 = vcmp.ge.f32.partialorder %v126_v48, 0.5  ;;  %v81_v58 = vld [vmem:[%s11347_s3 + $0x1b8] sm:$0xff]  ;;  %6071 = vmatmul.mubr.msk.f32.gmra.mxu0 %vm11358_vm4, %v573_v31  ;;  %v269_v62 = vmul.f32 2.0, %v77_v56  ;;  %v8956_v3 = vpack.c.bf16 %v254_v55, %v250_v49 }
  0x1f   :  { %v11559_v53 = vsel %vm8930_vm1, 4294967295, %v11558_v53  ;;  %6087 = vmatmul.mubr.msk.f32.gmra.mxu1 %vm11358_vm4, %v573_v31  ;;  %vm8944_vm10 = vmpackc.low %vm190_vm6, %vm186_vm3  ;;  %v141_v60 = vld [vmem:[%s11344_s0 + $0x198] sm:$0xff]  ;;  %v273_v1 = vmul.f32 2.0, %v81_v58  ;;  %777 = vmatprep.mubr.f32.mxu0 %v11383_v51  ;;  %v76_v4 = vld [vmem:[%s11347_s3 + $0x190] sm:$0xff] }
  0x20   :  { %v11561_v59 = vsel %vm8944_vm10, 4294967295, %v11560_v59  ;;  %v145_v61 = vld [vmem:[%s11344_s0 + $0x1b8] sm:$0xff]  ;;  %938 = vmatprep.mubr.f32.mxu1 %v11383_v51  ;;  %vm205_vm11 = vcmp.ge.f32.partialorder %v141_v60, 0.5  ;;  %v80_v5 = vld [vmem:[%s11347_s3 + $0x1b0] sm:$0xff]  ;;  %6744 = vmatprep.subr.msk.bf16.mxu0 %vm8930_vm1, %v8934_v54  ;;  %v268_v10 = vmul.f32 2.0, %v76_v4  ;;  %v575_v12 = vld [vmem:[%s11345_s1 + $0x28] sm:$0xff] }
  0x21   :  { %vm209_vm14 = vcmp.ge.f32.partialorder %v145_v61, 0.5  ;;  %v140_v7 = vld [vmem:[%s11344_s0 + $0x190] sm:$0xff]  ;;  %v8970_v8 = vpack.c.bf16 %v273_v1, %v269_v62  ;;  %v272_v11 = vmul.f32 2.0, %v80_v5  ;;  %6747 = vmatpush1.bf16.msk.msra.mxu0 %vm8944_vm10, %v8956_v3  ;;  %v51_v14 = vld [vmem:[%s11347_s3 + $0xc8] sm:$0xff]  ;;  %v50_v25 = vld [vmem:[%s11347_s3 + $0xc0] sm:$0xff]  ;;  %v11570_v61 = vmov 0 }
  0x22   :  { %v144_v9 = vld [vmem:[%s11344_s0 + $0x1b0] sm:$0xff]  ;;  %vm204_vm0 = vcmp.ge.f32.partialorder %v140_v7, 0.5  ;;  %vm8981_vm3 = vmpackc.low %vm209_vm14, %vm205_vm11  ;;  %v55_v15 = vld [vmem:[%s11347_s3 + $0xe8] sm:$0xff]  ;;  %6072 = vmatmul.mubr.msk.f32.gmra.mxu0 %vm11358_vm4, %v574_v50  ;;  %v243_v23 = vmul.f32 2.0, %v51_v14  ;;  %v242_v34 = vmul.f32 2.0, %v50_v25  ;;  %v11572_v5 = vmov 0 }
  0x23   :  { %v11563_v13 = vsel %vm8981_vm3, 4294967295, %v11562_v13  ;;  %vm208_vm6 = vcmp.ge.f32.partialorder %v144_v9, 0.5  ;;  %6088 = vmatmul.mubr.msk.f32.gmra.mxu1 %vm11358_vm4, %v574_v50  ;;  %v8997_v19 = vpack.c.bf16 %v272_v11, %v268_v10  ;;  %v115_v20 = vld [vmem:[%s11344_s0 + $0xc8] sm:$0xff]  ;;  %v247_v24 = vmul.f32 2.0, %v55_v15  ;;  %783 = vmatprep.mubr.f32.mxu0 %v11383_v51  ;;  %v54_v27 = vld [vmem:[%s11347_s3 + $0xe0] sm:$0xff]  ;;  %v69_v37 = vld [vmem:[%s11347_s3 + $0x158] sm:$0xff] }
  0x24   :  { %vm8993_vm1 = vmpackc.low %vm208_vm6, %vm204_vm0  ;;  %v119_v21 = vld [vmem:[%s11344_s0 + $0xe8] sm:$0xff]  ;;  %944 = vmatprep.mubr.f32.mxu1 %v11383_v51  ;;  %vm179_vm11 = vcmp.ge.f32.partialorder %v115_v20, 0.5  ;;  %v114_v28 = vld [vmem:[%s11344_s0 + $0xc0] sm:$0xff]  ;;  %6780 = vmatprep.subr.msk.bf16.mxu1 %vm8981_vm3, %v8970_v8  ;;  %v246_v36 = vmul.f32 2.0, %v54_v27  ;;  %v261_v42 = vmul.f32 2.0, %v69_v37 }
  0x25   :  { %v11565_v16 = vsel %vm8993_vm1, 4294967295, %v11564_v16  ;;  %vm183_vm14 = vcmp.ge.f32.partialorder %v119_v21, 0.5  ;;  %v9023_v30 = vpack.c.bf16 %v247_v24, %v243_v23  ;;  %v118_v31 = vld [vmem:[%s11344_s0 + $0xe0] sm:$0xff]  ;;  %vm178_vm6 = vcmp.ge.f32.partialorder %v114_v28, 0.5  ;;  %6783 = vmatpush1.bf16.msk.msra.mxu1 %vm8993_vm1, %v8997_v19  ;;  %v73_v39 = vld [vmem:[%s11347_s3 + $0x178] sm:$0xff]  ;;  %v68_v48 = vld [vmem:[%s11347_s3 + $0x150] sm:$0xff] }
  0x26   :  { %vm9019_vm0 = vmpackc.low %vm183_vm14, %vm179_vm11  ;;  %vm182_vm11 = vcmp.ge.f32.partialorder %v118_v31, 0.5  ;;  %v133_v40 = vld [vmem:[%s11344_s0 + $0x158] sm:$0xff]  ;;  %6073 = vmatmul.mubr.msk.f32.gmra.mxu0 %vm11358_vm4, %v575_v12  ;;  %v9049_v44 = vpack.c.bf16 %v246_v36, %v242_v34  ;;  %v265_v45 = vmul.f32 2.0, %v73_v39  ;;  %v72_v49 = vld [vmem:[%s11347_s3 + $0x170] sm:$0xff]  ;;  %v260_v58 = vmul.f32 2.0, %v68_v48 }
  0x27   :  { %v11567_v29 = vsel %vm9019_vm0, 4294967295, %v11566_v29  ;;  %v137_v41 = vld [vmem:[%s11344_s0 + $0x178] sm:$0xff]  ;;  %6089 = vmatmul.mubr.msk.f32.gmra.mxu1 %vm11358_vm4, %v575_v12  ;;  %vm9045_vm14 = vmpackc.low %vm182_vm11, %vm178_vm6  ;;  %vm197_vm10 = vcmp.ge.f32.partialorder %v133_v40, 0.5  ;;  %789 = vmatprep.mubr.f32.mxu0 %v11383_v51  ;;  %v576_v50 = vld [vmem:[%s11345_s1 + $0x30] sm:$0xff]  ;;  %v264_v60 = vmul.f32 2.0, %v72_v49  ;;  %v11576_v28 = vmov 0 }
  0x28   :  { %v11569_v43 = vsel %vm9045_vm14, 4294967295, %v11568_v43  ;;  %vm201_vm2 = vcmp.ge.f32.partialorder %v137_v41, 0.5  ;;  %950 = vmatprep.mubr.f32.mxu1 %v11383_v51  ;;  %v132_v55 = vld [vmem:[%s11344_s0 + $0x150] sm:$0xff]  ;;  %6750 = vmatprep.subr.msk.bf16.mxu0 %vm9019_vm0, %v9023_v30  ;;  %v9075_v62 = vpack.c.bf16 %v265_v45, %v261_v42  ;;  %v43_v1 = vld [vmem:[%s11347_s3 + $0x88] sm:$0xff]  ;;  %v577_v4 = vld [vmem:[%s11345_s1 + $0x38] sm:$0xff]  ;;  %v11578_v39 = vmov 0 }
  0x29   :  { %v136_v56 = vld [vmem:[%s11344_s0 + $0x170] sm:$0xff]  ;;  %vm9071_vm6 = vmpackc.low %vm201_vm2, %vm197_vm10  ;;  %vm196_vm11 = vcmp.ge.f32.partialorder %v132_v55, 0.5  ;;  %6753 = vmatpush1.bf16.msk.msra.mxu0 %vm9045_vm14, %v9049_v44  ;;  %v9090_v7 = vpack.c.bf16 %v264_v60, %v260_v58  ;;  %v47_v9 = vld [vmem:[%s11347_s3 + $0xa8] sm:$0xff]  ;;  %v235_v11 = vmul.f32 2.0, %v43_v1  ;;  %vm11574_vm10 = vcmask 523264  }
  0x2a   :  { %v11571_v61 = vsel %vm9071_vm6, 4294967295, %v11570_v61  ;;  %vm200_vm4 = vcmp.ge.f32.partialorder %v136_v56, 0.5  ;;  %v107_v10 = vld [vmem:[%s11344_s0 + $0x88] sm:$0xff]  ;;  %6074 = vmatmul.mubr.msk.f32.gmra.mxu0 %vm11574_vm10, %v576_v50  ;;  %vm11575_vm0 = vmmov %vm11574_vm10  ;;  %v239_v14 = vmul.f32 2.0, %v47_v9  ;;  %v42_v15 = vld [vmem:[%s11347_s3 + $0x80] sm:$0xff]  ;;  %6786 = vmatprep.subr.msk.bf16.mxu1 %vm9071_vm6, %v9075_v62  ;;  %vm11581_vm6 = vcmask 523264  }
  0x2b   :  { %vm9086_vm2 = vmpackc.low %vm200_vm4, %vm196_vm11  ;;  %6090 = vmatmul.mubr.msk.f32.gmra.mxu1 %vm11575_vm0, %v576_v50  ;;  %v111_v12 = vld [vmem:[%s11344_s0 + $0xa8] sm:$0xff]  ;;  %vm171_vm4 = vcmp.ge.f32.partialorder %v107_v10, 0.5  ;;  %v46_v20 = vld [vmem:[%s11347_s3 + $0xa0] sm:$0xff]  ;;  %795 = vmatprep.mubr.f32.mxu0 %v11383_v51  ;;  %v234_v24 = vmul.f32 2.0, %v42_v15  ;;  %v11583_v58 = vmov 0 }
  0x2c   :  { %v11573_v5 = vsel %vm9086_vm2, 4294967295, %v11572_v5  ;;  %956 = vmatprep.mubr.f32.mxu1 %v11383_v51  ;;  %vm175_vm11 = vcmp.ge.f32.partialorder %v111_v12, 0.5  ;;  %v106_v21 = vld [vmem:[%s11344_s0 + $0x80] sm:$0xff]  ;;  %v238_v25 = vmul.f32 2.0, %v46_v20  ;;  %v61_v27 = vld [vmem:[%s11347_s3 + $0x118] sm:$0xff]  ;;  %v9127_v31 = vpack.c.bf16 %v239_v14, %v235_v11  ;;  %6789 = vmatpush1.bf16.msk.msra.mxu1 %vm9086_vm2, %v9090_v7  ;;  %v60_v45 = vld [vmem:[%s11347_s3 + $0x110] sm:$0xff] }
  0x2d   :  { %v110_v23 = vld [vmem:[%s11344_s0 + $0xa0] sm:$0xff]  ;;  %vm9123_vm0 = vmpackc.low %vm175_vm11, %vm171_vm4  ;;  %vm170_vm10 = vcmp.ge.f32.partialorder %v106_v21, 0.5  ;;  %v65_v34 = vld [vmem:[%s11347_s3 + $0x138] sm:$0xff]  ;;  %v253_v37 = vmul.f32 2.0, %v61_v27  ;;  %v252_v55 = vmul.f32 2.0, %v60_v45 }
  0x2e   :  { %v11577_v28 = vsel %vm9123_vm0, 4294967295, %v11576_v28  ;;  %vm174_vm14 = vcmp.ge.f32.partialorder %v110_v23, 0.5  ;;  %v125_v36 = vld [vmem:[%s11344_s0 + $0x118] sm:$0xff]  ;;  %v9142_v40 = vpack.c.bf16 %v238_v25, %v234_v24  ;;  %v257_v42 = vmul.f32 2.0, %v65_v34  ;;  %6075 = vmatmul.mubr.msk.f32.gmra.mxu0 %vm11581_vm6, %v577_v4  ;;  %vm11582_vm15 = vmmov %vm11581_vm6  ;;  %v64_v48 = vld [vmem:[%s11347_s3 + $0x130] sm:$0xff]  ;;  %6756 = vmatprep.subr.msk.bf16.mxu0 %vm9123_vm0, %v9127_v31 }
  0x2f   :  { %vm9138_vm4 = vmpackc.low %vm174_vm14, %vm170_vm10  ;;  %v129_v41 = vld [vmem:[%s11344_s0 + $0x138] sm:$0xff]  ;;  %vm189_vm11 = vcmp.ge.f32.partialorder %v125_v36, 0.5  ;;  %6091 = vmatmul.mubr.msk.f32.gmra.mxu1 %vm11582_vm15, %v577_v4  ;;  %v124_v49 = vld [vmem:[%s11344_s0 + $0x110] sm:$0xff]  ;;  %801 = vmatprep.mubr.f32.mxu0 %v11383_v51  ;;  %v256_v1 = vmul.f32 2.0, %v64_v48  ;;  %v11585_v4 = vmov 0  ;;  %v11589_v36 = vmov 0 }
  0x30   :  { %v11579_v39 = vsel %vm9138_vm4, 4294967295, %v11578_v39  ;;  %vm193_vm14 = vcmp.ge.f32.partialorder %v129_v41, 0.5  ;;  %v128_v50 = vld [vmem:[%s11344_s0 + $0x130] sm:$0xff]  ;;  %962 = vmatprep.mubr.f32.mxu1 %v11383_v51  ;;  %v578_v56 = vld [vmem:[%s11345_s1 + $0x40] sm:$0xff]  ;;  %v9170_v60 = vpack.c.bf16 %v257_v42, %v253_v37  ;;  %vm188_vm6 = vcmp.ge.f32.partialorder %v124_v49, 0.5  ;;  %v35_v9 = vld [vmem:[%s11347_s3 + $0x48] sm:$0xff]  ;;  %6759 = vmatpush1.bf16.msk.msra.mxu0 %vm9138_vm4, %v9142_v40 }
  0x31   :  { %11580 = vst [vmem:[#allocation14_spill] sm:$0xff] %v11579_v39  ;;  %vm9166_vm15 = vmpackc.low %vm193_vm14, %vm189_vm11  ;;  %vm192_vm10 = vcmp.ge.f32.partialorder %v128_v50, 0.5  ;;  %v39_v10 = vld [vmem:[%s11347_s3 + $0x68] sm:$0xff]  ;;  %v9194_v12 = vpack.c.bf16 %v256_v1, %v252_v55  ;;  %v227_v20 = vmul.f32 2.0, %v35_v9  ;;  %v53_v23 = vld [vmem:[%s11347_s3 + $0xd8] sm:$0xff]  ;;  %vm11587_vm11 = vcmask 523264  }
  0x32   :  { %v11584_v58 = vsel %vm9166_vm15, 4294967295, %v11583_v58  ;;  %vm9175_vm2 = vmpackc.low %vm192_vm10, %vm188_vm6  ;;  %v579_v11 = vld [vmem:[%s11345_s1 + $0x48] sm:$0xff]  ;;  %6792 = vmatprep.subr.msk.bf16.mxu1 %vm9166_vm15, %v9170_v60  ;;  %v231_v21 = vmul.f32 2.0, %v39_v10  ;;  %6076 = vmatmul.mubr.msk.f32.gmra.mxu0 %vm11587_vm11, %v578_v56  ;;  %v57_v24 = vld [vmem:[%s11347_s3 + $0xf8] sm:$0xff]  ;;  %v245_v34 = vmul.f32 2.0, %v53_v23  ;;  %v11593_v48 = vmov 0 }
  0x33   :  { %v11586_v4 = vsel %vm9175_vm2, 4294967295, %v11585_v4  ;;  %v99_v14 = vld [vmem:[%s11344_s0 + $0x48] sm:$0xff]  ;;  %vm11588_vm14 = vmmov %vm11587_vm11  ;;  %v117_v25 = vld [vmem:[%s11344_s0 + $0xd8] sm:$0xff]  ;;  %807 = vmatprep.mubr.f32.mxu0 %v11383_v51  ;;  %v249_v41 = vmul.f32 2.0, %v57_v24  ;;  %6795 = vmatpush1.bf16.msk.msra.mxu1 %vm9175_vm2, %v9194_v12 }
  0x34   :  { %v103_v15 = vld [vmem:[%s11344_s0 + $0x68] sm:$0xff]  ;;  %6092 = vmatmul.mubr.msk.f32.gmra.mxu1 %vm11588_vm14, %v578_v56  ;;  %vm163_vm6 = vcmp.ge.f32.partialorder %v99_v14, 0.5  ;;  %v121_v27 = vld [vmem:[%s11344_s0 + $0xf8] sm:$0xff]  ;;  %v9222_v37 = vpack.c.bf16 %v231_v21, %v227_v20  ;;  %vm181_vm14 = vcmp.ge.f32.partialorder %v117_v25, 0.5  ;;  %v34_v42 = vld [vmem:[%s11347_s3 + $0x40] sm:$0xff]  ;;  %v11597_v20 = vmov 0 }
  0x35   :  { %vm167_vm10 = vcmp.ge.f32.partialorder %v103_v15, 0.5  ;;  %968 = vmatprep.mubr.f32.mxu1 %v11383_v51  ;;  %vm185_vm4 = vcmp.ge.f32.partialorder %v121_v27, 0.5  ;;  %v38_v45 = vld [vmem:[%s11347_s3 + $0x60] sm:$0xff]  ;;  %v226_v55 = vmul.f32 2.0, %v34_v42  ;;  %v9246_v1 = vpack.c.bf16 %v249_v41, %v245_v34  ;;  %v52_v9 = vld [vmem:[%s11347_s3 + $0xd0] sm:$0xff]  ;;  %v49_v27 = vld [vmem:[%s11347_s3 + $0xb8] sm:$0xff] }
  0x36   :  { %vm9218_vm11 = vmpackc.low %vm167_vm10, %vm163_vm6  ;;  %11592 = vst [vmem:[#allocation16_spill] sm:$0xff] %v9222_v37  ;;  %v98_v49 = vld [vmem:[%s11344_s0 + $0x40] sm:$0xff]  ;;  %v230_v56 = vmul.f32 2.0, %v38_v45  ;;  %v56_v10 = vld [vmem:[%s11347_s3 + $0xf0] sm:$0xff]  ;;  %v244_v24 = vmul.f32 2.0, %v52_v9  ;;  %v11601_v41 = vmov 0 }
  0x37   :  { %v11590_v36 = vsel %vm9218_vm11, 4294967295, %v11589_v36  ;;  %vm9233_vm6 = vmpackc.low %vm185_vm4, %vm181_vm14  ;;  %v102_v50 = vld [vmem:[%s11344_s0 + $0x60] sm:$0xff]  ;;  %6762 = vmatprep.subr.msk.bf16.mxu0 %vm9218_vm11, %v9222_v37  ;;  %vm162_vm4 = vcmp.ge.f32.partialorder %v98_v49, 0.5  ;;  %v116_v14 = vld [vmem:[%s11344_s0 + $0xd0] sm:$0xff]  ;;  %vm11595_vm14 = vcmask 523264   ;;  %v248_v25 = vmul.f32 2.0, %v56_v10 }
  0x38   :  { %11591 = vst [vmem:[#allocation15_spill] sm:$0xff] %v11590_v36  ;;  %v11594_v48 = vsel %vm9233_vm6, 4294967295, %v11593_v48  ;;  %vm166_vm10 = vcmp.ge.f32.partialorder %v102_v50, 0.5  ;;  %6077 = vmatmul.mubr.msk.f32.gmra.mxu0 %vm11595_vm14, %v579_v11  ;;  %vm11596_vm0 = vmmov %vm11595_vm14  ;;  %v580_v15 = vld [vmem:[%s11345_s1 + $0x50] sm:$0xff]  ;;  %v9266_v21 = vpack.c.bf16 %v230_v56, %v226_v55  ;;  %vm180_vm2 = vcmp.ge.f32.partialorder %v116_v14, 0.5  ;;  %v109_v34 = vld [vmem:[%s11344_s0 + $0x98] sm:$0xff]  ;;  %6798 = vmatprep.subr.msk.bf16.mxu1 %vm9233_vm6, %v9246_v1 }
  0x39   :  { %6093 = vmatmul.mubr.msk.f32.gmra.mxu1 %vm11596_vm0, %v579_v11  ;;  %vm9262_vm11 = vmpackc.low %vm166_vm10, %vm162_vm4  ;;  %v120_v23 = vld [vmem:[%s11344_s0 + $0xf0] sm:$0xff]  ;;  %813 = vmatprep.mubr.f32.mxu0 %v11383_v51  ;;  %v45_v11 = vld [vmem:[%s11347_s3 + $0x98] sm:$0xff]  ;;  %v9292_v42 = vpack.c.bf16 %v248_v25, %v244_v24  ;;  %vm173_vm10 = vcmp.ge.f32.partialorder %v109_v34, 0.5  ;;  %v241_v50 = vmul.f32 2.0, %v49_v27  ;;  %v11605_v24 = vmov 0 }
  0x3a   :  { %v11598_v20 = vsel %vm9262_vm11, 4294967295, %v11597_v20  ;;  %11600 = vst [vmem:[#allocation18_spill] sm:$0xff] %v9266_v21  ;;  %974 = vmatprep.mubr.f32.mxu1 %v11383_v51  ;;  %vm184_vm0 = vcmp.ge.f32.partialorder %v120_v23, 0.5  ;;  %6765 = vmatpush1.bf16.msk.msra.mxu0 %vm9262_vm11, %v9266_v21  ;;  %v113_v45 = vld [vmem:[%s11344_s0 + $0xb8] sm:$0xff]  ;;  %v237_v49 = vmul.f32 2.0, %v45_v11  ;;  %v44_v55 = vld [vmem:[%s11347_s3 + $0x90] sm:$0xff] }
  0x3b   :  { %11599 = vst [vmem:[#allocation17_spill] sm:$0xff] %v11598_v20  ;;  %vm9288_vm4 = vmpackc.low %vm184_vm0, %vm180_vm2  ;;  %vm177_vm14 = vcmp.ge.f32.partialorder %v113_v45, 0.5  ;;  %v48_v56 = vld [vmem:[%s11347_s3 + $0xb0] sm:$0xff]  ;;  %v236_v14 = vmul.f32 2.0, %v44_v55  ;;  %vm11603_vm2 = vcmask 523264   ;;  %v581_v23 = vld [vmem:[%s11345_s1 + $0x58] sm:$0xff] }
  0x3c   :  { %v11602_v41 = vsel %vm9288_vm4, 4294967295, %v11601_v41  ;;  %v108_v9 = vld [vmem:[%s11344_s0 + $0x90] sm:$0xff]  ;;  %6078 = vmatmul.mubr.msk.f32.gmra.mxu0 %vm11603_vm2, %v580_v15  ;;  %vm11604_vm0 = vmmov %vm11603_vm2  ;;  %v9318_v25 = vpack.c.bf16 %v241_v50, %v237_v49  ;;  %v240_v11 = vmul.f32 2.0, %v48_v56  ;;  %v27_v27 = vld [vmem:[%s11347_s3 + $0x8] sm:$0xff]  ;;  %6801 = vmatpush1.bf16.msk.msra.mxu1 %vm9288_vm4, %v9292_v42  ;;  %v11617_v36 = vmov 0.0  }
  0x3d   :  { %v112_v10 = vld [vmem:[%s11344_s0 + $0xb0] sm:$0xff]  ;;  %6094 = vmatmul.mubr.msk.f32.gmra.mxu1 %vm11604_vm0, %v580_v15  ;;  %vm9314_vm11 = vmpackc.low %vm177_vm14, %vm173_vm10  ;;  %vm172_vm6 = vcmp.ge.f32.partialorder %v108_v9, 0.5  ;;  %819 = vmatprep.mubr.f32.mxu0 %v11383_v51  ;;  %v11607_v15 = vmov 0  ;;  %v31_v34 = vld [vmem:[%s11347_s3 + $0x28] sm:$0xff]  ;;  %v219_v49 = vmul.f32 2.0, %v27_v27  ;;  %v11632_v37 = vmov 0 }
  0x3e   :  { %v11606_v24 = vsel %vm9314_vm11, 4294967295, %v11605_v24  ;;  %vm176_vm15 = vcmp.ge.f32.partialorder %v112_v10, 0.5  ;;  %980 = vmatprep.mubr.f32.mxu1 %v11383_v51  ;;  %v91_v45 = vld [vmem:[%s11344_s0 + $0x8] sm:$0xff]  ;;  %v9338_v50 = vpack.c.bf16 %v240_v11, %v236_v14  ;;  %v223_v56 = vmul.f32 2.0, %v31_v34  ;;  %v37_v9 = vld [vmem:[%s11347_s3 + $0x58] sm:$0xff]  ;;  %v582_v27 = vld [vmem:[%s11345_s1 + $0x60] sm:$0xff]  ;;  %6804 = vmatprep.subr.msk.bf16.mxu1 %vm9314_vm11, %v9318_v25 }
  0x3f   :  { %vm9325_vm2 = vmpackc.low %vm176_vm15, %vm172_vm6  ;;  %v95_v55 = vld [vmem:[%s11344_s0 + $0x28] sm:$0xff]  ;;  %vm155_vm15 = vcmp.ge.f32.partialorder %v91_v45, 0.5  ;;  %v41_v10 = vld [vmem:[%s11347_s3 + $0x78] sm:$0xff]  ;;  %v229_v34 = vmul.f32 2.0, %v37_v9 }
  0x40   :  { %v11608_v15 = vsel %vm9325_vm2, 4294967295, %v11607_v15  ;;  %11610 = vst [vmem:[#allocation20_spill] sm:$0xff] %v9338_v50  ;;  %vm159_vm6 = vcmp.ge.f32.partialorder %v95_v55, 0.5  ;;  %v101_v14 = vld [vmem:[%s11344_s0 + $0x58] sm:$0xff]  ;;  %v233_v45 = vmul.f32 2.0, %v41_v10  ;;  %v26_v51 = vld [vmem:[%s11347_s3] sm:$0xff]  ;;  %vm11611_vm10 = vmmov %vm11604_vm0  ;;  %v9370_v20 = vpack.c.bf16 %v223_v56, %v219_v49  ;;  %6807 = vmatpush1.bf16.msk.msra.mxu1 %vm9325_vm2, %v9338_v50 }
  0x41   :  { %11609 = vst [vmem:[#allocation19_spill] sm:$0xff] %v11608_v15  ;;  %v105_v11 = vld [vmem:[%s11344_s0 + $0x78] sm:$0xff]  ;;  %6079 = vmatmul.mubr.msk.f32.gmra.mxu0 %vm11611_vm10, %v581_v23  ;;  %vm11612_vm14 = vmmov %vm11604_vm0  ;;  %v11613_v55 = vmov 0  ;;  %vm165_vm11 = vcmp.ge.f32.partialorder %v101_v14, 0.5  ;;  %v30_v9 = vld [vmem:[%s11347_s3 + $0x20] sm:$0xff]  ;;  %v218_v21 = vmul.f32 2.0, %v26_v51 }
  0x42   :  { %6095 = vmatmul.mubr.msk.f32.gmra.mxu1 %vm11612_vm14, %v581_v23  ;;  %vm9366_vm0 = vmpackc.low %vm159_vm6, %vm155_vm15  ;;  %11616 = vst [vmem:[#allocation22_spill] sm:$0xff] %v9370_v20  ;;  %vm169_vm4 = vcmp.ge.f32.partialorder %v105_v11, 0.5  ;;  %v90_v10 = vld [vmem:[%s11344_s0] sm:$0xff]  ;;  %825 = vmatprep.mubr.f32.mxu0 %v11617_v36  ;;  %v11618_v23 = vmov 0  ;;  %v9384_v49 = vpack.c.bf16 %v233_v45, %v229_v34  ;;  %v222_v14 = vmul.f32 2.0, %v30_v9  ;;  %v36_v51 = vld [vmem:[%s11347_s3 + $0x50] sm:$0xff] }
  0x43   :  { %v11614_v55 = vsel %vm9366_vm0, 4294967295, %v11613_v55  ;;  %986 = vmatprep.mubr.f32.mxu1 %v11617_v36  ;;  %vm9380_vm15 = vmpackc.low %vm169_vm4, %vm165_vm11  ;;  %v94_v56 = vld [vmem:[%s11344_s0 + $0x20] sm:$0xff]  ;;  %vm154_vm6 = vcmp.ge.f32.partialorder %v90_v10, 0.5  ;;  %6768 = vmatprep.subr.msk.bf16.mxu0 %vm9366_vm0, %v9370_v20  ;;  %v40_v11 = vld [vmem:[%s11347_s3 + $0x70] sm:$0xff]  ;;  %v228_v9 = vmul.f32 2.0, %v36_v51  ;;  %vm11626_vm0 = vcmask 523264  }
  0x44   :  { %11615 = vst [vmem:[#allocation21_spill] sm:$0xff] %v11614_v55  ;;  %v11619_v23 = vsel %vm9380_vm15, 4294967295, %v11618_v23  ;;  %11621 = vst [vmem:[#allocation24_spill] sm:$0xff] %v9384_v49  ;;  %vm158_vm11 = vcmp.ge.f32.partialorder %v94_v56, 0.5  ;;  %v100_v34 = vld [vmem:[%s11344_s0 + $0x50] sm:$0xff]  ;;  %v583_v10 = vld [vmem:[%s11345_s1 + $0x68] sm:$0xff]  ;;  %6810 = vmatprep.subr.msk.bf16.mxu1 %vm9380_vm15, %v9384_v49  ;;  %v9417_v55 = vpack.c.bf16 %v222_v14, %v218_v21 }
  0x45   :  { %11620 = vst [vmem:[#allocation23_spill] sm:$0xff] %v11619_v23  ;;  %v104_v45 = vld [vmem:[%s11344_s0 + $0x70] sm:$0xff]  ;;  %vm9413_vm4 = vmpackc.low %vm158_vm11, %vm154_vm6  ;;  %v11622_v56 = vmov 0  ;;  %vm164_vm10 = vcmp.ge.f32.partialorder %v100_v34, 0.5  ;;  %v232_v20 = vmul.f32 2.0, %v40_v11  ;;  %v29_v51 = vld [vmem:[%s11347_s3 + $0x18] sm:$0xff]  ;;  %6080 = vmatmul.mubr.msk.f32.gmra.mxu0 %vm11626_vm0, %v582_v27 }
  0x46   :  { %v11623_v56 = vsel %vm9413_vm4, 4294967295, %v11622_v56  ;;  %11625 = vst [vmem:[#allocation26_spill] sm:$0xff] %v9417_v55  ;;  %vm168_vm14 = vcmp.ge.f32.partialorder %v104_v45, 0.5  ;;  %vm11627_vm2 = vmmov %vm11626_vm0  ;;  %v11628_v23 = vmov 0  ;;  %v33_v21 = vld [vmem:[%s11347_s3 + $0x38] sm:$0xff]  ;;  %v221_v11 = vmul.f32 2.0, %v29_v51  ;;  %831 = vmatprep.mubr.f32.mxu0 %v11617_v36  ;;  %6771 = vmatpush1.bf16.msk.msra.mxu0 %vm9413_vm4, %v9417_v55 }
  0x47   :  { %11624 = vst [vmem:[#allocation25_spill] sm:$0xff] %v11623_v56  ;;  %6096 = vmatmul.mubr.msk.f32.gmra.mxu1 %vm11627_vm2, %v582_v27  ;;  %vm9424_vm1 = vmpackc.low %vm168_vm14, %vm164_vm10  ;;  %v93_v14 = vld [vmem:[%s11344_s0 + $0x18] sm:$0xff]  ;;  %v9436_v34 = vpack.c.bf16 %v232_v20, %v228_v9  ;;  %v225_v45 = vmul.f32 2.0, %v33_v21  ;;  %v28_v49 = vld [vmem:[%s11347_s3 + $0x10] sm:$0xff]  ;;  %6822 = vmatprep.subr.msk.bf16.mxu0 %vm8736_vm5, %v8740_v47  ;;  %vm11636_vm14 = vcmask 523264  }
  0x48   :  { %v11629_v23 = vsel %vm9424_vm1, 4294967295, %v11628_v23  ;;  %992 = vmatprep.mubr.f32.mxu1 %v11617_v36  ;;  %v97_v27 = vld [vmem:[%s11344_s0 + $0x38] sm:$0xff]  ;;  %vm157_vm2 = vcmp.ge.f32.partialorder %v93_v14, 0.5  ;;  %v32_v51 = vld [vmem:[%s11347_s3 + $0x30] sm:$0xff]  ;;  %v220_v21 = vmul.f32 2.0, %v28_v49  ;;  %vm11637_vm4 = vmmov %vm11636_vm14  ;;  %v11638_v49 = vmov 0 }
  0x49   :  { %11630 = vst [vmem:[#allocation27_spill] sm:$0xff] %v11629_v23  ;;  %11631 = vst [vmem:[#allocation28_spill] sm:$0xff] %v9436_v34  ;;  %vm161_vm0 = vcmp.ge.f32.partialorder %v97_v27, 0.5  ;;  %v92_v20 = vld [vmem:[%s11344_s0 + $0x10] sm:$0xff]  ;;  %v224_v14 = vmul.f32 2.0, %v32_v51  ;;  %6813 = vmatpush1.bf16.msk.msra.mxu1 %vm9424_vm1, %v9436_v34  ;;  %v9463_v56 = vpack.c.bf16 %v225_v45, %v221_v11  ;;  %6081 = vmatmul.mubr.msk.f32.gmra.mxu0 %vm11636_vm14, %v583_v10 }
  0x4a   :  { %v96_v9 = vld [vmem:[%s11344_s0 + $0x30] sm:$0xff]  ;;  %vm9459_vm6 = vmpackc.low %vm161_vm0, %vm157_vm2  ;;  %vm156_vm11 = vcmp.ge.f32.partialorder %v92_v20, 0.5  ;;  %837 = vmatprep.mubr.f32.mxu0 %v11617_v36 }
  0x4b   :  { %v11633_v37 = vsel %vm9459_vm6, 4294967295, %v11632_v37  ;;  %11635 = vst [vmem:[#allocation30_spill] sm:$0xff] %v9463_v56  ;;  %vm160_vm10 = vcmp.ge.f32.partialorder %v96_v9, 0.5  ;;  %6097 = vmatmul.mubr.msk.f32.gmra.mxu1 %vm11637_vm4, %v583_v10  ;;  %v9474_v27 = vpack.c.bf16 %v224_v14, %v220_v21  ;;  %v584_v11 = vld [vmem:[%s11345_s1 + $0x70] sm:$0xff] }
  0x4c   :  { %11634 = vst [vmem:[#allocation29_spill] sm:$0xff] %v11633_v37  ;;  %vm9470_vm15 = vmpackc.low %vm160_vm10, %vm156_vm11  ;;  %998 = vmatprep.mubr.f32.mxu1 %v11617_v36 }
  0x4d   :  { %v11639_v49 = vsel %vm9470_vm15, 4294967295, %v11638_v49  ;;  %11641 = vst [vmem:[#allocation32_spill] sm:$0xff] %v9474_v27 }
  0x4e   :  { %11640 = vst [vmem:[#allocation31_spill] sm:$0xff] %v11639_v49 }
  0x4f   :  { %14 = vsyncpa [#allocation7], 0  ;;  %6816 = vmatprep.subr.msk.bf16.mxu1 %vm9459_vm6, %v9463_v56  ;;  %6082 = vmatmul.mubr.msk.f32.gmra.mxu0 %vm11637_vm4, %v584_v11  ;;  %v585_v10 = vld [vmem:[%s11345_s1 + $0x78] sm:$0xff]  ;;  %v11417_v45 = vmov 0   ;;  %vm11645_vm10 = vnez %v11565_v16  ;;  %vm11646_vm14 = vnez %v11549_v17  ;;  %v11665_v20 = vld [vmem:[#allocation24_spill] sm:$0xff]  ;;  %s8566_s19 = smov [#allocation6]  }
  0x50   :  { %6819 = vmatpush1.bf16.msk.msra.mxu1 %vm9470_vm15, %v9474_v27  ;;  %vm11642_vm2 = vmmov %vm11637_vm4  ;;  %843 = vmatprep.mubr.f32.mxu0 %v11617_v36  ;;  %vm11647_vm4 = vnez %v11571_v61  ;;  %v11663_v51 = vld [vmem:[#allocation15_spill] sm:$0xff]  ;;  %v11668_v21 = vld [vmem:[#allocation18_spill] sm:$0xff]  ;;  %s6022_s20 = sshll.u32 %s8566_s19, 4  ;;  %s6023_s20 = int_to_ptr.vmem [resolvable:$true] %s6022_s20 }
  0x51   :  { %6098 = vmatmul.mubr.msk.f32.gmra.mxu1 %vm11642_vm2, %v584_v11  ;;  %6870 = vmatprep.subr.msk.bf16.mxu1 %vm8878_vm8, %v8882_v33  ;;  %vm11643_vm0 = vmmov %vm11642_vm2  ;;  %vm11648_vm2 = vnez %v11551_v22  ;;  %v11666_v9 = vld [vmem:[#allocation23_spill] sm:$0xff]  ;;  %v11669_v14 = vld [vmem:[#allocation17_spill] sm:$0xff]  ;;  %s8520_s21 = scalar_lea.vmem %s6023_s20, 128  ;;  %p8525_p1 = scmp.lt.s32.totalorder %s6023_s20, %s6023_s20 }
  0x52   :  { %1004 = vmatprep.mubr.f32.mxu1 %v11617_v36  ;;  %vm11644_vm11 = vmmov %vm11643_vm0  ;;  %v11662_v36 = vld [vmem:[#allocation16_spill] sm:$0xff]  ;;  %v11671_v11 = vld [vmem:[#allocation22_spill] sm:$0xff]  ;;  %p8521_p0 = scmp.ne.s32.totalorder %s6023_s20, %s8520_s21  ;;  %p8526_p2 = scmp.lt.s32.totalorder %s8520_s21, %s8520_s21 }
  0x53   :  { %6083 = vmatmul.mubr.msk.f32.gmra.mxu0 %vm11643_vm0, %v585_v10  ;;  %vm11649_vm0 = vnez %v11573_v5 }
  0x54   :  { %1303 = vmatprep.mubr.bf16.mxu0 %v11417_v45  ;;  %p8527_p3 = por %p8526_p2, %p8525_p1 }
  0x55   :  { %6099 = vmatmul.mubr.msk.f32.gmra.mxu1 %vm11644_vm11, %v585_v10  ;;  %vm11650_vm11 = vnez %v11559_v53  ;;  %v11672_v10 = vld [vmem:[#allocation21_spill] sm:$0xff] }
  0x56   :  { %1344 = vmatprep.mubr.bf16.mxu1 %v11417_v45  ;;  %p8528_p4 = pnand %p8527_p3, %p8521_p0 }
  0x57   :  { %1304 = vmatmul.mubr.bf16.vlgmr.msra.gmra.mxu0 %v11417_v45 }
  0x58   :  { %6825 = vmatpush1.bf16.msk.msra.mxu0 %vm8763_vm7, %v8749_v52  ;;  %1611 = vmatprep.mubr.bf16.mxu0 %v11417_v45 }
  0x59   :  { %1345 = vmatmul.mubr.bf16.vlgmr.msra.gmra.mxu1 %v11417_v45  ;;  %6828 = vmatprep.subr.msk.bf16.mxu0 %vm8779_vm9, %v8783_v0 }
  0x5a   :  { %6873 = vmatpush1.bf16.msk.msra.mxu1 %vm8886_vm13, %v8898_v38  ;;  %1652 = vmatprep.mubr.bf16.mxu1 %v11417_v45  ;;  %v11674_v45 = vld [vmem:[#allocation25_spill] sm:$0xff] }
  0x5b   :  { %6876 = vmatprep.subr.msk.bf16.mxu1 %vm8981_vm3, %v8970_v8 }
  0x5c   :  { %6831 = vmatpush1.bf16.msk.msra.mxu0 %vm8792_vm12, %v8806_v6 }
  0x5d   :  { %6834 = vmatprep.subr.msk.bf16.mxu0 %vm11646_vm14, %v8838_v18  ;;  %vm11652_vm14 = vnez %v11561_v59 }
  0x5e   :  { %6879 = vmatpush1.bf16.msk.msra.mxu1 %vm11645_vm10, %v8997_v19  ;;  %vm11651_vm10 = vnez %v11584_v58 }
  0x5f   :  { %6882 = vmatprep.subr.msk.bf16.mxu1 %vm11647_vm4, %v9075_v62  ;;  %vm11653_vm4 = vnez %v11586_v4 }
  0x60   :  { %6837 = vmatpush1.bf16.msk.msra.mxu0 %vm11648_vm2, %v8861_v26  ;;  %vm11654_vm2 = vnez %v11567_v29 }
  0x61   :  { %6840 = vmatprep.subr.msk.bf16.mxu0 %vm11650_vm11, %v8934_v54  ;;  %vm11656_vm11 = vnez %v11569_v43 }
  0x62   :  { %6885 = vmatpush1.bf16.msk.msra.mxu1 %vm11649_vm0, %v9090_v7  ;;  %vm11655_vm0 = vnez %v11594_v48 }
  0x63   :  { %6888 = vmatprep.subr.msk.bf16.mxu1 %vm11651_vm10, %v9170_v60  ;;  %vm11657_vm10 = vnez %v11602_v41 }
  0x64   :  { %6843 = vmatpush1.bf16.msk.msra.mxu0 %vm11652_vm14, %v8956_v3  ;;  %vm11658_vm14 = vnez %v11577_v28 }
  0x65   :  { %6846 = vmatprep.subr.msk.bf16.mxu0 %vm11654_vm2, %v9023_v30  ;;  %vm11660_vm2 = vnez %v11579_v39 }
  0x66   :  { %6891 = vmatpush1.bf16.msk.msra.mxu1 %vm11653_vm4, %v9194_v12  ;;  %vm11659_vm4 = vnez %v11606_v24 }
  0x67   :  { %6894 = vmatprep.subr.msk.bf16.mxu1 %vm11655_vm0, %v9246_v1  ;;  %vm11661_vm0 = vnez %v11608_v15 }
  0x68   :  { %6849 = vmatpush1.bf16.msk.msra.mxu0 %vm11656_vm11, %v9049_v44  ;;  %vm11664_vm11 = vnez %v11663_v51 }
  0x69   :  { %6852 = vmatprep.subr.msk.bf16.mxu0 %vm11658_vm14, %v9127_v31  ;;  %vm11670_vm14 = vnez %v11669_v14 }
  0x6a   :  { %6897 = vmatpush1.bf16.msk.msra.mxu1 %vm11657_vm10, %v9292_v42  ;;  %vm11667_vm10 = vnez %v11666_v9 }
  0x6b   :  { %6900 = vmatprep.subr.msk.bf16.mxu1 %vm11659_vm4, %v9318_v25 }
  0x6c   :  { %6855 = vmatpush1.bf16.msk.msra.mxu0 %vm11660_vm2, %v9142_v40  ;;  %vm11673_vm2 = vnez %v11672_v10  ;;  %v620_v10 = vlaneseq }
  0x6d   :  { %6858 = vmatprep.subr.msk.bf16.mxu0 %vm11664_vm11, %v11662_v36  ;;  %vm11675_vm11 = vnez %v11674_v45  ;;  %v618_v45 = vld [vmem:[%s11348_s4] sm:$0xf] }
  0x6e   :  { %6903 = vmatpush1.bf16.msk.msra.mxu1 %vm11661_vm0, %v9338_v50 }
  0x6f   :  { %6906 = vmatprep.subr.msk.bf16.mxu1 %vm11667_vm10, %v11665_v20 }
  0x70   :  { %6861 = vmatpush1.bf16.msk.msra.mxu0 %vm11670_vm14, %v11668_v21 }
  0x71   :  { %6864 = vmatprep.subr.msk.bf16.mxu0 %vm11673_vm2, %v11671_v11  ;;  %v621_v11 = vshrl.u32 %v620_v10, 7 }
  0x72   :  { %6909 = vmatpush1.bf16.msk.msra.mxu1 %vm9424_vm1, %v9436_v34 }
  0x73   :  { %6912 = vmatprep.subr.msk.bf16.mxu1 %vm9459_vm6, %v9463_v56  ;;  %v622_v37 = vsub.s32 0, %v621_v11  ;;  %v630_v56 = vsub.s32 2, %v621_v11  ;;  %v634_v23 = vsub.s32 3, %v621_v11 }
  0x74   :  { %6867 = vmatpush1.bf16.msk.msra.mxu0 %vm11675_vm11, %v9417_v55 }
  0x75   :  { %6918 = vmatprep.subr.msk.bf16.mxu0 %vm8736_vm5, %v8740_v47  ;;  %v9612_v32 = vrot.slane %v618_v45, %v622_v37  ;;  %v9618_v21 = vrot.slane %v618_v45, %v634_v23 }
  0x76   :  { %6915 = vmatpush1.bf16.msk.msra.mxu1 %vm9470_vm15, %v9474_v27  ;;  %v626_v27 = vsub.s32 1, %v621_v11 }
  0x77   :  { %6966 = vmatprep.subr.msk.bf16.mxu1 %vm8878_vm8, %v8882_v33  ;;  %v9614_v33 = vrot.slane %v618_v45, %v630_v56  ;;  %vm11741_vm8 = vnez %v11573_v5 }
  0x78   :  { %v9616_v14 = vrot.slane %v618_v45, %v626_v27 }
  0xd2   :  { %v9604_v55 = vpop.f32.mrf.mxu0  ;;  %v9606_v49 = vpop.f32.mrf.mxu1 }
  0xd4   :  { %v9608_v46 = vpop.f32.mrf.mxu0  ;;  %v9610_v47 = vpop.f32.mrf.mxu1 }
  0xd6   :  { %v761_v10 = vpop.f32.mrf.mxu0  ;;  %v922_v34 = vpop.f32.mrf.mxu1 }
  0xd7   :  { %v9621_v9 = vadd.f32 %v761_v10, %v9612_v32  ;;  %v9624_v20 = vadd.f32 %v922_v34, %v9614_v33 }
  0xd8   :  { %v763_v11 = vpop.f32.mrf.mxu0  ;;  %v924_v51 = vpop.f32.mrf.mxu1 }
  0xd9   :  { %11676 = vst [vmem:[#allocation33_spill] sm:$0xff] %v9621_v9  ;;  %11677 = vst [vmem:[#allocation34_spill] sm:$0xff] %v9624_v20  ;;  %v9627_v36 = vadd.f32 %v763_v11, %v9616_v14  ;;  %v9630_v37 = vadd.f32 %v924_v51, %v9618_v21 }
  0xda   :  { %v767_v56 = vpop.f32.mrf.mxu0 }
  0xdb   :  { %11678 = vst [vmem:[#allocation35_spill] sm:$0xff] %v9627_v36  ;;  %11679 = vst [vmem:[#allocation36_spill] sm:$0xff] %v9630_v37  ;;  %v928_v15 = vpop.f32.mrf.mxu1  ;;  %v9633_v27 = vadd.f32 %v767_v56, %v9612_v32 }
  0xdc   :  { %v9636_v23 = vadd.f32 %v928_v15, %v9614_v33  ;;  %v769_v45 = vpop.f32.mrf.mxu0 }
  0xdd   :  { %11680 = vst [vmem:[#allocation37_spill] sm:$0xff] %v9633_v27  ;;  %v930_v10 = vpop.f32.mrf.mxu1  ;;  %v9639_v34 = vadd.f32 %v769_v45, %v9616_v14 }
  0xde   :  { %11681 = vst [vmem:[#allocation38_spill] sm:$0xff] %v9636_v23  ;;  %v9642_v20 = vadd.f32 %v930_v10, %v9618_v21  ;;  %v773_v11 = vpop.f32.mrf.mxu0 }
  0xdf   :  { %11682 = vst [vmem:[#allocation39_spill] sm:$0xff] %v9639_v34  ;;  %v934_v36 = vpop.f32.mrf.mxu1  ;;  %v9645_v51 = vadd.f32 %v773_v11, %v9612_v32 }
  0xe0   :  { %11683 = vst [vmem:[#allocation40_spill] sm:$0xff] %v9642_v20  ;;  %v9648_v37 = vadd.f32 %v934_v36, %v9614_v33  ;;  %v775_v56 = vpop.f32.mrf.mxu0 }
  0xe1   :  { %11684 = vst [vmem:[#allocation41_spill] sm:$0xff] %v9645_v51  ;;  %v936_v27 = vpop.f32.mrf.mxu1  ;;  %v9651_v15 = vadd.f32 %v775_v56, %v9616_v14 }
  0xe2   :  { %11685 = vst [vmem:[#allocation42_spill] sm:$0xff] %v9648_v37  ;;  %v9654_v23 = vadd.f32 %v936_v27, %v9618_v21  ;;  %v779_v45 = vpop.f32.mrf.mxu0 }
  0xe3   :  { %11686 = vst [vmem:[#allocation43_spill] sm:$0xff] %v9651_v15  ;;  %v940_v34 = vpop.f32.mrf.mxu1  ;;  %v9657_v10 = vadd.f32 %v779_v45, %v9612_v32 }
  0xe4   :  { %11687 = vst [vmem:[#allocation44_spill] sm:$0xff] %v9654_v23  ;;  %v9660_v20 = vadd.f32 %v940_v34, %v9614_v33  ;;  %v781_v11 = vpop.f32.mrf.mxu0 }
  0xe5   :  { %11688 = vst [vmem:[#allocation45_spill] sm:$0xff] %v9657_v10  ;;  %v942_v51 = vpop.f32.mrf.mxu1  ;;  %v9663_v36 = vadd.f32 %v781_v11, %v9616_v14 }
  0xe6   :  { %11689 = vst [vmem:[#allocation46_spill] sm:$0xff] %v9660_v20  ;;  %v9666_v37 = vadd.f32 %v942_v51, %v9618_v21  ;;  %v785_v56 = vpop.f32.mrf.mxu0 }
  0xe7   :  { %11690 = vst [vmem:[#allocation47_spill] sm:$0xff] %v9663_v36  ;;  %v946_v15 = vpop.f32.mrf.mxu1  ;;  %v9669_v27 = vadd.f32 %v785_v56, %v9612_v32 }
  0xe8   :  { %11691 = vst [vmem:[#allocation48_spill] sm:$0xff] %v9666_v37  ;;  %v9672_v23 = vadd.f32 %v946_v15, %v9614_v33  ;;  %v787_v45 = vpop.f32.mrf.mxu0 }
  0xe9   :  { %11692 = vst [vmem:[#allocation49_spill] sm:$0xff] %v9669_v27  ;;  %v948_v10 = vpop.f32.mrf.mxu1  ;;  %v9675_v34 = vadd.f32 %v787_v45, %v9616_v14 }
  0xea   :  { %11693 = vst [vmem:[#allocation50_spill] sm:$0xff] %v9672_v23  ;;  %v9678_v20 = vadd.f32 %v948_v10, %v9618_v21  ;;  %v791_v11 = vpop.f32.mrf.mxu0 }
  0xeb   :  { %11694 = vst [vmem:[#allocation51_spill] sm:$0xff] %v9675_v34  ;;  %v952_v36 = vpop.f32.mrf.mxu1  ;;  %v9681_v51 = vadd.f32 %v791_v11, %v9612_v32 }
  0xec   :  { %11695 = vst [vmem:[#allocation52_spill] sm:$0xff] %v9678_v20  ;;  %v9684_v37 = vadd.f32 %v952_v36, %v9614_v33  ;;  %v793_v56 = vpop.f32.mrf.mxu0 }
  0xed   :  { %11696 = vst [vmem:[#allocation53_spill] sm:$0xff] %v9681_v51  ;;  %v954_v27 = vpop.f32.mrf.mxu1  ;;  %v9687_v15 = vadd.f32 %v793_v56, %v9616_v14 }
  0xee   :  { %11697 = vst [vmem:[#allocation54_spill] sm:$0xff] %v9684_v37  ;;  %v9690_v23 = vadd.f32 %v954_v27, %v9618_v21  ;;  %v797_v45 = vpop.f32.mrf.mxu0 }
  0xef   :  { %11698 = vst [vmem:[#allocation55_spill] sm:$0xff] %v9687_v15  ;;  %v958_v34 = vpop.f32.mrf.mxu1  ;;  %v9693_v10 = vadd.f32 %v797_v45, %v9612_v32 }
  0xf0   :  { %11699 = vst [vmem:[#allocation56_spill] sm:$0xff] %v9690_v23  ;;  %v9696_v20 = vadd.f32 %v958_v34, %v9614_v33  ;;  %v799_v11 = vpop.f32.mrf.mxu0 }
  0xf1   :  { %11700 = vst [vmem:[#allocation57_spill] sm:$0xff] %v9693_v10  ;;  %v960_v51 = vpop.f32.mrf.mxu1  ;;  %v9699_v36 = vadd.f32 %v799_v11, %v9616_v14 }
  0xf2   :  { %11701 = vst [vmem:[#allocation58_spill] sm:$0xff] %v9696_v20  ;;  %v9702_v37 = vadd.f32 %v960_v51, %v9618_v21  ;;  %v803_v56 = vpop.f32.mrf.mxu0 }
  0xf3   :  { %11702 = vst [vmem:[#allocation59_spill] sm:$0xff] %v9699_v36  ;;  %v9705_v27 = vadd.f32 %v803_v56, %v9612_v32 }
  0xf4   :  { %11703 = vst [vmem:[#allocation60_spill] sm:$0xff] %v9702_v37  ;;  %v964_v15 = vpop.f32.mrf.mxu1  ;;  %v805_v45 = vpop.f32.mrf.mxu0 }
  0xf5   :  { %11704 = vst [vmem:[#allocation61_spill] sm:$0xff] %v9705_v27  ;;  %v9708_v23 = vadd.f32 %v964_v15, %v9614_v33  ;;  %v9711_v34 = vadd.f32 %v805_v45, %v9616_v14 }
  0xf6   :  { %v966_v10 = vpop.f32.mrf.mxu1 }
  0xf7   :  { %11705 = vst [vmem:[#allocation62_spill] sm:$0xff] %v9708_v23  ;;  %11706 = vst [vmem:[#allocation63_spill] sm:$0xff] %v9711_v34  ;;  %v9714_v20 = vadd.f32 %v966_v10, %v9618_v21 }
  0xf8   :  { %v809_v11 = vpop.f32.mrf.mxu0 }
  0xf9   :  { %11707 = vst [vmem:[#allocation64_spill] sm:$0xff] %v9714_v20  ;;  %v970_v36 = vpop.f32.mrf.mxu1  ;;  %v9717_v51 = vadd.f32 %v809_v11, %v9612_v32 }
  0xfa   :  { %v9720_v37 = vadd.f32 %v970_v36, %v9614_v33  ;;  %v811_v56 = vpop.f32.mrf.mxu0 }
  0xfb   :  { %11708 = vst [vmem:[#allocation65_spill] sm:$0xff] %v9717_v51  ;;  %v972_v27 = vpop.f32.mrf.mxu1  ;;  %v9723_v15 = vadd.f32 %v811_v56, %v9616_v14 }
  0xfc   :  { %11709 = vst [vmem:[#allocation66_spill] sm:$0xff] %v9720_v37  ;;  %v9726_v23 = vadd.f32 %v972_v27, %v9618_v21  ;;  %v815_v45 = vpop.f32.mrf.mxu0 }
  0xfd   :  { %11710 = vst [vmem:[#allocation67_spill] sm:$0xff] %v9723_v15  ;;  %v976_v34 = vpop.f32.mrf.mxu1  ;;  %v9729_v10 = vadd.f32 %v815_v45, %v9612_v32 }
  0xfe   :  { %11711 = vst [vmem:[#allocation68_spill] sm:$0xff] %v9726_v23  ;;  %v9732_v20 = vadd.f32 %v976_v34, %v9614_v33  ;;  %v817_v11 = vpop.f32.mrf.mxu0 }
  0xff   :  { %11712 = vst [vmem:[#allocation69_spill] sm:$0xff] %v9729_v10  ;;  %v978_v51 = vpop.f32.mrf.mxu1  ;;  %v9735_v36 = vadd.f32 %v817_v11, %v9616_v14 }
 0x100   :  { %11713 = vst [vmem:[#allocation70_spill] sm:$0xff] %v9732_v20  ;;  %v9738_v37 = vadd.f32 %v978_v51, %v9618_v21 }
 0x101   :  { %11714 = vst [vmem:[#allocation71_spill] sm:$0xff] %v9735_v36  ;;  %v821_v56 = vpop.f32.mrf.mxu0 }
 0x102   :  { %11715 = vst [vmem:[#allocation72_spill] sm:$0xff] %v9738_v37  ;;  %v982_v15 = vpop.f32.mrf.mxu1  ;;  %v9741_v27 = vadd.f32 %v821_v56, %v9612_v32 }
 0x103   :  { %v9744_v23 = vadd.f32 %v982_v15, %v9614_v33  ;;  %v823_v45 = vpop.f32.mrf.mxu0 }
 0x104   :  { %11716 = vst [vmem:[#allocation73_spill] sm:$0xff] %v9741_v27  ;;  %v984_v10 = vpop.f32.mrf.mxu1  ;;  %v9747_v34 = vadd.f32 %v823_v45, %v9616_v14 }
 0x105   :  { %11717 = vst [vmem:[#allocation74_spill] sm:$0xff] %v9744_v23  ;;  %v9750_v20 = vadd.f32 %v984_v10, %v9618_v21  ;;  %v827_v11 = vpop.f32.mrf.mxu0 }
 0x106   :  { %11718 = vst [vmem:[#allocation75_spill] sm:$0xff] %v9747_v34  ;;  %v9753_v51 = vadd.f32 %v827_v11, %v9612_v32 }
 0x107   :  { %11719 = vst [vmem:[#allocation76_spill] sm:$0xff] %v9750_v20  ;;  %v988_v36 = vpop.f32.mrf.mxu1  ;;  %v829_v56 = vpop.f32.mrf.mxu0 }
 0x108   :  { %11720 = vst [vmem:[#allocation77_spill] sm:$0xff] %v9753_v51  ;;  %v9756_v37 = vadd.f32 %v988_v36, %v9614_v33  ;;  %v9759_v15 = vadd.f32 %v829_v56, %v9616_v14 }
 0x109   :  { %v990_v27 = vpop.f32.mrf.mxu1  ;;  %v833_v45 = vpop.f32.mrf.mxu0 }
 0x10a   :  { %11721 = vst [vmem:[#allocation78_spill] sm:$0xff] %v9756_v37  ;;  %11722 = vst [vmem:[#allocation79_spill] sm:$0xff] %v9759_v15  ;;  %v9762_v23 = vadd.f32 %v990_v27, %v9618_v21  ;;  %v9765_v10 = vadd.f32 %v833_v45, %v9612_v32 }
 0x10b   :  { %v994_v34 = vpop.f32.mrf.mxu1  ;;  %v835_v11 = vpop.f32.mrf.mxu0 }
 0x10c   :  { %11723 = vst [vmem:[#allocation80_spill] sm:$0xff] %v9762_v23  ;;  %11724 = vst [vmem:[#allocation81_spill] sm:$0xff] %v9765_v10  ;;  %v9768_v20 = vadd.f32 %v994_v34, %v9614_v33  ;;  %v9771_v36 = vadd.f32 %v835_v11, %v9616_v14 }
 0x10d   :  { %v996_v51 = vpop.f32.mrf.mxu1 }
 0x10e   :  { %11725 = vst [vmem:[#allocation82_spill] sm:$0xff] %v9768_v20  ;;  %11726 = vst [vmem:[#allocation83_spill] sm:$0xff] %v9771_v36  ;;  %v9774_v37 = vadd.f32 %v996_v51, %v9618_v21 }
 0x10f   :  { %v839_v56 = vpop.f32.mrf.mxu0 }
 0x110   :  { %11727 = vst [vmem:[#allocation84_spill] sm:$0xff] %v9774_v37  ;;  %v9777_v27 = vadd.f32 %v839_v56, %v9612_v32 }
 0x111   :  { %v1000_v15 = vpop.f32.mrf.mxu1  ;;  %v841_v45 = vpop.f32.mrf.mxu0 }
 0x112   :  { %11728 = vst [vmem:[#allocation85_spill] sm:$0xff] %v9777_v27  ;;  %v9780_v23 = vadd.f32 %v1000_v15, %v9614_v33  ;;  %v9783_v34 = vadd.f32 %v841_v45, %v9616_v14  ;;  %v756_v15 = vadd.f32 %v9604_v55, %v9612_v32 }
 0x113   :  { %v1002_v10 = vpop.f32.mrf.mxu1  ;;  %v845_v11 = vpop.f32.mrf.mxu0 }
 0x114   :  { %11729 = vst [vmem:[#allocation86_spill] sm:$0xff] %v9780_v23  ;;  %11730 = vst [vmem:[#allocation87_spill] sm:$0xff] %v9783_v34  ;;  %v9786_v20 = vadd.f32 %v1002_v10, %v9618_v21  ;;  %v9789_v51 = vadd.f32 %v845_v11, %v9612_v32  ;;  %v758_v11 = vadd.f32 %v9608_v46, %v9616_v14 }
 0x115   :  { %v1006_v36 = vpop.f32.mrf.mxu1  ;;  %v847_v56 = vpop.f32.mrf.mxu0 }
 0x116   :  { %11731 = vst [vmem:[#allocation88_spill] sm:$0xff] %v9786_v20  ;;  %11732 = vst [vmem:[#allocation89_spill] sm:$0xff] %v9789_v51  ;;  %v9792_v37 = vadd.f32 %v1006_v36, %v9614_v33  ;;  %v9797_v23 = vadd.f32 %v847_v56, %v9616_v14 }
 0x117   :  { %v1008_v27 = vpop.f32.mrf.mxu1  ;;  %v1305_v10 = vpop.f32.mrf.mxu0 }
 0x118   :  { %11733 = vst [vmem:[#allocation90_spill] sm:$0xff] %v9792_v37  ;;  %11734 = vst [vmem:[#allocation91_spill] sm:$0xff] %v9797_v23  ;;  %v9800_v45 = vadd.f32 %v1008_v27, %v9618_v21  ;;  %v1353_v51 = vadd.f32 %v1305_v10, %v756_v15  ;;  %v919_v27 = vadd.f32 %v9610_v47, %v9618_v21 }
 0x119   :  { %v1346_v20 = vpop.f32.mrf.mxu1  ;;  %v1307_v34 = vpop.f32.mrf.mxu0  ;;  %v917_v23 = vadd.f32 %v9606_v49, %v9614_v33 }
 0x11a   :  { %11735 = vst [vmem:[#allocation92_spill] sm:$0xff] %v9800_v45  ;;  %v6132_v37 = vmul.f32 -1.442695, %v1353_v51  ;;  %v1354_v9 = vadd.f32 %v1307_v34, %v758_v11 }
 0x11b   :  { %v1348_v36 = vpop.f32.mrf.mxu1  ;;  %v1309_v50 = vpop.f32.mrf.mxu0  ;;  %v1355_v46 = vadd.f32 %v1346_v20, %v917_v23 }
 0x11c   :  { %8264 = vpow2.f32 %v6132_v37  ;;  %v6133_v32 = vmul.f32 -1.442695, %v1354_v9  ;;  %v1356_v45 = vadd.f32 %v1348_v36, %v919_v27  ;;  %v11755_v27 = vld [vmem:[#allocation16_spill] sm:$0xff] }
 0x11d   :  { %v1350_v39 = vpop.f32.mrf.mxu1  ;;  %v1310_v55 = vpop.f32.mrf.mxu0 }
 0x11e   :  { %8266 = vpow2.f32 %v6133_v32  ;;  %v6134_v14 = vmul.f32 -1.442695, %v1356_v45  ;;  %v11736_v45 = vmov 0   ;;  %v11751_v32 = vld [vmem:[#allocation14_spill] sm:$0xff]  ;;  %v11753_v55 = vld [vmem:[#allocation20_spill] sm:$0xff] }
 0x11f   :  { %v1351_v56 = vpop.f32.mrf.mxu1  ;;  %8268 = vtanh.f32 %v1355_v46  ;;  %v11756_v46 = vld [vmem:[#allocation15_spill] sm:$0xff] }
 0x120   :  { %8270 = vpow2.f32 %v6134_v14  ;;  %v11758_v14 = vld [vmem:[#allocation24_spill] sm:$0xff] }
 0x129   :  { %v8265_v15 = vpop.eup %8264 }
 0x12a   :  { %v1360_v10 = vadd.f32 1.0, %v8265_v15 }
 0x12b   :  { %v8267_v34 = vpop.eup %8266 }
 0x12c   :  { %8272 = vrcp.f32 %v1360_v10  ;;  %v1366_v39 = vadd.f32 1.0, %v8267_v34  ;;  %v8269_v50 = vpop.eup %8268  ;;  %v11760_v10 = vld [vmem:[#allocation18_spill] sm:$0xff] }
 0x12d   :  { %v8271_v9 = vpop.eup %8270 }
 0x12e   :  { %8274 = vrcp.f32 %v1366_v39  ;;  %v1373_v47 = vadd.f32 1.0, %v8271_v9  ;;  %v11762_v39 = vld [vmem:[#allocation28_spill] sm:$0xff]  ;;  %v11764_v9 = vld [vmem:[#allocation22_spill] sm:$0xff] }
 0x130   :  { %8276 = vrcp.f32 %v1373_v47  ;;  %v11768_v47 = vld [vmem:[#allocation26_spill] sm:$0xff] }
 0x139   :  { %v8273_v37 = vpop.eup %8272 }
 0x13a   :  { %v1377_v51 = vmul.f32 %v8273_v37, %v8269_v50  ;;  %v11774_v50 = vld [vmem:[#allocation13_spill] sm:$0xff] }
 0x13b   :  { %v8275_v11 = vpop.eup %8274 }
 0x13c   :  { %v1376_v21 = vmul.f32 0.0, %v8275_v11  ;;  %v11777_v11 = vld [vmem:[#allocation33_spill] sm:$0xff] }
 0x13d   :  { %v8277_v33 = vpop.eup %8276 }
 0x13e   :  { %v9808_v36 = vadd.f32 %v1377_v51, %v1376_v21  ;;  %v11766_v51 = vld [vmem:[#allocation30_spill] sm:$0xff] }
 0x140   :  { %8278 = vtanh.f32 %v9808_v36 }
 0x14d   :  { %v8279_v49 = vpop.eup %8278 }
 0x14e   :  { %v1380_v20 = vmul.f32 %v8279_v49, %v8277_v33  ;;  %v11770_v33 = vld [vmem:[#allocation32_spill] sm:$0xff] }
 0x150   :  { %1381 = vst [vmem:[%s11349_s5] sm:$0xff] %v1380_v20  ;;  %v1386_v23 = vpack.c.bf16 %v1380_v20, %v1380_v20  ;;  %v11772_v20 = vld [vmem:[#allocation11_spill] sm:$0xff] }
 0x152   :  { %1612 = vmatmul.mubr.bf16.vlgmr.msra.gmra.mxu0 %v1386_v23  ;;  %1653 = vmatmul.mubr.bf16.vlgmr.msra.gmra.mxu1 %v1386_v23 }
 0x153   :  { %6921 = vmatpush1.bf16.msk.msra.mxu0 %vm8763_vm7, %v8749_v52  ;;  %6969 = vmatpush1.bf16.msk.msra.mxu1 %vm8886_vm13, %v8898_v38  ;;  %vm11737_vm7 = vnez %v11565_v16  ;;  %vm11738_vm13 = vnez %v11549_v17 }
 0x154   :  { %6924 = vmatprep.subr.msk.bf16.mxu0 %vm8779_vm9, %v8783_v0  ;;  %6972 = vmatprep.subr.msk.bf16.mxu1 %vm8981_vm3, %v8970_v8  ;;  %vm11739_vm9 = vnez %v11571_v61  ;;  %vm11740_vm3 = vnez %v11551_v22 }
 0x155   :  { %1919 = vmatprep.mubr.bf16.mxu0 %v11736_v45  ;;  %1960 = vmatprep.mubr.bf16.mxu1 %v11736_v45 }
 0x157   :  { %6927 = vmatpush1.bf16.msk.msra.mxu0 %vm8792_vm12, %v8806_v6  ;;  %6975 = vmatpush1.bf16.msk.msra.mxu1 %vm11737_vm7, %v8997_v19  ;;  %vm11742_vm12 = vnez %v11559_v53  ;;  %vm11743_vm7 = vnez %v11584_v58 }
 0x158   :  { %6930 = vmatprep.subr.msk.bf16.mxu0 %vm11738_vm13, %v8838_v18  ;;  %6978 = vmatprep.subr.msk.bf16.mxu1 %vm11739_vm9, %v9075_v62  ;;  %vm11744_vm13 = vnez %v11561_v59  ;;  %vm11745_vm9 = vnez %v11586_v4 }
 0x15b   :  { %6933 = vmatpush1.bf16.msk.msra.mxu0 %vm11740_vm3, %v8861_v26  ;;  %6981 = vmatpush1.bf16.msk.msra.mxu1 %vm11741_vm8, %v9090_v7  ;;  %vm11746_vm3 = vnez %v11567_v29  ;;  %vm11747_vm8 = vnez %v11594_v48 }
 0x15c   :  { %6936 = vmatprep.subr.msk.bf16.mxu0 %vm11742_vm12, %v8934_v54  ;;  %6984 = vmatprep.subr.msk.bf16.mxu1 %vm11743_vm7, %v9170_v60  ;;  %vm11748_vm12 = vnez %v11569_v43  ;;  %vm11749_vm7 = vnez %v11602_v41 }
 0x15f   :  { %6939 = vmatpush1.bf16.msk.msra.mxu0 %vm11744_vm13, %v8956_v3  ;;  %6987 = vmatpush1.bf16.msk.msra.mxu1 %vm11745_vm9, %v9194_v12  ;;  %vm11750_vm13 = vnez %v11577_v28 }
 0x160   :  { %6942 = vmatprep.subr.msk.bf16.mxu0 %vm11746_vm3, %v9023_v30  ;;  %6990 = vmatprep.subr.msk.bf16.mxu1 %vm11747_vm8, %v9246_v1  ;;  %vm11752_vm3 = vnez %v11751_v32 }
 0x163   :  { %6945 = vmatpush1.bf16.msk.msra.mxu0 %vm11748_vm12, %v9049_v44  ;;  %6993 = vmatpush1.bf16.msk.msra.mxu1 %vm11749_vm7, %v9292_v42  ;;  %vm11757_vm12 = vnez %v11756_v46 }
 0x164   :  { %6948 = vmatprep.subr.msk.bf16.mxu0 %vm11750_vm13, %v9127_v31  ;;  %6996 = vmatprep.subr.msk.bf16.mxu1 %vm11659_vm4, %v9318_v25 }
 0x167   :  { %6951 = vmatpush1.bf16.msk.msra.mxu0 %vm11752_vm3, %v9142_v40  ;;  %6999 = vmatpush1.bf16.msk.msra.mxu1 %vm11661_vm0, %v11753_v55 }
 0x168   :  { %6954 = vmatprep.subr.msk.bf16.mxu0 %vm11757_vm12, %v11755_v27  ;;  %7002 = vmatprep.subr.msk.bf16.mxu1 %vm11667_vm10, %v11758_v14 }
 0x16b   :  { %6957 = vmatpush1.bf16.msk.msra.mxu0 %vm11670_vm14, %v11760_v10  ;;  %7005 = vmatpush1.bf16.msk.msra.mxu1 %vm9424_vm1, %v11762_v39  ;;  %v11775_v39 = vld [vmem:[#allocation12_spill] sm:$0xff] }
 0x16c   :  { %6960 = vmatprep.subr.msk.bf16.mxu0 %vm11673_vm2, %v11764_v9  ;;  %7008 = vmatprep.subr.msk.bf16.mxu1 %vm9459_vm6, %v11766_v51  ;;  %vm11776_vm1 = vnez %v11775_v39  ;;  %v11780_v39 = vld [vmem:[#allocation34_spill] sm:$0xff]  ;;  %vm11785_vm6 = vnez %v11547_v2  ;;  %vm11790_vm2 = vnez %v11573_v5 }
 0x16f   :  { %6963 = vmatpush1.bf16.msk.msra.mxu0 %vm11675_vm11, %v11768_v47  ;;  %7011 = vmatpush1.bf16.msk.msra.mxu1 %vm9470_vm15, %v11770_v33  ;;  %v11778_v47 = vld [vmem:[#allocation35_spill] sm:$0xff]  ;;  %vm11783_vm15 = vnez %v11545_v63  ;;  %vm11784_vm11 = vnez %v11563_v13 }
 0x170   :  { %7014 = vmatprep.subr.msk.bf16.mxu0 %vm8736_vm5, %v11772_v20  ;;  %7062 = vmatprep.subr.msk.bf16.mxu1 %vm11776_vm1, %v11774_v50  ;;  %v11779_v20 = vld [vmem:[#allocation36_spill] sm:$0xff]  ;;  %vm11781_vm1 = vnez %v11543_v57  ;;  %vm11782_vm5 = vnez %v11557_v35 }
 0x212   :  { %v1613_v37 = vpop.f32.mrf.mxu0  ;;  %v1654_v9 = vpop.f32.mrf.mxu1 }
 0x213   :  { %v1661_v51 = vadd.f32 %v1613_v37, %v11777_v11  ;;  %v1663_v50 = vadd.f32 %v1654_v9, %v11780_v39  ;;  %v11799_v9 = vld [vmem:[#allocation16_spill] sm:$0xff] }
 0x214   :  { %v1615_v34 = vpop.f32.mrf.mxu0  ;;  %v1656_v10 = vpop.f32.mrf.mxu1 }
 0x215   :  { %v6167_v21 = vmul.f32 -1.442695, %v1661_v51  ;;  %v1662_v15 = vadd.f32 %v1615_v34, %v11778_v47  ;;  %v1664_v27 = vadd.f32 %v1656_v10, %v11779_v20 }
 0x216   :  { %v1617_v14 = vpop.f32.mrf.mxu0  ;;  %v1658_v49 = vpop.f32.mrf.mxu1 }
 0x217   :  { %8280 = vpow2.f32 %v6167_v21  ;;  %v6168_v33 = vmul.f32 -1.442695, %v1662_v15  ;;  %v6169_v56 = vmul.f32 -1.442695, %v1664_v27  ;;  %v11801_v49 = vld [vmem:[#allocation24_spill] sm:$0xff] }
 0x218   :  { %v1618_v46 = vpop.f32.mrf.mxu0  ;;  %v1659_v23 = vpop.f32.mrf.mxu1 }
 0x219   :  { %8282 = vpow2.f32 %v6168_v33  ;;  %v11803_v23 = vld [vmem:[#allocation18_spill] sm:$0xff] }
 0x21a   :  { %8284 = vtanh.f32 %v1663_v50 }
 0x21b   :  { %8286 = vpow2.f32 %v6169_v56  ;;  %v11797_v56 = vld [vmem:[#allocation20_spill] sm:$0xff] }
 0x224   :  { %v8281_v55 = vpop.eup %8280 }
 0x225   :  { %v1668_v32 = vadd.f32 1.0, %v8281_v55 }
 0x226   :  { %v8283_v37 = vpop.eup %8282 }
 0x227   :  { %8288 = vrcp.f32 %v1668_v32  ;;  %v1674_v51 = vadd.f32 1.0, %v8283_v37  ;;  %v8285_v14 = vpop.eup %8284 }
 0x228   :  { %v8287_v34 = vpop.eup %8286 }
 0x229   :  { %8290 = vrcp.f32 %v1674_v51  ;;  %v1681_v47 = vadd.f32 1.0, %v8287_v34  ;;  %v11805_v51 = vld [vmem:[#allocation28_spill] sm:$0xff]  ;;  %v11808_v34 = vld [vmem:[#allocation22_spill] sm:$0xff] }
 0x22b   :  { %8292 = vrcp.f32 %v1681_v47  ;;  %v11814_v47 = vld [vmem:[#allocation26_spill] sm:$0xff] }
 0x234   :  { %v8289_v11 = vpop.eup %8288 }
 0x235   :  { %v1685_v15 = vmul.f32 %v8289_v11, %v8285_v14  ;;  %v11806_v14 = vld [vmem:[#allocation27_spill] sm:$0xff]  ;;  %v11809_v11 = vld [vmem:[#allocation21_spill] sm:$0xff] }
 0x236   :  { %v8291_v46 = vpop.eup %8290 }
 0x237   :  { %v1684_v21 = vmul.f32 %v8291_v46, %v9808_v36  ;;  %v11812_v46 = vld [vmem:[#allocation29_spill] sm:$0xff] }
 0x238   :  { %v8293_v55 = vpop.eup %8292 }
 0x239   :  { %v9917_v10 = vadd.f32 %v1685_v15, %v1684_v21  ;;  %v11811_v15 = vld [vmem:[#allocation30_spill] sm:$0xff]  ;;  %v11815_v21 = vld [vmem:[#allocation25_spill] sm:$0xff] }
 0x23b   :  { %8294 = vtanh.f32 %v9917_v10 }
 0x248   :  { %v8295_v27 = vpop.eup %8294 }
 0x249   :  { %v1688_v39 = vmul.f32 %v8295_v27, %v8293_v55  ;;  %v11817_v55 = vld [vmem:[#allocation32_spill] sm:$0xff]  ;;  %v11818_v27 = vld [vmem:[#allocation31_spill] sm:$0xff] }
 0x24b   :  { %1689 = vst [vmem:[%s11349_s5 + $0x8] sm:$0xff] %v1688_v39  ;;  %v1694_v32 = vpack.c.bf16 %v1688_v39, %v1688_v39  ;;  %v11820_v39 = vld [vmem:[#allocation11_spill] sm:$0xff] }
 0x24d   :  { %1920 = vmatmul.mubr.bf16.vlgmr.msra.gmra.mxu0 %v1694_v32  ;;  %1961 = vmatmul.mubr.bf16.vlgmr.msra.gmra.mxu1 %v1694_v32  ;;  %v11821_v32 = vld [vmem:[#allocation10_spill] sm:$0xff] }
 0x24e   :  { %7017 = vmatpush1.bf16.msk.msra.mxu0 %vm11781_vm1, %v8749_v52  ;;  %7065 = vmatpush1.bf16.msk.msra.mxu1 %vm11782_vm5, %v8898_v38  ;;  %vm11786_vm1 = vnez %v11565_v16  ;;  %vm11787_vm5 = vnez %v11549_v17 }
 0x24f   :  { %7020 = vmatprep.subr.msk.bf16.mxu0 %vm11783_vm15, %v8783_v0  ;;  %7068 = vmatprep.subr.msk.bf16.mxu1 %vm11784_vm11, %v8970_v8  ;;  %vm11788_vm15 = vnez %v11571_v61  ;;  %vm11789_vm11 = vnez %v11551_v22 }
 0x250   :  { %2227 = vmatprep.mubr.bf16.mxu0 %v11736_v45  ;;  %2268 = vmatprep.mubr.bf16.mxu1 %v11736_v45 }
 0x252   :  { %7023 = vmatpush1.bf16.msk.msra.mxu0 %vm11785_vm6, %v8806_v6  ;;  %7071 = vmatpush1.bf16.msk.msra.mxu1 %vm11786_vm1, %v8997_v19  ;;  %vm11791_vm6 = vnez %v11559_v53  ;;  %vm11792_vm1 = vnez %v11584_v58 }
 0x253   :  { %7026 = vmatprep.subr.msk.bf16.mxu0 %vm11787_vm5, %v8838_v18  ;;  %7074 = vmatprep.subr.msk.bf16.mxu1 %vm11788_vm15, %v9075_v62  ;;  %vm11793_vm5 = vnez %v11561_v59 }
 0x256   :  { %7029 = vmatpush1.bf16.msk.msra.mxu0 %vm11789_vm11, %v8861_v26  ;;  %7077 = vmatpush1.bf16.msk.msra.mxu1 %vm11790_vm2, %v9090_v7  ;;  %vm11794_vm11 = vnez %v11567_v29 }
 0x257   :  { %7032 = vmatprep.subr.msk.bf16.mxu0 %vm11791_vm6, %v8934_v54  ;;  %7080 = vmatprep.subr.msk.bf16.mxu1 %vm11792_vm1, %v9170_v60  ;;  %vm11795_vm6 = vnez %v11569_v43 }
 0x25a   :  { %7035 = vmatpush1.bf16.msk.msra.mxu0 %vm11793_vm5, %v8956_v3  ;;  %7083 = vmatpush1.bf16.msk.msra.mxu1 %vm11745_vm9, %v9194_v12 }
 0x25b   :  { %7038 = vmatprep.subr.msk.bf16.mxu0 %vm11794_vm11, %v9023_v30  ;;  %7086 = vmatprep.subr.msk.bf16.mxu1 %vm11747_vm8, %v9246_v1 }
 0x25e   :  { %7041 = vmatpush1.bf16.msk.msra.mxu0 %vm11795_vm6, %v9049_v44  ;;  %7089 = vmatpush1.bf16.msk.msra.mxu1 %vm11749_vm7, %v9292_v42 }
 0x25f   :  { %7044 = vmatprep.subr.msk.bf16.mxu0 %vm11750_vm13, %v9127_v31  ;;  %7092 = vmatprep.subr.msk.bf16.mxu1 %vm11659_vm4, %v9318_v25  ;;  %vm11807_vm4 = vnez %v11806_v14  ;;  %v11823_v14 = vld [vmem:[#allocation13_spill] sm:$0xff] }
 0x262   :  { %7047 = vmatpush1.bf16.msk.msra.mxu0 %vm11752_vm3, %v9142_v40  ;;  %7095 = vmatpush1.bf16.msk.msra.mxu1 %vm11661_vm0, %v11797_v56  ;;  %vm11810_vm3 = vnez %v11809_v11  ;;  %vm11813_vm0 = vnez %v11812_v46  ;;  %v11826_v46 = vld [vmem:[#allocation37_spill] sm:$0xff] }
 0x263   :  { %7050 = vmatprep.subr.msk.bf16.mxu0 %vm11757_vm12, %v11799_v9  ;;  %7098 = vmatprep.subr.msk.bf16.mxu1 %vm11667_vm10, %v11801_v49  ;;  %vm11816_vm12 = vnez %v11815_v21  ;;  %vm11819_vm10 = vnez %v11818_v27 }
 0x266   :  { %7053 = vmatpush1.bf16.msk.msra.mxu0 %vm11670_vm14, %v11803_v23  ;;  %7101 = vmatpush1.bf16.msk.msra.mxu1 %vm11807_vm4, %v11805_v51  ;;  %vm11822_vm14 = vnez %v11821_v32  ;;  %v11824_v51 = vld [vmem:[#allocation12_spill] sm:$0xff] }
 0x267   :  { %7056 = vmatprep.subr.msk.bf16.mxu0 %vm11810_vm3, %v11808_v34  ;;  %7104 = vmatprep.subr.msk.bf16.mxu1 %vm11813_vm0, %v11811_v15  ;;  %vm11825_vm4 = vnez %v11824_v51  ;;  %v11829_v51 = vld [vmem:[#allocation38_spill] sm:$0xff]  ;;  %vm11834_vm0 = vnez %v11547_v2 }
 0x26a   :  { %7059 = vmatpush1.bf16.msk.msra.mxu0 %vm11816_vm12, %v11814_v47  ;;  %7107 = vmatpush1.bf16.msk.msra.mxu1 %vm11819_vm10, %v11817_v55  ;;  %v11827_v47 = vld [vmem:[#allocation39_spill] sm:$0xff]  ;;  %vm11832_vm10 = vnez %v11545_v63  ;;  %vm11833_vm12 = vnez %v11563_v13 }
 0x26b   :  { %7110 = vmatprep.subr.msk.bf16.mxu0 %vm11822_vm14, %v11820_v39  ;;  %7158 = vmatprep.subr.msk.bf16.mxu1 %vm11825_vm4, %v11823_v14  ;;  %v11828_v39 = vld [vmem:[#allocation40_spill] sm:$0xff]  ;;  %vm11830_vm4 = vnez %v11543_v57  ;;  %vm11831_vm14 = vnez %v11557_v35 }
 0x30d   :  { %v1921_v11 = vpop.f32.mrf.mxu0  ;;  %v1962_v34 = vpop.f32.mrf.mxu1 }
 0x30e   :  { %v1969_v15 = vadd.f32 %v1921_v11, %v11826_v46  ;;  %v1971_v14 = vadd.f32 %v1962_v34, %v11829_v51  ;;  %v11845_v34 = vld [vmem:[#allocation16_spill] sm:$0xff] }
 0x30f   :  { %v1923_v37 = vpop.f32.mrf.mxu0  ;;  %v1964_v23 = vpop.f32.mrf.mxu1 }
 0x310   :  { %v6202_v21 = vmul.f32 -1.442695, %v1969_v15  ;;  %v1970_v20 = vadd.f32 %v1923_v37, %v11827_v47  ;;  %v1972_v9 = vadd.f32 %v1964_v23, %v11828_v39  ;;  %v11849_v39 = vld [vmem:[#allocation23_spill] sm:$0xff] }
 0x311   :  { %v1925_v49 = vpop.f32.mrf.mxu0  ;;  %v1966_v27 = vpop.f32.mrf.mxu1 }
 0x312   :  { %8296 = vpow2.f32 %v6202_v21  ;;  %v6203_v55 = vmul.f32 -1.442695, %v1970_v20  ;;  %v6204_v50 = vmul.f32 -1.442695, %v1972_v9  ;;  %v11848_v27 = vld [vmem:[#allocation24_spill] sm:$0xff] }
 0x313   :  { %v1926_v33 = vpop.f32.mrf.mxu0  ;;  %v1967_v32 = vpop.f32.mrf.mxu1 }
 0x314   :  { %8298 = vpow2.f32 %v6203_v55  ;;  %v11846_v55 = vld [vmem:[#allocation15_spill] sm:$0xff]  ;;  %v11851_v32 = vld [vmem:[#allocation18_spill] sm:$0xff] }
 0x315   :  { %8300 = vtanh.f32 %v1971_v14  ;;  %v11843_v14 = vld [vmem:[#allocation19_spill] sm:$0xff] }
 0x316   :  { %8302 = vpow2.f32 %v6204_v50  ;;  %v11842_v50 = vld [vmem:[#allocation20_spill] sm:$0xff] }
 0x31f   :  { %v8297_v56 = vpop.eup %8296 }
 0x320   :  { %v1976_v36 = vadd.f32 1.0, %v8297_v56 }
 0x321   :  { %v8299_v11 = vpop.eup %8298 }
 0x322   :  { %8304 = vrcp.f32 %v1976_v36  ;;  %v1982_v15 = vadd.f32 1.0, %v8299_v11  ;;  %v8301_v49 = vpop.eup %8300  ;;  %v11852_v11 = vld [vmem:[#allocation17_spill] sm:$0xff] }
 0x323   :  { %v8303_v37 = vpop.eup %8302 }
 0x324   :  { %8306 = vrcp.f32 %v1982_v15  ;;  %v1989_v47 = vadd.f32 1.0, %v8303_v37  ;;  %v11854_v15 = vld [vmem:[#allocation28_spill] sm:$0xff]  ;;  %v11857_v37 = vld [vmem:[#allocation22_spill] sm:$0xff] }
 0x326   :  { %8308 = vrcp.f32 %v1989_v47  ;;  %v11862_v47 = vld [vmem:[#allocation26_spill] sm:$0xff] }
 0x32f   :  { %v8305_v46 = vpop.eup %8304 }
 0x330   :  { %v1993_v20 = vmul.f32 %v8305_v46, %v8301_v49  ;;  %v11855_v49 = vld [vmem:[#allocation27_spill] sm:$0xff] }
 0x331   :  { %v8307_v33 = vpop.eup %8306 }
 0x332   :  { %v1992_v21 = vmul.f32 %v8307_v33, %v9917_v10  ;;  %v11840_v10 = vld [vmem:[#allocation14_spill] sm:$0xff]  ;;  %v11860_v33 = vld [vmem:[#allocation29_spill] sm:$0xff] }
 0x333   :  { %v8309_v56 = vpop.eup %8308 }
 0x334   :  { %v10026_v23 = vadd.f32 %v1993_v20, %v1992_v21  ;;  %v11859_v20 = vld [vmem:[#allocation30_spill] sm:$0xff]  ;;  %v11863_v21 = vld [vmem:[#allocation25_spill] sm:$0xff] }
 0x336   :  { %8310 = vtanh.f32 %v10026_v23 }
 0x343   :  { %v8311_v9 = vpop.eup %8310 }
 0x344   :  { %v1996_v51 = vmul.f32 %v8311_v9, %v8309_v56  ;;  %v11865_v56 = vld [vmem:[#allocation32_spill] sm:$0xff]  ;;  %v11866_v9 = vld [vmem:[#allocation31_spill] sm:$0xff] }
 0x346   :  { %1997 = vst [vmem:[%s11349_s5 + $0x10] sm:$0xff] %v1996_v51  ;;  %v2002_v36 = vpack.c.bf16 %v1996_v51, %v1996_v51  ;;  %v11868_v51 = vld [vmem:[#allocation11_spill] sm:$0xff] }
 0x348   :  { %2228 = vmatmul.mubr.bf16.vlgmr.msra.gmra.mxu0 %v2002_v36  ;;  %2269 = vmatmul.mubr.bf16.vlgmr.msra.gmra.mxu1 %v2002_v36  ;;  %v11869_v36 = vld [vmem:[#allocation10_spill] sm:$0xff] }
 0x349   :  { %7113 = vmatpush1.bf16.msk.msra.mxu0 %vm11830_vm4, %v8749_v52  ;;  %7161 = vmatpush1.bf16.msk.msra.mxu1 %vm11831_vm14, %v8898_v38  ;;  %vm11835_vm4 = vnez %v11565_v16  ;;  %vm11836_vm14 = vnez %v11549_v17 }
 0x34a   :  { %7116 = vmatprep.subr.msk.bf16.mxu0 %vm11832_vm10, %v8783_v0  ;;  %7164 = vmatprep.subr.msk.bf16.mxu1 %vm11833_vm12, %v8970_v8  ;;  %vm11837_vm12 = vnez %v11551_v22 }
 0x34b   :  { %2535 = vmatprep.mubr.bf16.mxu0 %v11736_v45  ;;  %2576 = vmatprep.mubr.bf16.mxu1 %v11736_v45 }
 0x34d   :  { %7119 = vmatpush1.bf16.msk.msra.mxu0 %vm11834_vm0, %v8806_v6  ;;  %7167 = vmatpush1.bf16.msk.msra.mxu1 %vm11835_vm4, %v8997_v19  ;;  %vm11838_vm0 = vnez %v11559_v53 }
 0x34e   :  { %7122 = vmatprep.subr.msk.bf16.mxu0 %vm11836_vm14, %v8838_v18  ;;  %7170 = vmatprep.subr.msk.bf16.mxu1 %vm11788_vm15, %v9075_v62 }
 0x351   :  { %7125 = vmatpush1.bf16.msk.msra.mxu0 %vm11837_vm12, %v8861_v26  ;;  %7173 = vmatpush1.bf16.msk.msra.mxu1 %vm11790_vm2, %v9090_v7 }
 0x352   :  { %7128 = vmatprep.subr.msk.bf16.mxu0 %vm11838_vm0, %v8934_v54  ;;  %7176 = vmatprep.subr.msk.bf16.mxu1 %vm11792_vm1, %v9170_v60 }
 0x355   :  { %7131 = vmatpush1.bf16.msk.msra.mxu0 %vm11793_vm5, %v8956_v3  ;;  %7179 = vmatpush1.bf16.msk.msra.mxu1 %vm11745_vm9, %v9194_v12  ;;  %vm11839_vm9 = vnez %v11606_v24 }
 0x356   :  { %7134 = vmatprep.subr.msk.bf16.mxu0 %vm11794_vm11, %v9023_v30  ;;  %7182 = vmatprep.subr.msk.bf16.mxu1 %vm11747_vm8, %v9246_v1  ;;  %vm11841_vm11 = vnez %v11840_v10  ;;  %vm11844_vm8 = vnez %v11843_v14 }
 0x359   :  { %7137 = vmatpush1.bf16.msk.msra.mxu0 %vm11795_vm6, %v9049_v44  ;;  %7185 = vmatpush1.bf16.msk.msra.mxu1 %vm11749_vm7, %v9292_v42  ;;  %vm11847_vm6 = vnez %v11846_v55  ;;  %vm11850_vm7 = vnez %v11849_v39 }
 0x35a   :  { %7140 = vmatprep.subr.msk.bf16.mxu0 %vm11750_vm13, %v9127_v31  ;;  %7188 = vmatprep.subr.msk.bf16.mxu1 %vm11839_vm9, %v9318_v25  ;;  %vm11853_vm13 = vnez %v11852_v11  ;;  %vm11856_vm9 = vnez %v11855_v49  ;;  %v11871_v49 = vld [vmem:[#allocation13_spill] sm:$0xff] }
 0x35d   :  { %7143 = vmatpush1.bf16.msk.msra.mxu0 %vm11841_vm11, %v9142_v40  ;;  %7191 = vmatpush1.bf16.msk.msra.mxu1 %vm11844_vm8, %v11842_v50  ;;  %vm11861_vm8 = vnez %v11860_v33  ;;  %v11874_v33 = vld [vmem:[#allocation41_spill] sm:$0xff] }
 0x35e   :  { %7146 = vmatprep.subr.msk.bf16.mxu0 %vm11847_vm6, %v11845_v34  ;;  %7194 = vmatprep.subr.msk.bf16.mxu1 %vm11850_vm7, %v11848_v27  ;;  %vm11864_vm6 = vnez %v11863_v21  ;;  %vm11867_vm7 = vnez %v11866_v9 }
 0x361   :  { %7149 = vmatpush1.bf16.msk.msra.mxu0 %vm11853_vm13, %v11851_v32  ;;  %7197 = vmatpush1.bf16.msk.msra.mxu1 %vm11856_vm9, %v11854_v15  ;;  %vm11870_vm13 = vnez %v11869_v36  ;;  %v11872_v15 = vld [vmem:[#allocation12_spill] sm:$0xff] }
 0x362   :  { %7152 = vmatprep.subr.msk.bf16.mxu0 %vm11810_vm3, %v11857_v37  ;;  %7200 = vmatprep.subr.msk.bf16.mxu1 %vm11861_vm8, %v11859_v20  ;;  %vm11873_vm9 = vnez %v11872_v15  ;;  %v11877_v15 = vld [vmem:[#allocation42_spill] sm:$0xff] }
 0x365   :  { %7155 = vmatpush1.bf16.msk.msra.mxu0 %vm11864_vm6, %v11862_v47  ;;  %7203 = vmatpush1.bf16.msk.msra.mxu1 %vm11867_vm7, %v11865_v56  ;;  %v11875_v47 = vld [vmem:[#allocation43_spill] sm:$0xff]  ;;  %vm11880_vm7 = vnez %v11563_v13  ;;  %vm11881_vm6 = vnez %v11547_v2 }
 0x366   :  { %7206 = vmatprep.subr.msk.bf16.mxu0 %vm11870_vm13, %v11868_v51  ;;  %7254 = vmatprep.subr.msk.bf16.mxu1 %vm11873_vm9, %v11871_v49  ;;  %v11876_v51 = vld [vmem:[#allocation44_spill] sm:$0xff]  ;;  %vm11878_vm9 = vnez %v11543_v57  ;;  %vm11879_vm13 = vnez %v11557_v35 }
 0x408   :  { %v2229_v46 = vpop.f32.mrf.mxu0  ;;  %v2270_v37 = vpop.f32.mrf.mxu1 }
 0x409   :  { %v2277_v20 = vadd.f32 %v2229_v46, %v11874_v33  ;;  %v2279_v49 = vadd.f32 %v2270_v37, %v11877_v15  ;;  %v11893_v37 = vld [vmem:[#allocation16_spill] sm:$0xff] }
 0x40a   :  { %v2231_v11 = vpop.f32.mrf.mxu0  ;;  %v2272_v32 = vpop.f32.mrf.mxu1 }
 0x40b   :  { %v6237_v21 = vmul.f32 -1.442695, %v2277_v20  ;;  %v2278_v39 = vadd.f32 %v2231_v11, %v11875_v47  ;;  %v2280_v34 = vadd.f32 %v2272_v32, %v11876_v51  ;;  %v11897_v51 = vld [vmem:[#allocation23_spill] sm:$0xff] }
 0x40c   :  { %v2233_v27 = vpop.f32.mrf.mxu0  ;;  %v2274_v9 = vpop.f32.mrf.mxu1 }
 0x40d   :  { %8312 = vpow2.f32 %v6237_v21  ;;  %v6238_v56 = vmul.f32 -1.442695, %v2278_v39  ;;  %v6239_v14 = vmul.f32 -1.442695, %v2280_v34  ;;  %v11896_v9 = vld [vmem:[#allocation24_spill] sm:$0xff] }
 0x40e   :  { %v2234_v55 = vpop.f32.mrf.mxu0  ;;  %v2275_v36 = vpop.f32.mrf.mxu1 }
 0x40f   :  { %8314 = vpow2.f32 %v6238_v56  ;;  %v11894_v56 = vld [vmem:[#allocation15_spill] sm:$0xff]  ;;  %v11899_v36 = vld [vmem:[#allocation18_spill] sm:$0xff] }
 0x410   :  { %8316 = vtanh.f32 %v2279_v49  ;;  %v11891_v49 = vld [vmem:[#allocation19_spill] sm:$0xff] }
 0x411   :  { %8318 = vpow2.f32 %v6239_v14  ;;  %v11890_v14 = vld [vmem:[#allocation20_spill] sm:$0xff] }
 0x41a   :  { %v8313_v50 = vpop.eup %8312 }
 0x41b   :  { %v2284_v10 = vadd.f32 1.0, %v8313_v50 }
 0x41c   :  { %v8315_v46 = vpop.eup %8314 }
 0x41d   :  { %8320 = vrcp.f32 %v2284_v10  ;;  %v2290_v20 = vadd.f32 1.0, %v8315_v46  ;;  %v8317_v27 = vpop.eup %8316  ;;  %v11900_v46 = vld [vmem:[#allocation17_spill] sm:$0xff] }
 0x41e   :  { %v8319_v11 = vpop.eup %8318 }
 0x41f   :  { %8322 = vrcp.f32 %v2290_v20  ;;  %v2297_v47 = vadd.f32 1.0, %v8319_v11  ;;  %v11902_v20 = vld [vmem:[#allocation28_spill] sm:$0xff]  ;;  %v11905_v11 = vld [vmem:[#allocation22_spill] sm:$0xff] }
 0x421   :  { %8324 = vrcp.f32 %v2297_v47  ;;  %v11909_v47 = vld [vmem:[#allocation26_spill] sm:$0xff] }
 0x42a   :  { %v8321_v33 = vpop.eup %8320 }
 0x42b   :  { %v2301_v39 = vmul.f32 %v8321_v33, %v8317_v27  ;;  %v11903_v27 = vld [vmem:[#allocation27_spill] sm:$0xff] }
 0x42c   :  { %v8323_v55 = vpop.eup %8322 }
 0x42d   :  { %v2300_v21 = vmul.f32 %v8323_v55, %v10026_v23  ;;  %v11921_v55 = vld [vmem:[#allocation45_spill] sm:$0xff] }
 0x42e   :  { %v8325_v50 = vpop.eup %8324 }
 0x42f   :  { %v10135_v32 = vadd.f32 %v2301_v39, %v2300_v21  ;;  %v11907_v39 = vld [vmem:[#allocation30_spill] sm:$0xff]  ;;  %v11910_v21 = vld [vmem:[#allocation25_spill] sm:$0xff] }
 0x431   :  { %8326 = vtanh.f32 %v10135_v32 }
 0x43e   :  { %v8327_v34 = vpop.eup %8326 }
 0x43f   :  { %v2304_v15 = vmul.f32 %v8327_v34, %v8325_v50  ;;  %v11912_v50 = vld [vmem:[#allocation32_spill] sm:$0xff]  ;;  %v11913_v34 = vld [vmem:[#allocation31_spill] sm:$0xff] }
 0x441   :  { %2305 = vst [vmem:[%s11349_s5 + $0x18] sm:$0xff] %v2304_v15  ;;  %v2310_v10 = vpack.c.bf16 %v2304_v15, %v2304_v15  ;;  %v11915_v15 = vld [vmem:[#allocation11_spill] sm:$0xff] }
 0x443   :  { %2536 = vmatmul.mubr.bf16.vlgmr.msra.gmra.mxu0 %v2310_v10  ;;  %2577 = vmatmul.mubr.bf16.vlgmr.msra.gmra.mxu1 %v2310_v10  ;;  %v11916_v10 = vld [vmem:[#allocation10_spill] sm:$0xff] }
 0x444   :  { %7209 = vmatpush1.bf16.msk.msra.mxu0 %vm11878_vm9, %v8749_v52  ;;  %7257 = vmatpush1.bf16.msk.msra.mxu1 %vm11879_vm13, %v8898_v38 }
 0x445   :  { %7212 = vmatprep.subr.msk.bf16.mxu0 %vm11832_vm10, %v8783_v0  ;;  %7260 = vmatprep.subr.msk.bf16.mxu1 %vm11880_vm7, %v8970_v8 }
 0x446   :  { %2843 = vmatprep.mubr.bf16.mxu0 %v11736_v45  ;;  %2884 = vmatprep.mubr.bf16.mxu1 %v11736_v45 }
 0x448   :  { %7215 = vmatpush1.bf16.msk.msra.mxu0 %vm11881_vm6, %v8806_v6  ;;  %7263 = vmatpush1.bf16.msk.msra.mxu1 %vm11835_vm4, %v8997_v19 }
 0x449   :  { %7218 = vmatprep.subr.msk.bf16.mxu0 %vm11836_vm14, %v8838_v18  ;;  %7266 = vmatprep.subr.msk.bf16.mxu1 %vm11788_vm15, %v9075_v62  ;;  %vm11882_vm15 = vnez %v11586_v4 }
 0x44c   :  { %7221 = vmatpush1.bf16.msk.msra.mxu0 %vm11837_vm12, %v8861_v26  ;;  %7269 = vmatpush1.bf16.msk.msra.mxu1 %vm11790_vm2, %v9090_v7  ;;  %vm11883_vm12 = vnez %v11567_v29  ;;  %vm11884_vm2 = vnez %v11594_v48 }
 0x44d   :  { %7224 = vmatprep.subr.msk.bf16.mxu0 %vm11838_vm0, %v8934_v54  ;;  %7272 = vmatprep.subr.msk.bf16.mxu1 %vm11792_vm1, %v9170_v60  ;;  %vm11885_vm0 = vnez %v11569_v43  ;;  %vm11886_vm1 = vnez %v11602_v41 }
 0x450   :  { %7227 = vmatpush1.bf16.msk.msra.mxu0 %vm11793_vm5, %v8956_v3  ;;  %7275 = vmatpush1.bf16.msk.msra.mxu1 %vm11882_vm15, %v9194_v12  ;;  %vm11887_vm5 = vnez %v11577_v28  ;;  %vm11888_vm15 = vnez %v11606_v24 }
 0x451   :  { %7230 = vmatprep.subr.msk.bf16.mxu0 %vm11883_vm12, %v9023_v30  ;;  %7278 = vmatprep.subr.msk.bf16.mxu1 %vm11884_vm2, %v9246_v1  ;;  %vm11892_vm2 = vnez %v11891_v49 }
 0x454   :  { %7233 = vmatpush1.bf16.msk.msra.mxu0 %vm11885_vm0, %v9049_v44  ;;  %7281 = vmatpush1.bf16.msk.msra.mxu1 %vm11886_vm1, %v9292_v42  ;;  %vm11895_vm0 = vnez %v11894_v56  ;;  %vm11898_vm1 = vnez %v11897_v51 }
 0x455   :  { %7236 = vmatprep.subr.msk.bf16.mxu0 %vm11887_vm5, %v9127_v31  ;;  %7284 = vmatprep.subr.msk.bf16.mxu1 %vm11888_vm15, %v9318_v25  ;;  %vm11901_vm5 = vnez %v11900_v46  ;;  %vm11904_vm15 = vnez %v11903_v27  ;;  %v11918_v27 = vld [vmem:[#allocation13_spill] sm:$0xff] }
 0x458   :  { %7239 = vmatpush1.bf16.msk.msra.mxu0 %vm11841_vm11, %v9142_v40  ;;  %7287 = vmatpush1.bf16.msk.msra.mxu1 %vm11892_vm2, %v11890_v14 }
 0x459   :  { %7242 = vmatprep.subr.msk.bf16.mxu0 %vm11895_vm0, %v11893_v37  ;;  %7290 = vmatprep.subr.msk.bf16.mxu1 %vm11898_vm1, %v11896_v9  ;;  %vm11911_vm0 = vnez %v11910_v21  ;;  %vm11914_vm1 = vnez %v11913_v34 }
 0x45c   :  { %7245 = vmatpush1.bf16.msk.msra.mxu0 %vm11901_vm5, %v11899_v36  ;;  %7293 = vmatpush1.bf16.msk.msra.mxu1 %vm11904_vm15, %v11902_v20  ;;  %vm11917_vm5 = vnez %v11916_v10  ;;  %v11919_v20 = vld [vmem:[#allocation12_spill] sm:$0xff] }
 0x45d   :  { %7248 = vmatprep.subr.msk.bf16.mxu0 %vm11810_vm3, %v11905_v11  ;;  %7296 = vmatprep.subr.msk.bf16.mxu1 %vm11861_vm8, %v11907_v39  ;;  %vm11920_vm15 = vnez %v11919_v20  ;;  %v11924_v20 = vld [vmem:[#allocation46_spill] sm:$0xff] }
 0x460   :  { %7251 = vmatpush1.bf16.msk.msra.mxu0 %vm11911_vm0, %v11909_v47  ;;  %7299 = vmatpush1.bf16.msk.msra.mxu1 %vm11914_vm1, %v11912_v50  ;;  %v11922_v47 = vld [vmem:[#allocation47_spill] sm:$0xff] }
 0x461   :  { %7302 = vmatprep.subr.msk.bf16.mxu0 %vm11917_vm5, %v11915_v15  ;;  %7350 = vmatprep.subr.msk.bf16.mxu1 %vm11920_vm15, %v11918_v27  ;;  %v11923_v15 = vld [vmem:[#allocation48_spill] sm:$0xff] }
 0x503   :  { %v2537_v33 = vpop.f32.mrf.mxu0  ;;  %v2578_v11 = vpop.f32.mrf.mxu1 }
 0x504   :  { %v2585_v39 = vadd.f32 %v2537_v33, %v11921_v55  ;;  %v2587_v27 = vadd.f32 %v2578_v11, %v11924_v20  ;;  %v11940_v11 = vld [vmem:[#allocation16_spill] sm:$0xff] }
 0x505   :  { %v2539_v46 = vpop.f32.mrf.mxu0  ;;  %v2580_v36 = vpop.f32.mrf.mxu1 }
 0x506   :  { %v6272_v21 = vmul.f32 -1.442695, %v2585_v39  ;;  %v2586_v51 = vadd.f32 %v2539_v46, %v11922_v47  ;;  %v2588_v37 = vadd.f32 %v2580_v36, %v11923_v15  ;;  %v11944_v15 = vld [vmem:[#allocation23_spill] sm:$0xff] }
 0x507   :  { %v2541_v9 = vpop.f32.mrf.mxu0  ;;  %v2582_v34 = vpop.f32.mrf.mxu1 }
 0x508   :  { %8328 = vpow2.f32 %v6272_v21  ;;  %v6273_v50 = vmul.f32 -1.442695, %v2586_v51  ;;  %v6274_v49 = vmul.f32 -1.442695, %v2588_v37  ;;  %v11943_v34 = vld [vmem:[#allocation24_spill] sm:$0xff] }
 0x509   :  { %v2542_v56 = vpop.f32.mrf.mxu0  ;;  %v2583_v10 = vpop.f32.mrf.mxu1 }
 0x50a   :  { %8330 = vpow2.f32 %v6273_v50  ;;  %v11941_v50 = vld [vmem:[#allocation15_spill] sm:$0xff]  ;;  %v11946_v10 = vld [vmem:[#allocation18_spill] sm:$0xff] }
 0x50b   :  { %8332 = vtanh.f32 %v2587_v27 }
 0x50c   :  { %8334 = vpow2.f32 %v6274_v49  ;;  %v11938_v49 = vld [vmem:[#allocation20_spill] sm:$0xff] }
 0x515   :  { %v8329_v14 = vpop.eup %8328 }
 0x516   :  { %v2592_v23 = vadd.f32 1.0, %v8329_v14 }
 0x517   :  { %v8331_v33 = vpop.eup %8330 }
 0x518   :  { %8336 = vrcp.f32 %v2592_v23  ;;  %v2598_v39 = vadd.f32 1.0, %v8331_v33  ;;  %v8333_v9 = vpop.eup %8332  ;;  %v11947_v33 = vld [vmem:[#allocation17_spill] sm:$0xff] }
 0x519   :  { %v8335_v46 = vpop.eup %8334 }
 0x51a   :  { %8338 = vrcp.f32 %v2598_v39  ;;  %v2605_v47 = vadd.f32 1.0, %v8335_v46  ;;  %v11949_v39 = vld [vmem:[#allocation28_spill] sm:$0xff]  ;;  %v11952_v46 = vld [vmem:[#allocation22_spill] sm:$0xff] }
 0x51c   :  { %8340 = vrcp.f32 %v2605_v47  ;;  %v11956_v47 = vld [vmem:[#allocation26_spill] sm:$0xff] }
 0x525   :  { %v8337_v55 = vpop.eup %8336 }
 0x526   :  { %v2609_v51 = vmul.f32 %v8337_v55, %v8333_v9  ;;  %v11950_v9 = vld [vmem:[#allocation27_spill] sm:$0xff] }
 0x527   :  { %v8339_v56 = vpop.eup %8338 }
 0x528   :  { %v2608_v21 = vmul.f32 %v8339_v56, %v10135_v32  ;;  %v11964_v56 = vld [vmem:[#allocation49_spill] sm:$0xff] }
 0x529   :  { %v8341_v14 = vpop.eup %8340 }
 0x52a   :  { %v10244_v36 = vadd.f32 %v2609_v51, %v2608_v21  ;;  %v11954_v51 = vld [vmem:[#allocation30_spill] sm:$0xff] }
 0x52c   :  { %8342 = vtanh.f32 %v10244_v36 }
 0x539   :  { %v8343_v37 = vpop.eup %8342 }
 0x53a   :  { %v2612_v20 = vmul.f32 %v8343_v37, %v8341_v14  ;;  %v11958_v14 = vld [vmem:[#allocation32_spill] sm:$0xff] }
 0x53c   :  { %2613 = vst [vmem:[%s11349_s5 + $0x20] sm:$0xff] %v2612_v20  ;;  %v2618_v23 = vpack.c.bf16 %v2612_v20, %v2612_v20  ;;  %v11960_v20 = vld [vmem:[#allocation11_spill] sm:$0xff] }
 0x53e   :  { %2844 = vmatmul.mubr.bf16.vlgmr.msra.gmra.mxu0 %v2618_v23  ;;  %2885 = vmatmul.mubr.bf16.vlgmr.msra.gmra.mxu1 %v2618_v23 }
 0x53f   :  { %7305 = vmatpush1.bf16.msk.msra.mxu0 %vm11878_vm9, %v8749_v52  ;;  %7353 = vmatpush1.bf16.msk.msra.mxu1 %vm11879_vm13, %v8898_v38  ;;  %vm11927_vm13 = vnez %v11573_v5 }
 0x540   :  { %7308 = vmatprep.subr.msk.bf16.mxu0 %vm11832_vm10, %v8783_v0  ;;  %7356 = vmatprep.subr.msk.bf16.mxu1 %vm11880_vm7, %v8970_v8  ;;  %vm11925_vm10 = vnez %v11571_v61  ;;  %vm11926_vm7 = vnez %v11551_v22  ;;  %v12363_v22 = vld [vmem:[#allocation17_spill] sm:$0xff] }
 0x541   :  { %3151 = vmatprep.mubr.bf16.mxu0 %v11736_v45  ;;  %3192 = vmatprep.mubr.bf16.mxu1 %v11736_v45 }
 0x543   :  { %7311 = vmatpush1.bf16.msk.msra.mxu0 %vm11881_vm6, %v8806_v6  ;;  %7359 = vmatpush1.bf16.msk.msra.mxu1 %vm11835_vm4, %v8997_v19  ;;  %vm11928_vm6 = vnez %v11559_v53  ;;  %vm11929_vm4 = vnez %v11584_v58 }
 0x544   :  { %7314 = vmatprep.subr.msk.bf16.mxu0 %vm11836_vm14, %v8838_v18  ;;  %7362 = vmatprep.subr.msk.bf16.mxu1 %vm11925_vm10, %v9075_v62  ;;  %vm11930_vm14 = vnez %v11561_v59  ;;  %vm11931_vm10 = vnez %v11586_v4 }
 0x547   :  { %7317 = vmatpush1.bf16.msk.msra.mxu0 %vm11926_vm7, %v8861_v26  ;;  %7365 = vmatpush1.bf16.msk.msra.mxu1 %vm11927_vm13, %v9090_v7  ;;  %vm11932_vm13 = vnez %v11594_v48 }
 0x548   :  { %7320 = vmatprep.subr.msk.bf16.mxu0 %vm11928_vm6, %v8934_v54  ;;  %7368 = vmatprep.subr.msk.bf16.mxu1 %vm11929_vm4, %v9170_v60  ;;  %vm11933_vm6 = vnez %v11569_v43  ;;  %vm11934_vm4 = vnez %v11602_v41 }
 0x54b   :  { %7323 = vmatpush1.bf16.msk.msra.mxu0 %vm11930_vm14, %v8956_v3  ;;  %7371 = vmatpush1.bf16.msk.msra.mxu1 %vm11931_vm10, %v9194_v12  ;;  %vm11935_vm14 = vnez %v11577_v28  ;;  %vm11936_vm10 = vnez %v11606_v24 }
 0x54c   :  { %7326 = vmatprep.subr.msk.bf16.mxu0 %vm11883_vm12, %v9023_v30  ;;  %7374 = vmatprep.subr.msk.bf16.mxu1 %vm11932_vm13, %v9246_v1 }
 0x54f   :  { %7329 = vmatpush1.bf16.msk.msra.mxu0 %vm11933_vm6, %v9049_v44  ;;  %7377 = vmatpush1.bf16.msk.msra.mxu1 %vm11934_vm4, %v9292_v42  ;;  %vm11942_vm6 = vnez %v11941_v50  ;;  %vm11945_vm4 = vnez %v11944_v15 }
 0x550   :  { %7332 = vmatprep.subr.msk.bf16.mxu0 %vm11935_vm14, %v9127_v31  ;;  %7380 = vmatprep.subr.msk.bf16.mxu1 %vm11936_vm10, %v9318_v25  ;;  %vm11948_vm14 = vnez %v11947_v33  ;;  %vm11951_vm10 = vnez %v11950_v9  ;;  %v11962_v9 = vld [vmem:[#allocation13_spill] sm:$0xff] }
 0x553   :  { %7335 = vmatpush1.bf16.msk.msra.mxu0 %vm11841_vm11, %v9142_v40  ;;  %7383 = vmatpush1.bf16.msk.msra.mxu1 %vm11892_vm2, %v11938_v49 }
 0x554   :  { %7338 = vmatprep.subr.msk.bf16.mxu0 %vm11942_vm6, %v11940_v11  ;;  %7386 = vmatprep.subr.msk.bf16.mxu1 %vm11945_vm4, %v11943_v34 }
 0x557   :  { %7341 = vmatpush1.bf16.msk.msra.mxu0 %vm11948_vm14, %v11946_v10  ;;  %7389 = vmatpush1.bf16.msk.msra.mxu1 %vm11951_vm10, %v11949_v39  ;;  %v11967_v39 = vld [vmem:[#allocation50_spill] sm:$0xff] }
 0x558   :  { %7344 = vmatprep.subr.msk.bf16.mxu0 %vm11810_vm3, %v11952_v46  ;;  %7392 = vmatprep.subr.msk.bf16.mxu1 %vm11861_vm8, %v11954_v51 }
 0x55b   :  { %7347 = vmatpush1.bf16.msk.msra.mxu0 %vm11911_vm0, %v11956_v47  ;;  %7395 = vmatpush1.bf16.msk.msra.mxu1 %vm11914_vm1, %v11958_v14  ;;  %v11965_v47 = vld [vmem:[#allocation51_spill] sm:$0xff]  ;;  %vm11970_vm1 = vnez %v11563_v13  ;;  %vm11971_vm0 = vnez %v11547_v2 }
 0x55c   :  { %7398 = vmatprep.subr.msk.bf16.mxu0 %vm11917_vm5, %v11960_v20  ;;  %7446 = vmatprep.subr.msk.bf16.mxu1 %vm11920_vm15, %v11962_v9  ;;  %v11966_v20 = vld [vmem:[#allocation52_spill] sm:$0xff]  ;;  %vm11968_vm15 = vnez %v11557_v35  ;;  %vm11969_vm5 = vnez %v11545_v63 }
 0x5fe   :  { %v2845_v55 = vpop.f32.mrf.mxu0  ;;  %v2886_v46 = vpop.f32.mrf.mxu1 }
 0x5ff   :  { %v2893_v51 = vadd.f32 %v2845_v55, %v11964_v56  ;;  %v2895_v9 = vadd.f32 %v2886_v46, %v11967_v39  ;;  %v11987_v46 = vld [vmem:[#allocation16_spill] sm:$0xff] }
 0x600   :  { %v2847_v33 = vpop.f32.mrf.mxu0  ;;  %v2888_v10 = vpop.f32.mrf.mxu1 }
 0x601   :  { %v6307_v21 = vmul.f32 -1.442695, %v2893_v51  ;;  %v2894_v15 = vadd.f32 %v2847_v33, %v11965_v47  ;;  %v2896_v11 = vadd.f32 %v2888_v10, %v11966_v20 }
 0x602   :  { %v2849_v34 = vpop.f32.mrf.mxu0  ;;  %v2890_v37 = vpop.f32.mrf.mxu1 }
 0x603   :  { %8344 = vpow2.f32 %v6307_v21  ;;  %v6308_v14 = vmul.f32 -1.442695, %v2894_v15  ;;  %v6309_v27 = vmul.f32 -1.442695, %v2896_v11  ;;  %v11989_v37 = vld [vmem:[#allocation24_spill] sm:$0xff] }
 0x604   :  { %v2850_v50 = vpop.f32.mrf.mxu0  ;;  %v2891_v23 = vpop.f32.mrf.mxu1 }
 0x605   :  { %8346 = vpow2.f32 %v6308_v14  ;;  %v11991_v23 = vld [vmem:[#allocation18_spill] sm:$0xff] }
 0x606   :  { %8348 = vtanh.f32 %v2895_v9 }
 0x607   :  { %8350 = vpow2.f32 %v6309_v27  ;;  %v11985_v27 = vld [vmem:[#allocation20_spill] sm:$0xff] }
 0x610   :  { %v8345_v49 = vpop.eup %8344 }
 0x611   :  { %v2900_v32 = vadd.f32 1.0, %v8345_v49 }
 0x612   :  { %v8347_v55 = vpop.eup %8346 }
 0x613   :  { %8352 = vrcp.f32 %v2900_v32  ;;  %v2906_v51 = vadd.f32 1.0, %v8347_v55  ;;  %v8349_v34 = vpop.eup %8348 }
 0x614   :  { %v8351_v33 = vpop.eup %8350 }
 0x615   :  { %8354 = vrcp.f32 %v2906_v51  ;;  %v2913_v47 = vadd.f32 1.0, %v8351_v33  ;;  %v11993_v51 = vld [vmem:[#allocation28_spill] sm:$0xff]  ;;  %v11995_v33 = vld [vmem:[#allocation22_spill] sm:$0xff] }
 0x617   :  { %8356 = vrcp.f32 %v2913_v47  ;;  %v11999_v47 = vld [vmem:[#allocation26_spill] sm:$0xff] }
 0x620   :  { %v8353_v56 = vpop.eup %8352 }
 0x621   :  { %v2917_v15 = vmul.f32 %v8353_v56, %v8349_v34  ;;  %v12008_v34 = vld [vmem:[#allocation13_spill] sm:$0xff] }
 0x622   :  { %v8355_v50 = vpop.eup %8354 }
 0x623   :  { %v2916_v21 = vmul.f32 %v8355_v50, %v10244_v36  ;;  %v12011_v50 = vld [vmem:[#allocation53_spill] sm:$0xff] }
 0x624   :  { %v8357_v49 = vpop.eup %8356 }
 0x625   :  { %v10353_v10 = vadd.f32 %v2917_v15, %v2916_v21  ;;  %v11997_v15 = vld [vmem:[#allocation30_spill] sm:$0xff]  ;;  %v12000_v21 = vld [vmem:[#allocation25_spill] sm:$0xff] }
 0x627   :  { %8358 = vtanh.f32 %v10353_v10 }
 0x634   :  { %v8359_v11 = vpop.eup %8358 }
 0x635   :  { %v2920_v39 = vmul.f32 %v8359_v11, %v8357_v49  ;;  %v12002_v49 = vld [vmem:[#allocation32_spill] sm:$0xff]  ;;  %v12003_v11 = vld [vmem:[#allocation31_spill] sm:$0xff] }
 0x637   :  { %2921 = vst [vmem:[%s11349_s5 + $0x28] sm:$0xff] %v2920_v39  ;;  %v2926_v32 = vpack.c.bf16 %v2920_v39, %v2920_v39  ;;  %v12005_v39 = vld [vmem:[#allocation11_spill] sm:$0xff] }
 0x639   :  { %3152 = vmatmul.mubr.bf16.vlgmr.msra.gmra.mxu0 %v2926_v32  ;;  %3193 = vmatmul.mubr.bf16.vlgmr.msra.gmra.mxu1 %v2926_v32  ;;  %v12006_v32 = vld [vmem:[#allocation10_spill] sm:$0xff] }
 0x63a   :  { %7401 = vmatpush1.bf16.msk.msra.mxu0 %vm11878_vm9, %v8749_v52  ;;  %7449 = vmatpush1.bf16.msk.msra.mxu1 %vm11968_vm15, %v8898_v38  ;;  %vm11972_vm9 = vnez %v11565_v16  ;;  %vm11973_vm15 = vnez %v11549_v17 }
 0x63b   :  { %7404 = vmatprep.subr.msk.bf16.mxu0 %vm11969_vm5, %v8783_v0  ;;  %7452 = vmatprep.subr.msk.bf16.mxu1 %vm11970_vm1, %v8970_v8  ;;  %vm11974_vm5 = vnez %v11571_v61  ;;  %vm11975_vm1 = vnez %v11573_v5 }
 0x63c   :  { %3459 = vmatprep.mubr.bf16.mxu0 %v11736_v45  ;;  %3500 = vmatprep.mubr.bf16.mxu1 %v11736_v45 }
 0x63e   :  { %7407 = vmatpush1.bf16.msk.msra.mxu0 %vm11971_vm0, %v8806_v6  ;;  %7455 = vmatpush1.bf16.msk.msra.mxu1 %vm11972_vm9, %v8997_v19  ;;  %vm11976_vm0 = vnez %v11559_v53  ;;  %vm11977_vm9 = vnez %v11584_v58 }
 0x63f   :  { %7410 = vmatprep.subr.msk.bf16.mxu0 %vm11973_vm15, %v8838_v18  ;;  %7458 = vmatprep.subr.msk.bf16.mxu1 %vm11974_vm5, %v9075_v62  ;;  %vm11978_vm15 = vnez %v11561_v59  ;;  %vm11979_vm5 = vnez %v11586_v4 }
 0x642   :  { %7413 = vmatpush1.bf16.msk.msra.mxu0 %vm11926_vm7, %v8861_v26  ;;  %7461 = vmatpush1.bf16.msk.msra.mxu1 %vm11975_vm1, %v9090_v7 }
 0x643   :  { %7416 = vmatprep.subr.msk.bf16.mxu0 %vm11976_vm0, %v8934_v54  ;;  %7464 = vmatprep.subr.msk.bf16.mxu1 %vm11977_vm9, %v9170_v60  ;;  %vm11980_vm0 = vnez %v11569_v43  ;;  %vm11981_vm9 = vnez %v11602_v41 }
 0x646   :  { %7419 = vmatpush1.bf16.msk.msra.mxu0 %vm11978_vm15, %v8956_v3  ;;  %7467 = vmatpush1.bf16.msk.msra.mxu1 %vm11979_vm5, %v9194_v12  ;;  %vm11982_vm15 = vnez %v11577_v28  ;;  %vm11983_vm5 = vnez %v11606_v24 }
 0x647   :  { %7422 = vmatprep.subr.msk.bf16.mxu0 %vm11883_vm12, %v9023_v30  ;;  %7470 = vmatprep.subr.msk.bf16.mxu1 %vm11932_vm13, %v9246_v1 }
 0x64a   :  { %7425 = vmatpush1.bf16.msk.msra.mxu0 %vm11980_vm0, %v9049_v44  ;;  %7473 = vmatpush1.bf16.msk.msra.mxu1 %vm11981_vm9, %v9292_v42 }
 0x64b   :  { %7428 = vmatprep.subr.msk.bf16.mxu0 %vm11982_vm15, %v9127_v31  ;;  %7476 = vmatprep.subr.msk.bf16.mxu1 %vm11983_vm5, %v9318_v25 }
 0x64e   :  { %7431 = vmatpush1.bf16.msk.msra.mxu0 %vm11841_vm11, %v9142_v40  ;;  %7479 = vmatpush1.bf16.msk.msra.mxu1 %vm11892_vm2, %v11985_v27 }
 0x64f   :  { %7434 = vmatprep.subr.msk.bf16.mxu0 %vm11942_vm6, %v11987_v46  ;;  %7482 = vmatprep.subr.msk.bf16.mxu1 %vm11945_vm4, %v11989_v37  ;;  %vm12001_vm6 = vnez %v12000_v21  ;;  %vm12004_vm4 = vnez %v12003_v11 }
 0x652   :  { %7437 = vmatpush1.bf16.msk.msra.mxu0 %vm11948_vm14, %v11991_v23  ;;  %7485 = vmatpush1.bf16.msk.msra.mxu1 %vm11951_vm10, %v11993_v51  ;;  %vm12007_vm14 = vnez %v12006_v32  ;;  %v12009_v51 = vld [vmem:[#allocation12_spill] sm:$0xff] }
 0x653   :  { %7440 = vmatprep.subr.msk.bf16.mxu0 %vm11810_vm3, %v11995_v33  ;;  %7488 = vmatprep.subr.msk.bf16.mxu1 %vm11861_vm8, %v11997_v15  ;;  %vm12010_vm10 = vnez %v12009_v51  ;;  %v12014_v51 = vld [vmem:[#allocation54_spill] sm:$0xff]  ;;  %vm12019_vm8 = vnez %v11547_v2 }
 0x656   :  { %7443 = vmatpush1.bf16.msk.msra.mxu0 %vm12001_vm6, %v11999_v47  ;;  %7491 = vmatpush1.bf16.msk.msra.mxu1 %vm12004_vm4, %v12002_v49  ;;  %v12012_v47 = vld [vmem:[#allocation55_spill] sm:$0xff]  ;;  %vm12017_vm4 = vnez %v11545_v63  ;;  %vm12018_vm6 = vnez %v11563_v13 }
 0x657   :  { %7494 = vmatprep.subr.msk.bf16.mxu0 %vm12007_vm14, %v12005_v39  ;;  %7542 = vmatprep.subr.msk.bf16.mxu1 %vm12010_vm10, %v12008_v34  ;;  %v12013_v39 = vld [vmem:[#allocation56_spill] sm:$0xff]  ;;  %vm12015_vm10 = vnez %v11543_v57  ;;  %vm12016_vm14 = vnez %v11557_v35 }
 0x6f9   :  { %v3153_v56 = vpop.f32.mrf.mxu0  ;;  %v3194_v33 = vpop.f32.mrf.mxu1 }
 0x6fa   :  { %v3201_v15 = vadd.f32 %v3153_v56, %v12011_v50  ;;  %v3203_v34 = vadd.f32 %v3194_v33, %v12014_v51  ;;  %v12030_v33 = vld [vmem:[#allocation16_spill] sm:$0xff] }
 0x6fb   :  { %v3155_v55 = vpop.f32.mrf.mxu0  ;;  %v3196_v23 = vpop.f32.mrf.mxu1 }
 0x6fc   :  { %v6342_v21 = vmul.f32 -1.442695, %v3201_v15  ;;  %v3202_v20 = vadd.f32 %v3155_v55, %v12012_v47  ;;  %v3204_v46 = vadd.f32 %v3196_v23, %v12013_v39  ;;  %v12034_v39 = vld [vmem:[#allocation23_spill] sm:$0xff] }
 0x6fd   :  { %v3157_v37 = vpop.f32.mrf.mxu0  ;;  %v3198_v11 = vpop.f32.mrf.mxu1 }
 0x6fe   :  { %8360 = vpow2.f32 %v6342_v21  ;;  %v6343_v49 = vmul.f32 -1.442695, %v3202_v20  ;;  %v6344_v9 = vmul.f32 -1.442695, %v3204_v46  ;;  %v12033_v11 = vld [vmem:[#allocation24_spill] sm:$0xff] }
 0x6ff   :  { %v3158_v14 = vpop.f32.mrf.mxu0  ;;  %v3199_v32 = vpop.f32.mrf.mxu1 }
 0x700   :  { %8362 = vpow2.f32 %v6343_v49  ;;  %v12031_v49 = vld [vmem:[#allocation15_spill] sm:$0xff]  ;;  %v12036_v32 = vld [vmem:[#allocation18_spill] sm:$0xff] }
 0x701   :  { %8364 = vtanh.f32 %v3203_v34 }
 0x702   :  { %8366 = vpow2.f32 %v6344_v9  ;;  %v12028_v9 = vld [vmem:[#allocation20_spill] sm:$0xff] }
 0x70b   :  { %v8361_v27 = vpop.eup %8360 }
 0x70c   :  { %v3208_v36 = vadd.f32 1.0, %v8361_v27 }
 0x70d   :  { %v8363_v56 = vpop.eup %8362 }
 0x70e   :  { %8368 = vrcp.f32 %v3208_v36  ;;  %v3214_v15 = vadd.f32 1.0, %v8363_v56  ;;  %v8365_v37 = vpop.eup %8364  ;;  %v12037_v56 = vld [vmem:[#allocation17_spill] sm:$0xff] }
 0x70f   :  { %v8367_v55 = vpop.eup %8366 }
 0x710   :  { %8370 = vrcp.f32 %v3214_v15  ;;  %v3221_v47 = vadd.f32 1.0, %v8367_v55  ;;  %v12039_v15 = vld [vmem:[#allocation28_spill] sm:$0xff]  ;;  %v12042_v55 = vld [vmem:[#allocation22_spill] sm:$0xff] }
 0x712   :  { %8372 = vrcp.f32 %v3221_v47  ;;  %v12047_v47 = vld [vmem:[#allocation26_spill] sm:$0xff] }
 0x71b   :  { %v8369_v50 = vpop.eup %8368 }
 0x71c   :  { %v3225_v20 = vmul.f32 %v8369_v50, %v8365_v37  ;;  %v12040_v37 = vld [vmem:[#allocation27_spill] sm:$0xff] }
 0x71d   :  { %v8371_v14 = vpop.eup %8370 }
 0x71e   :  { %v3224_v21 = vmul.f32 %v8371_v14, %v10353_v10  ;;  %v12045_v14 = vld [vmem:[#allocation29_spill] sm:$0xff] }
 0x71f   :  { %v8373_v27 = vpop.eup %8372 }
 0x720   :  { %v10462_v23 = vadd.f32 %v3225_v20, %v3224_v21  ;;  %v12044_v20 = vld [vmem:[#allocation30_spill] sm:$0xff]  ;;  %v12048_v21 = vld [vmem:[#allocation25_spill] sm:$0xff] }
 0x722   :  { %8374 = vtanh.f32 %v10462_v23 }
 0x72f   :  { %v8375_v46 = vpop.eup %8374 }
 0x730   :  { %v3228_v51 = vmul.f32 %v8375_v46, %v8373_v27  ;;  %v12050_v27 = vld [vmem:[#allocation32_spill] sm:$0xff]  ;;  %v12051_v46 = vld [vmem:[#allocation31_spill] sm:$0xff] }
 0x732   :  { %3229 = vst [vmem:[%s11349_s5 + $0x30] sm:$0xff] %v3228_v51  ;;  %v3234_v36 = vpack.c.bf16 %v3228_v51, %v3228_v51  ;;  %v12053_v51 = vld [vmem:[#allocation11_spill] sm:$0xff] }
 0x734   :  { %3460 = vmatmul.mubr.bf16.vlgmr.msra.gmra.mxu0 %v3234_v36  ;;  %3501 = vmatmul.mubr.bf16.vlgmr.msra.gmra.mxu1 %v3234_v36  ;;  %v12054_v36 = vld [vmem:[#allocation10_spill] sm:$0xff] }
 0x735   :  { %7497 = vmatpush1.bf16.msk.msra.mxu0 %vm12015_vm10, %v8749_v52  ;;  %7545 = vmatpush1.bf16.msk.msra.mxu1 %vm12016_vm14, %v8898_v38  ;;  %vm12020_vm10 = vnez %v11565_v16  ;;  %vm12021_vm14 = vnez %v11549_v17 }
 0x736   :  { %7500 = vmatprep.subr.msk.bf16.mxu0 %vm12017_vm4, %v8783_v0  ;;  %7548 = vmatprep.subr.msk.bf16.mxu1 %vm12018_vm6, %v8970_v8  ;;  %vm12022_vm4 = vnez %v11571_v61 }
 0x737   :  { %3767 = vmatprep.mubr.bf16.mxu0 %v11736_v45  ;;  %3808 = vmatprep.mubr.bf16.mxu1 %v11736_v45 }
 0x739   :  { %7503 = vmatpush1.bf16.msk.msra.mxu0 %vm12019_vm8, %v8806_v6  ;;  %7551 = vmatpush1.bf16.msk.msra.mxu1 %vm12020_vm10, %v8997_v19  ;;  %vm12023_vm8 = vnez %v11559_v53  ;;  %vm12024_vm10 = vnez %v11584_v58 }
 0x73a   :  { %7506 = vmatprep.subr.msk.bf16.mxu0 %vm12021_vm14, %v8838_v18  ;;  %7554 = vmatprep.subr.msk.bf16.mxu1 %vm12022_vm4, %v9075_v62  ;;  %vm12025_vm14 = vnez %v11561_v59  ;;  %vm12026_vm4 = vnez %v11586_v4 }
 0x73d   :  { %7509 = vmatpush1.bf16.msk.msra.mxu0 %vm11926_vm7, %v8861_v26  ;;  %7557 = vmatpush1.bf16.msk.msra.mxu1 %vm11975_vm1, %v9090_v7 }
 0x73e   :  { %7512 = vmatprep.subr.msk.bf16.mxu0 %vm12023_vm8, %v8934_v54  ;;  %7560 = vmatprep.subr.msk.bf16.mxu1 %vm12024_vm10, %v9170_v60 }
 0x741   :  { %7515 = vmatpush1.bf16.msk.msra.mxu0 %vm12025_vm14, %v8956_v3  ;;  %7563 = vmatpush1.bf16.msk.msra.mxu1 %vm12026_vm4, %v9194_v12 }
 0x742   :  { %7518 = vmatprep.subr.msk.bf16.mxu0 %vm11883_vm12, %v9023_v30  ;;  %7566 = vmatprep.subr.msk.bf16.mxu1 %vm11932_vm13, %v9246_v1 }
 0x745   :  { %7521 = vmatpush1.bf16.msk.msra.mxu0 %vm11980_vm0, %v9049_v44  ;;  %7569 = vmatpush1.bf16.msk.msra.mxu1 %vm11981_vm9, %v9292_v42  ;;  %vm12032_vm0 = vnez %v12031_v49  ;;  %vm12035_vm9 = vnez %v12034_v39 }
 0x746   :  { %7524 = vmatprep.subr.msk.bf16.mxu0 %vm11982_vm15, %v9127_v31  ;;  %7572 = vmatprep.subr.msk.bf16.mxu1 %vm11983_vm5, %v9318_v25  ;;  %vm12038_vm15 = vnez %v12037_v56  ;;  %vm12041_vm5 = vnez %v12040_v37  ;;  %v12056_v37 = vld [vmem:[#allocation13_spill] sm:$0xff] }
 0x749   :  { %7527 = vmatpush1.bf16.msk.msra.mxu0 %vm11841_vm11, %v9142_v40  ;;  %7575 = vmatpush1.bf16.msk.msra.mxu1 %vm11892_vm2, %v12028_v9  ;;  %vm12046_vm2 = vnez %v12045_v14  ;;  %v12059_v14 = vld [vmem:[#allocation57_spill] sm:$0xff] }
 0x74a   :  { %7530 = vmatprep.subr.msk.bf16.mxu0 %vm12032_vm0, %v12030_v33  ;;  %7578 = vmatprep.subr.msk.bf16.mxu1 %vm12035_vm9, %v12033_v11  ;;  %vm12049_vm0 = vnez %v12048_v21  ;;  %vm12052_vm9 = vnez %v12051_v46 }
 0x74d   :  { %7533 = vmatpush1.bf16.msk.msra.mxu0 %vm12038_vm15, %v12036_v32  ;;  %7581 = vmatpush1.bf16.msk.msra.mxu1 %vm12041_vm5, %v12039_v15  ;;  %vm12055_vm15 = vnez %v12054_v36  ;;  %v12057_v15 = vld [vmem:[#allocation12_spill] sm:$0xff] }
 0x74e   :  { %7536 = vmatprep.subr.msk.bf16.mxu0 %vm11810_vm3, %v12042_v55  ;;  %7584 = vmatprep.subr.msk.bf16.mxu1 %vm12046_vm2, %v12044_v20  ;;  %vm12058_vm5 = vnez %v12057_v15  ;;  %v12062_v15 = vld [vmem:[#allocation58_spill] sm:$0xff] }
 0x751   :  { %7539 = vmatpush1.bf16.msk.msra.mxu0 %vm12049_vm0, %v12047_v47  ;;  %7587 = vmatpush1.bf16.msk.msra.mxu1 %vm12052_vm9, %v12050_v27  ;;  %v12060_v47 = vld [vmem:[#allocation59_spill] sm:$0xff]  ;;  %vm12065_vm9 = vnez %v11545_v63  ;;  %vm12066_vm0 = vnez %v11547_v2 }
 0x752   :  { %7590 = vmatprep.subr.msk.bf16.mxu0 %vm12055_vm15, %v12053_v51  ;;  %7638 = vmatprep.subr.msk.bf16.mxu1 %vm12058_vm5, %v12056_v37  ;;  %v12061_v51 = vld [vmem:[#allocation60_spill] sm:$0xff]  ;;  %vm12063_vm5 = vnez %v11543_v57  ;;  %vm12064_vm15 = vnez %v11557_v35 }
 0x7f4   :  { %v3461_v50 = vpop.f32.mrf.mxu0  ;;  %v3502_v55 = vpop.f32.mrf.mxu1 }
 0x7f5   :  { %v3509_v20 = vadd.f32 %v3461_v50, %v12059_v14  ;;  %v3511_v37 = vadd.f32 %v3502_v55, %v12062_v15  ;;  %v12078_v55 = vld [vmem:[#allocation16_spill] sm:$0xff] }
 0x7f6   :  { %v3463_v56 = vpop.f32.mrf.mxu0  ;;  %v3504_v32 = vpop.f32.mrf.mxu1 }
 0x7f7   :  { %v6377_v21 = vmul.f32 -1.442695, %v3509_v20  ;;  %v3510_v39 = vadd.f32 %v3463_v56, %v12060_v47  ;;  %v3512_v33 = vadd.f32 %v3504_v32, %v12061_v51  ;;  %v12082_v51 = vld [vmem:[#allocation23_spill] sm:$0xff] }
 0x7f8   :  { %v3465_v11 = vpop.f32.mrf.mxu0  ;;  %v3506_v46 = vpop.f32.mrf.mxu1 }
 0x7f9   :  { %8376 = vpow2.f32 %v6377_v21  ;;  %v6378_v27 = vmul.f32 -1.442695, %v3510_v39  ;;  %v6379_v34 = vmul.f32 -1.442695, %v3512_v33  ;;  %v12081_v46 = vld [vmem:[#allocation24_spill] sm:$0xff] }
 0x7fa   :  { %v3466_v49 = vpop.f32.mrf.mxu0  ;;  %v3507_v36 = vpop.f32.mrf.mxu1 }
 0x7fb   :  { %8378 = vpow2.f32 %v6378_v27  ;;  %v12079_v27 = vld [vmem:[#allocation15_spill] sm:$0xff]  ;;  %v12084_v36 = vld [vmem:[#allocation18_spill] sm:$0xff] }
 0x7fc   :  { %8380 = vtanh.f32 %v3511_v37  ;;  %v12076_v37 = vld [vmem:[#allocation19_spill] sm:$0xff] }
 0x7fd   :  { %8382 = vpow2.f32 %v6379_v34  ;;  %v12075_v34 = vld [vmem:[#allocation20_spill] sm:$0xff] }
 0x806   :  { %v8377_v9 = vpop.eup %8376 }
 0x807   :  { %v3516_v10 = vadd.f32 1.0, %v8377_v9 }
 0x808   :  { %v8379_v50 = vpop.eup %8378 }
 0x809   :  { %8384 = vrcp.f32 %v3516_v10  ;;  %v3522_v20 = vadd.f32 1.0, %v8379_v50  ;;  %v8381_v11 = vpop.eup %8380  ;;  %v12085_v50 = vld [vmem:[#allocation17_spill] sm:$0xff] }
 0x80a   :  { %v8383_v56 = vpop.eup %8382 }
 0x80b   :  { %8386 = vrcp.f32 %v3522_v20  ;;  %v3529_v47 = vadd.f32 1.0, %v8383_v56  ;;  %v12087_v20 = vld [vmem:[#allocation28_spill] sm:$0xff]  ;;  %v12090_v56 = vld [vmem:[#allocation22_spill] sm:$0xff] }
 0x80d   :  { %8388 = vrcp.f32 %v3529_v47  ;;  %v12094_v47 = vld [vmem:[#allocation26_spill] sm:$0xff] }
 0x816   :  { %v8385_v14 = vpop.eup %8384 }
 0x817   :  { %v3533_v39 = vmul.f32 %v8385_v14, %v8381_v11  ;;  %v12088_v11 = vld [vmem:[#allocation27_spill] sm:$0xff] }
 0x818   :  { %v8387_v49 = vpop.eup %8386 }
 0x819   :  { %v3532_v21 = vmul.f32 %v8387_v49, %v10462_v23  ;;  %v12106_v49 = vld [vmem:[#allocation61_spill] sm:$0xff] }
 0x81a   :  { %v8389_v9 = vpop.eup %8388 }
 0x81b   :  { %v10571_v32 = vadd.f32 %v3533_v39, %v3532_v21  ;;  %v12092_v39 = vld [vmem:[#allocation30_spill] sm:$0xff]  ;;  %v12095_v21 = vld [vmem:[#allocation25_spill] sm:$0xff] }
 0x81d   :  { %8390 = vtanh.f32 %v10571_v32 }
 0x82a   :  { %v8391_v33 = vpop.eup %8390 }
 0x82b   :  { %v3536_v15 = vmul.f32 %v8391_v33, %v8389_v9  ;;  %v12097_v9 = vld [vmem:[#allocation32_spill] sm:$0xff]  ;;  %v12098_v33 = vld [vmem:[#allocation31_spill] sm:$0xff] }
 0x82d   :  { %3537 = vst [vmem:[%s11349_s5 + $0x38] sm:$0xff] %v3536_v15  ;;  %v3542_v10 = vpack.c.bf16 %v3536_v15, %v3536_v15  ;;  %v12100_v15 = vld [vmem:[#allocation11_spill] sm:$0xff] }
 0x82f   :  { %3768 = vmatmul.mubr.bf16.vlgmr.msra.gmra.mxu0 %v3542_v10  ;;  %3809 = vmatmul.mubr.bf16.vlgmr.msra.gmra.mxu1 %v3542_v10  ;;  %v12101_v10 = vld [vmem:[#allocation10_spill] sm:$0xff] }
 0x830   :  { %7593 = vmatpush1.bf16.msk.msra.mxu0 %vm12063_vm5, %v8749_v52  ;;  %7641 = vmatpush1.bf16.msk.msra.mxu1 %vm12064_vm15, %v8898_v38  ;;  %vm12067_vm5 = vnez %v11565_v16  ;;  %vm12068_vm15 = vnez %v11549_v17 }
 0x831   :  { %7596 = vmatprep.subr.msk.bf16.mxu0 %vm12065_vm9, %v8783_v0  ;;  %7644 = vmatprep.subr.msk.bf16.mxu1 %vm12018_vm6, %v8970_v8  ;;  %vm12069_vm9 = vnez %v11571_v61 }
 0x832   :  { %4075 = vmatprep.mubr.bf16.mxu0 %v11736_v45  ;;  %4116 = vmatprep.mubr.bf16.mxu1 %v11736_v45 }
 0x834   :  { %7599 = vmatpush1.bf16.msk.msra.mxu0 %vm12066_vm0, %v8806_v6  ;;  %7647 = vmatpush1.bf16.msk.msra.mxu1 %vm12067_vm5, %v8997_v19 }
 0x835   :  { %7602 = vmatprep.subr.msk.bf16.mxu0 %vm12068_vm15, %v8838_v18  ;;  %7650 = vmatprep.subr.msk.bf16.mxu1 %vm12069_vm9, %v9075_v62 }
 0x838   :  { %7605 = vmatpush1.bf16.msk.msra.mxu0 %vm11926_vm7, %v8861_v26  ;;  %7653 = vmatpush1.bf16.msk.msra.mxu1 %vm11975_vm1, %v9090_v7 }
 0x839   :  { %7608 = vmatprep.subr.msk.bf16.mxu0 %vm12023_vm8, %v8934_v54  ;;  %7656 = vmatprep.subr.msk.bf16.mxu1 %vm12024_vm10, %v9170_v60  ;;  %vm12070_vm8 = vnez %v11569_v43  ;;  %vm12071_vm10 = vnez %v11602_v41 }
 0x83c   :  { %7611 = vmatpush1.bf16.msk.msra.mxu0 %vm12025_vm14, %v8956_v3  ;;  %7659 = vmatpush1.bf16.msk.msra.mxu1 %vm12026_vm4, %v9194_v12  ;;  %vm12072_vm14 = vnez %v11577_v28  ;;  %vm12073_vm4 = vnez %v11606_v24 }
 0x83d   :  { %7614 = vmatprep.subr.msk.bf16.mxu0 %vm11883_vm12, %v9023_v30  ;;  %7662 = vmatprep.subr.msk.bf16.mxu1 %vm11932_vm13, %v9246_v1  ;;  %vm12077_vm13 = vnez %v12076_v37 }
 0x840   :  { %7617 = vmatpush1.bf16.msk.msra.mxu0 %vm12070_vm8, %v9049_v44  ;;  %7665 = vmatpush1.bf16.msk.msra.mxu1 %vm12071_vm10, %v9292_v42  ;;  %vm12080_vm8 = vnez %v12079_v27  ;;  %vm12083_vm10 = vnez %v12082_v51 }
 0x841   :  { %7620 = vmatprep.subr.msk.bf16.mxu0 %vm12072_vm14, %v9127_v31  ;;  %7668 = vmatprep.subr.msk.bf16.mxu1 %vm12073_vm4, %v9318_v25  ;;  %vm12086_vm14 = vnez %v12085_v50  ;;  %vm12089_vm4 = vnez %v12088_v11  ;;  %v12103_v11 = vld [vmem:[#allocation13_spill] sm:$0xff] }
 0x844   :  { %7623 = vmatpush1.bf16.msk.msra.mxu0 %vm11841_vm11, %v9142_v40  ;;  %7671 = vmatpush1.bf16.msk.msra.mxu1 %vm12077_vm13, %v12075_v34 }
 0x845   :  { %7626 = vmatprep.subr.msk.bf16.mxu0 %vm12080_vm8, %v12078_v55  ;;  %7674 = vmatprep.subr.msk.bf16.mxu1 %vm12083_vm10, %v12081_v46  ;;  %vm12096_vm8 = vnez %v12095_v21  ;;  %vm12099_vm10 = vnez %v12098_v33 }
 0x848   :  { %7629 = vmatpush1.bf16.msk.msra.mxu0 %vm12086_vm14, %v12084_v36  ;;  %7677 = vmatpush1.bf16.msk.msra.mxu1 %vm12089_vm4, %v12087_v20  ;;  %vm12102_vm14 = vnez %v12101_v10  ;;  %v12104_v20 = vld [vmem:[#allocation12_spill] sm:$0xff] }
 0x849   :  { %7632 = vmatprep.subr.msk.bf16.mxu0 %vm11810_vm3, %v12090_v56  ;;  %7680 = vmatprep.subr.msk.bf16.mxu1 %vm12046_vm2, %v12092_v39  ;;  %vm12105_vm4 = vnez %v12104_v20  ;;  %v12109_v20 = vld [vmem:[#allocation62_spill] sm:$0xff] }
 0x84c   :  { %7635 = vmatpush1.bf16.msk.msra.mxu0 %vm12096_vm8, %v12094_v47  ;;  %7683 = vmatpush1.bf16.msk.msra.mxu1 %vm12099_vm10, %v12097_v9  ;;  %v12107_v47 = vld [vmem:[#allocation63_spill] sm:$0xff]  ;;  %vm12112_vm10 = vnez %v11545_v63 }
 0x84d   :  { %7686 = vmatprep.subr.msk.bf16.mxu0 %vm12102_vm14, %v12100_v15  ;;  %7734 = vmatprep.subr.msk.bf16.mxu1 %vm12105_vm4, %v12103_v11  ;;  %v12108_v15 = vld [vmem:[#allocation64_spill] sm:$0xff]  ;;  %vm12110_vm4 = vnez %v11543_v57  ;;  %vm12111_vm14 = vnez %v11557_v35 }
 0x8ef   :  { %v3769_v14 = vpop.f32.mrf.mxu0  ;;  %v3810_v56 = vpop.f32.mrf.mxu1 }
 0x8f0   :  { %v3817_v39 = vadd.f32 %v3769_v14, %v12106_v49  ;;  %v3819_v11 = vadd.f32 %v3810_v56, %v12109_v20  ;;  %v12125_v56 = vld [vmem:[#allocation16_spill] sm:$0xff] }
 0x8f1   :  { %v3771_v50 = vpop.f32.mrf.mxu0  ;;  %v3812_v36 = vpop.f32.mrf.mxu1 }
 0x8f2   :  { %v6412_v21 = vmul.f32 -1.442695, %v3817_v39  ;;  %v3818_v51 = vadd.f32 %v3771_v50, %v12107_v47  ;;  %v3820_v55 = vadd.f32 %v3812_v36, %v12108_v15  ;;  %v12129_v15 = vld [vmem:[#allocation23_spill] sm:$0xff] }
 0x8f3   :  { %v3773_v46 = vpop.f32.mrf.mxu0  ;;  %v3814_v33 = vpop.f32.mrf.mxu1 }
 0x8f4   :  { %8392 = vpow2.f32 %v6412_v21  ;;  %v6413_v9 = vmul.f32 -1.442695, %v3818_v51  ;;  %v6414_v37 = vmul.f32 -1.442695, %v3820_v55  ;;  %v12128_v33 = vld [vmem:[#allocation24_spill] sm:$0xff] }
 0x8f5   :  { %v3774_v27 = vpop.f32.mrf.mxu0  ;;  %v3815_v10 = vpop.f32.mrf.mxu1 }
 0x8f6   :  { %8394 = vpow2.f32 %v6413_v9  ;;  %v12126_v9 = vld [vmem:[#allocation15_spill] sm:$0xff]  ;;  %v12131_v10 = vld [vmem:[#allocation18_spill] sm:$0xff] }
 0x8f7   :  { %8396 = vtanh.f32 %v3819_v11 }
 0x8f8   :  { %8398 = vpow2.f32 %v6414_v37  ;;  %v12123_v37 = vld [vmem:[#allocation20_spill] sm:$0xff] }
 0x901   :  { %v8393_v34 = vpop.eup %8392 }
 0x902   :  { %v3824_v23 = vadd.f32 1.0, %v8393_v34 }
 0x903   :  { %v8395_v14 = vpop.eup %8394 }
 0x904   :  { %8400 = vrcp.f32 %v3824_v23  ;;  %v3830_v39 = vadd.f32 1.0, %v8395_v14  ;;  %v8397_v46 = vpop.eup %8396  ;;  %v12132_v14 = vld [vmem:[#allocation17_spill] sm:$0xff] }
 0x905   :  { %v8399_v50 = vpop.eup %8398 }
 0x906   :  { %8402 = vrcp.f32 %v3830_v39  ;;  %v3837_v47 = vadd.f32 1.0, %v8399_v50  ;;  %v12134_v39 = vld [vmem:[#allocation28_spill] sm:$0xff]  ;;  %v12137_v50 = vld [vmem:[#allocation22_spill] sm:$0xff] }
 0x908   :  { %8404 = vrcp.f32 %v3837_v47  ;;  %v12141_v47 = vld [vmem:[#allocation26_spill] sm:$0xff] }
 0x911   :  { %v8401_v49 = vpop.eup %8400 }
 0x912   :  { %v3841_v51 = vmul.f32 %v8401_v49, %v8397_v46  ;;  %v12135_v46 = vld [vmem:[#allocation27_spill] sm:$0xff] }
 0x913   :  { %v8403_v27 = vpop.eup %8402 }
 0x914   :  { %v3840_v21 = vmul.f32 %v8403_v27, %v10571_v32  ;;  %v12152_v27 = vld [vmem:[#allocation65_spill] sm:$0xff] }
 0x915   :  { %v8405_v34 = vpop.eup %8404 }
 0x916   :  { %v10680_v36 = vadd.f32 %v3841_v51, %v3840_v21  ;;  %v12139_v51 = vld [vmem:[#allocation30_spill] sm:$0xff] }
 0x918   :  { %8406 = vtanh.f32 %v10680_v36 }
 0x925   :  { %v8407_v55 = vpop.eup %8406 }
 0x926   :  { %v3844_v20 = vmul.f32 %v8407_v55, %v8405_v34  ;;  %v12143_v34 = vld [vmem:[#allocation32_spill] sm:$0xff]  ;;  %v12144_v55 = vld [vmem:[#allocation31_spill] sm:$0xff] }
 0x928   :  { %3845 = vst [vmem:[%s11349_s5 + $0x40] sm:$0xff] %v3844_v20  ;;  %v3850_v23 = vpack.c.bf16 %v3844_v20, %v3844_v20  ;;  %v12146_v20 = vld [vmem:[#allocation11_spill] sm:$0xff] }
 0x92a   :  { %4076 = vmatmul.mubr.bf16.vlgmr.msra.gmra.mxu0 %v3850_v23  ;;  %4117 = vmatmul.mubr.bf16.vlgmr.msra.gmra.mxu1 %v3850_v23  ;;  %v12147_v23 = vld [vmem:[#allocation10_spill] sm:$0xff] }
 0x92b   :  { %7689 = vmatpush1.bf16.msk.msra.mxu0 %vm12110_vm4, %v8749_v52  ;;  %7737 = vmatpush1.bf16.msk.msra.mxu1 %vm12111_vm14, %v8898_v38 }
 0x92c   :  { %7692 = vmatprep.subr.msk.bf16.mxu0 %vm12112_vm10, %v8783_v0  ;;  %7740 = vmatprep.subr.msk.bf16.mxu1 %vm12018_vm6, %v8970_v8 }
 0x92d   :  { %4383 = vmatprep.mubr.bf16.mxu0 %v11736_v45  ;;  %4424 = vmatprep.mubr.bf16.mxu1 %v11736_v45 }
 0x92f   :  { %7695 = vmatpush1.bf16.msk.msra.mxu0 %vm12066_vm0, %v8806_v6  ;;  %7743 = vmatpush1.bf16.msk.msra.mxu1 %vm12067_vm5, %v8997_v19  ;;  %vm12113_vm0 = vnez %v11559_v53  ;;  %vm12114_vm5 = vnez %v11584_v58 }
 0x930   :  { %7698 = vmatprep.subr.msk.bf16.mxu0 %vm12068_vm15, %v8838_v18  ;;  %7746 = vmatprep.subr.msk.bf16.mxu1 %vm12069_vm9, %v9075_v62  ;;  %vm12115_vm15 = vnez %v11561_v59  ;;  %vm12116_vm9 = vnez %v11586_v4 }
 0x933   :  { %7701 = vmatpush1.bf16.msk.msra.mxu0 %vm11926_vm7, %v8861_v26  ;;  %7749 = vmatpush1.bf16.msk.msra.mxu1 %vm11975_vm1, %v9090_v7  ;;  %vm12117_vm1 = vnez %v11594_v48 }
 0x934   :  { %7704 = vmatprep.subr.msk.bf16.mxu0 %vm12113_vm0, %v8934_v54  ;;  %7752 = vmatprep.subr.msk.bf16.mxu1 %vm12114_vm5, %v9170_v60  ;;  %vm12118_vm0 = vnez %v11569_v43  ;;  %vm12119_vm5 = vnez %v11602_v41 }
 0x937   :  { %7707 = vmatpush1.bf16.msk.msra.mxu0 %vm12115_vm15, %v8956_v3  ;;  %7755 = vmatpush1.bf16.msk.msra.mxu1 %vm12116_vm9, %v9194_v12  ;;  %vm12120_vm15 = vnez %v11577_v28  ;;  %vm12121_vm9 = vnez %v11606_v24 }
 0x938   :  { %7710 = vmatprep.subr.msk.bf16.mxu0 %vm11883_vm12, %v9023_v30  ;;  %7758 = vmatprep.subr.msk.bf16.mxu1 %vm12117_vm1, %v9246_v1 }
 0x93b   :  { %7713 = vmatpush1.bf16.msk.msra.mxu0 %vm12118_vm0, %v9049_v44  ;;  %7761 = vmatpush1.bf16.msk.msra.mxu1 %vm12119_vm5, %v9292_v42  ;;  %vm12127_vm0 = vnez %v12126_v9  ;;  %vm12130_vm5 = vnez %v12129_v15 }
 0x93c   :  { %7716 = vmatprep.subr.msk.bf16.mxu0 %vm12120_vm15, %v9127_v31  ;;  %7764 = vmatprep.subr.msk.bf16.mxu1 %vm12121_vm9, %v9318_v25  ;;  %vm12133_vm15 = vnez %v12132_v14  ;;  %vm12136_vm9 = vnez %v12135_v46  ;;  %v12149_v46 = vld [vmem:[#allocation13_spill] sm:$0xff] }
 0x93f   :  { %7719 = vmatpush1.bf16.msk.msra.mxu0 %vm11841_vm11, %v9142_v40  ;;  %7767 = vmatpush1.bf16.msk.msra.mxu1 %vm12077_vm13, %v12123_v37 }
 0x940   :  { %7722 = vmatprep.subr.msk.bf16.mxu0 %vm12127_vm0, %v12125_v56  ;;  %7770 = vmatprep.subr.msk.bf16.mxu1 %vm12130_vm5, %v12128_v33  ;;  %vm12145_vm5 = vnez %v12144_v55 }
 0x943   :  { %7725 = vmatpush1.bf16.msk.msra.mxu0 %vm12133_vm15, %v12131_v10  ;;  %7773 = vmatpush1.bf16.msk.msra.mxu1 %vm12136_vm9, %v12134_v39  ;;  %vm12148_vm15 = vnez %v12147_v23  ;;  %v12150_v39 = vld [vmem:[#allocation12_spill] sm:$0xff] }
 0x944   :  { %7728 = vmatprep.subr.msk.bf16.mxu0 %vm11810_vm3, %v12137_v50  ;;  %7776 = vmatprep.subr.msk.bf16.mxu1 %vm12046_vm2, %v12139_v51  ;;  %vm12151_vm9 = vnez %v12150_v39  ;;  %v12155_v39 = vld [vmem:[#allocation66_spill] sm:$0xff] }
 0x947   :  { %7731 = vmatpush1.bf16.msk.msra.mxu0 %vm12096_vm8, %v12141_v47  ;;  %7779 = vmatpush1.bf16.msk.msra.mxu1 %vm12145_vm5, %v12143_v34  ;;  %v12153_v47 = vld [vmem:[#allocation67_spill] sm:$0xff] }
 0x948   :  { %7782 = vmatprep.subr.msk.bf16.mxu0 %vm12148_vm15, %v12146_v20  ;;  %7830 = vmatprep.subr.msk.bf16.mxu1 %vm12151_vm9, %v12149_v46  ;;  %v12154_v20 = vld [vmem:[#allocation68_spill] sm:$0xff]  ;;  %vm12156_vm9 = vnez %v11547_v2 }
 0x9ea   :  { %v4077_v49 = vpop.f32.mrf.mxu0  ;;  %v4118_v50 = vpop.f32.mrf.mxu1 }
 0x9eb   :  { %v4125_v51 = vadd.f32 %v4077_v49, %v12152_v27  ;;  %v4127_v46 = vadd.f32 %v4118_v50, %v12155_v39  ;;  %v12172_v50 = vld [vmem:[#allocation16_spill] sm:$0xff] }
 0x9ec   :  { %v4079_v14 = vpop.f32.mrf.mxu0  ;;  %v4120_v10 = vpop.f32.mrf.mxu1 }
 0x9ed   :  { %v6447_v21 = vmul.f32 -1.442695, %v4125_v51  ;;  %v4126_v15 = vadd.f32 %v4079_v14, %v12153_v47  ;;  %v4128_v56 = vadd.f32 %v4120_v10, %v12154_v20  ;;  %v12175_v20 = vld [vmem:[#allocation23_spill] sm:$0xff] }
 0x9ee   :  { %v4081_v33 = vpop.f32.mrf.mxu0  ;;  %v4122_v55 = vpop.f32.mrf.mxu1 }
 0x9ef   :  { %8408 = vpow2.f32 %v6447_v21  ;;  %v6448_v34 = vmul.f32 -1.442695, %v4126_v15  ;;  %v6449_v11 = vmul.f32 -1.442695, %v4128_v56  ;;  %v12174_v55 = vld [vmem:[#allocation24_spill] sm:$0xff] }
 0x9f0   :  { %v4082_v9 = vpop.f32.mrf.mxu0  ;;  %v4123_v23 = vpop.f32.mrf.mxu1 }
 0x9f1   :  { %8410 = vpow2.f32 %v6448_v34  ;;  %v12177_v23 = vld [vmem:[#allocation18_spill] sm:$0xff] }
 0x9f2   :  { %8412 = vtanh.f32 %v4127_v46 }
 0x9f3   :  { %8414 = vpow2.f32 %v6449_v11  ;;  %v12170_v11 = vld [vmem:[#allocation20_spill] sm:$0xff] }
 0x9fc   :  { %v8409_v37 = vpop.eup %8408 }
 0x9fd   :  { %v4132_v32 = vadd.f32 1.0, %v8409_v37 }
 0x9fe   :  { %v8411_v49 = vpop.eup %8410 }
 0x9ff   :  { %8416 = vrcp.f32 %v4132_v32  ;;  %v4138_v51 = vadd.f32 1.0, %v8411_v49  ;;  %v8413_v33 = vpop.eup %8412  ;;  %v12178_v49 = vld [vmem:[#allocation17_spill] sm:$0xff] }
 0xa00   :  { %v8415_v14 = vpop.eup %8414 }
 0xa01   :  { %8418 = vrcp.f32 %v4138_v51  ;;  %v4145_v47 = vadd.f32 1.0, %v8415_v14  ;;  %v12180_v51 = vld [vmem:[#allocation28_spill] sm:$0xff]  ;;  %v12183_v14 = vld [vmem:[#allocation22_spill] sm:$0xff] }
 0xa03   :  { %8420 = vrcp.f32 %v4145_v47  ;;  %v12187_v47 = vld [vmem:[#allocation26_spill] sm:$0xff] }
 0xa0c   :  { %v8417_v27 = vpop.eup %8416 }
 0xa0d   :  { %v4149_v15 = vmul.f32 %v8417_v27, %v8413_v33  ;;  %v12181_v33 = vld [vmem:[#allocation27_spill] sm:$0xff] }
 0xa0e   :  { %v8419_v9 = vpop.eup %8418 }
 0xa0f   :  { %v4148_v21 = vmul.f32 %v8419_v9, %v10680_v36  ;;  %v12196_v9 = vld [vmem:[#allocation69_spill] sm:$0xff] }
 0xa10   :  { %v8421_v37 = vpop.eup %8420 }
 0xa11   :  { %v10789_v10 = vadd.f32 %v4149_v15, %v4148_v21  ;;  %v12185_v15 = vld [vmem:[#allocation30_spill] sm:$0xff] }
 0xa13   :  { %8422 = vtanh.f32 %v10789_v10 }
 0xa20   :  { %v8423_v56 = vpop.eup %8422 }
 0xa21   :  { %v4152_v39 = vmul.f32 %v8423_v56, %v8421_v37  ;;  %v12189_v37 = vld [vmem:[#allocation32_spill] sm:$0xff] }
 0xa23   :  { %4153 = vst [vmem:[%s11349_s5 + $0x48] sm:$0xff] %v4152_v39  ;;  %v4158_v32 = vpack.c.bf16 %v4152_v39, %v4152_v39  ;;  %v12191_v39 = vld [vmem:[#allocation11_spill] sm:$0xff] }
 0xa25   :  { %4384 = vmatmul.mubr.bf16.vlgmr.msra.gmra.mxu0 %v4158_v32  ;;  %4425 = vmatmul.mubr.bf16.vlgmr.msra.gmra.mxu1 %v4158_v32 }
 0xa26   :  { %7785 = vmatpush1.bf16.msk.msra.mxu0 %vm12110_vm4, %v8749_v52  ;;  %7833 = vmatpush1.bf16.msk.msra.mxu1 %vm12111_vm14, %v8898_v38  ;;  %vm12157_vm4 = vnez %v11565_v16  ;;  %vm12158_vm14 = vnez %v11549_v17 }
 0xa27   :  { %7788 = vmatprep.subr.msk.bf16.mxu0 %vm12112_vm10, %v8783_v0  ;;  %7836 = vmatprep.subr.msk.bf16.mxu1 %vm12018_vm6, %v8970_v8  ;;  %vm12159_vm10 = vnez %v11571_v61  ;;  %vm12160_vm6 = vnez %v11573_v5 }
 0xa28   :  { %4691 = vmatprep.mubr.bf16.mxu0 %v11736_v45  ;;  %4732 = vmatprep.mubr.bf16.mxu1 %v11736_v45 }
 0xa2a   :  { %7791 = vmatpush1.bf16.msk.msra.mxu0 %vm12156_vm9, %v8806_v6  ;;  %7839 = vmatpush1.bf16.msk.msra.mxu1 %vm12157_vm4, %v8997_v19  ;;  %vm12161_vm9 = vnez %v11559_v53  ;;  %vm12162_vm4 = vnez %v11584_v58 }
 0xa2b   :  { %7794 = vmatprep.subr.msk.bf16.mxu0 %vm12158_vm14, %v8838_v18  ;;  %7842 = vmatprep.subr.msk.bf16.mxu1 %vm12159_vm10, %v9075_v62  ;;  %vm12163_vm14 = vnez %v11561_v59  ;;  %vm12164_vm10 = vnez %v11586_v4 }
 0xa2e   :  { %7797 = vmatpush1.bf16.msk.msra.mxu0 %vm11926_vm7, %v8861_v26  ;;  %7845 = vmatpush1.bf16.msk.msra.mxu1 %vm12160_vm6, %v9090_v7 }
 0xa2f   :  { %7800 = vmatprep.subr.msk.bf16.mxu0 %vm12161_vm9, %v8934_v54  ;;  %7848 = vmatprep.subr.msk.bf16.mxu1 %vm12162_vm4, %v9170_v60  ;;  %vm12165_vm9 = vnez %v11569_v43  ;;  %vm12166_vm4 = vnez %v11602_v41 }
 0xa32   :  { %7803 = vmatpush1.bf16.msk.msra.mxu0 %vm12163_vm14, %v8956_v3  ;;  %7851 = vmatpush1.bf16.msk.msra.mxu1 %vm12164_vm10, %v9194_v12  ;;  %vm12167_vm14 = vnez %v11577_v28  ;;  %vm12168_vm10 = vnez %v11606_v24 }
 0xa33   :  { %7806 = vmatprep.subr.msk.bf16.mxu0 %vm11883_vm12, %v9023_v30  ;;  %7854 = vmatprep.subr.msk.bf16.mxu1 %vm12117_vm1, %v9246_v1 }
 0xa36   :  { %7809 = vmatpush1.bf16.msk.msra.mxu0 %vm12165_vm9, %v9049_v44  ;;  %7857 = vmatpush1.bf16.msk.msra.mxu1 %vm12166_vm4, %v9292_v42  ;;  %vm12176_vm4 = vnez %v12175_v20 }
 0xa37   :  { %7812 = vmatprep.subr.msk.bf16.mxu0 %vm12167_vm14, %v9127_v31  ;;  %7860 = vmatprep.subr.msk.bf16.mxu1 %vm12168_vm10, %v9318_v25  ;;  %vm12179_vm14 = vnez %v12178_v49  ;;  %vm12182_vm10 = vnez %v12181_v33  ;;  %v12193_v33 = vld [vmem:[#allocation13_spill] sm:$0xff] }
 0xa3a   :  { %7815 = vmatpush1.bf16.msk.msra.mxu0 %vm11841_vm11, %v9142_v40  ;;  %7863 = vmatpush1.bf16.msk.msra.mxu1 %vm12077_vm13, %v12170_v11 }
 0xa3b   :  { %7818 = vmatprep.subr.msk.bf16.mxu0 %vm12127_vm0, %v12172_v50  ;;  %7866 = vmatprep.subr.msk.bf16.mxu1 %vm12176_vm4, %v12174_v55 }
 0xa3e   :  { %7821 = vmatpush1.bf16.msk.msra.mxu0 %vm12179_vm14, %v12177_v23  ;;  %7869 = vmatpush1.bf16.msk.msra.mxu1 %vm12182_vm10, %v12180_v51  ;;  %v12194_v51 = vld [vmem:[#allocation12_spill] sm:$0xff] }
 0xa3f   :  { %7824 = vmatprep.subr.msk.bf16.mxu0 %vm11810_vm3, %v12183_v14  ;;  %7872 = vmatprep.subr.msk.bf16.mxu1 %vm12046_vm2, %v12185_v15  ;;  %vm12195_vm10 = vnez %v12194_v51  ;;  %v12199_v51 = vld [vmem:[#allocation70_spill] sm:$0xff]  ;;  %vm12204_vm2 = vnez %v11547_v2 }
 0xa42   :  { %7827 = vmatpush1.bf16.msk.msra.mxu0 %vm12096_vm8, %v12187_v47  ;;  %7875 = vmatpush1.bf16.msk.msra.mxu1 %vm12145_vm5, %v12189_v37  ;;  %v12197_v47 = vld [vmem:[#allocation71_spill] sm:$0xff]  ;;  %vm12202_vm5 = vnez %v11545_v63  ;;  %vm12203_vm8 = vnez %v11563_v13  ;;  %v12374_v13 = vld [vmem:[#allocation32_spill] sm:$0xff] }
 0xa43   :  { %7878 = vmatprep.subr.msk.bf16.mxu0 %vm12148_vm15, %v12191_v39  ;;  %7926 = vmatprep.subr.msk.bf16.mxu1 %vm12195_vm10, %v12193_v33  ;;  %v12198_v39 = vld [vmem:[#allocation72_spill] sm:$0xff]  ;;  %vm12200_vm10 = vnez %v11543_v57  ;;  %vm12201_vm15 = vnez %v11557_v35 }
 0xae5   :  { %v4385_v27 = vpop.f32.mrf.mxu0  ;;  %v4426_v14 = vpop.f32.mrf.mxu1 }
 0xae6   :  { %v4433_v15 = vadd.f32 %v4385_v27, %v12196_v9  ;;  %v4435_v33 = vadd.f32 %v4426_v14, %v12199_v51  ;;  %v12218_v14 = vld [vmem:[#allocation16_spill] sm:$0xff] }
 0xae7   :  { %v4387_v49 = vpop.f32.mrf.mxu0  ;;  %v4428_v23 = vpop.f32.mrf.mxu1 }
 0xae8   :  { %v6482_v21 = vmul.f32 -1.442695, %v4433_v15  ;;  %v4434_v20 = vadd.f32 %v4387_v49, %v12197_v47  ;;  %v4436_v50 = vadd.f32 %v4428_v23, %v12198_v39 }
 0xae9   :  { %v4389_v55 = vpop.f32.mrf.mxu0  ;;  %v4430_v56 = vpop.f32.mrf.mxu1 }
 0xaea   :  { %8424 = vpow2.f32 %v6482_v21  ;;  %v6483_v37 = vmul.f32 -1.442695, %v4434_v20  ;;  %v6484_v46 = vmul.f32 -1.442695, %v4436_v50  ;;  %v12220_v56 = vld [vmem:[#allocation24_spill] sm:$0xff] }
 0xaeb   :  { %v4390_v34 = vpop.f32.mrf.mxu0  ;;  %v4431_v32 = vpop.f32.mrf.mxu1 }
 0xaec   :  { %8426 = vpow2.f32 %v6483_v37  ;;  %v12222_v32 = vld [vmem:[#allocation18_spill] sm:$0xff] }
 0xaed   :  { %8428 = vtanh.f32 %v4435_v33 }
 0xaee   :  { %8430 = vpow2.f32 %v6484_v46  ;;  %v12216_v46 = vld [vmem:[#allocation20_spill] sm:$0xff] }
 0xaf7   :  { %v8425_v11 = vpop.eup %8424 }
 0xaf8   :  { %v4440_v36 = vadd.f32 1.0, %v8425_v11 }
 0xaf9   :  { %v8427_v27 = vpop.eup %8426 }
 0xafa   :  { %8432 = vrcp.f32 %v4440_v36  ;;  %v4446_v15 = vadd.f32 1.0, %v8427_v27  ;;  %v8429_v55 = vpop.eup %8428 }
 0xafb   :  { %v8431_v49 = vpop.eup %8430 }
 0xafc   :  { %8434 = vrcp.f32 %v4446_v15  ;;  %v4453_v47 = vadd.f32 1.0, %v8431_v49  ;;  %v12224_v15 = vld [vmem:[#allocation28_spill] sm:$0xff]  ;;  %v12227_v49 = vld [vmem:[#allocation22_spill] sm:$0xff] }
 0xafe   :  { %8436 = vrcp.f32 %v4453_v47  ;;  %v12232_v47 = vld [vmem:[#allocation26_spill] sm:$0xff] }
 0xb07   :  { %v8433_v9 = vpop.eup %8432 }
 0xb08   :  { %v4457_v20 = vmul.f32 %v8433_v9, %v8429_v55  ;;  %v12225_v55 = vld [vmem:[#allocation27_spill] sm:$0xff] }
 0xb09   :  { %v8435_v34 = vpop.eup %8434 }
 0xb0a   :  { %v4456_v21 = vmul.f32 %v8435_v34, %v10789_v10  ;;  %v12230_v34 = vld [vmem:[#allocation29_spill] sm:$0xff] }
 0xb0b   :  { %v8437_v11 = vpop.eup %8436 }
 0xb0c   :  { %v10898_v23 = vadd.f32 %v4457_v20, %v4456_v21  ;;  %v12229_v20 = vld [vmem:[#allocation30_spill] sm:$0xff]  ;;  %v12233_v21 = vld [vmem:[#allocation25_spill] sm:$0xff] }
 0xb0e   :  { %8438 = vtanh.f32 %v10898_v23 }
 0xb1b   :  { %v8439_v50 = vpop.eup %8438 }
 0xb1c   :  { %v4460_v51 = vmul.f32 %v8439_v50, %v8437_v11  ;;  %v12235_v11 = vld [vmem:[#allocation32_spill] sm:$0xff]  ;;  %v12236_v50 = vld [vmem:[#allocation31_spill] sm:$0xff] }
 0xb1e   :  { %4461 = vst [vmem:[%s11349_s5 + $0x50] sm:$0xff] %v4460_v51  ;;  %v4466_v36 = vpack.c.bf16 %v4460_v51, %v4460_v51  ;;  %v12238_v51 = vld [vmem:[#allocation11_spill] sm:$0xff] }
 0xb20   :  { %4692 = vmatmul.mubr.bf16.vlgmr.msra.gmra.mxu0 %v4466_v36  ;;  %4733 = vmatmul.mubr.bf16.vlgmr.msra.gmra.mxu1 %v4466_v36  ;;  %v12239_v36 = vld [vmem:[#allocation10_spill] sm:$0xff] }
 0xb21   :  { %7881 = vmatpush1.bf16.msk.msra.mxu0 %vm12200_vm10, %v8749_v52  ;;  %7929 = vmatpush1.bf16.msk.msra.mxu1 %vm12201_vm15, %v8898_v38  ;;  %vm12205_vm10 = vnez %v11565_v16  ;;  %vm12206_vm15 = vnez %v11549_v17 }
 0xb22   :  { %7884 = vmatprep.subr.msk.bf16.mxu0 %vm12202_vm5, %v8783_v0  ;;  %7932 = vmatprep.subr.msk.bf16.mxu1 %vm12203_vm8, %v8970_v8  ;;  %vm12207_vm5 = vnez %v11571_v61 }
 0xb23   :  { %4999 = vmatprep.mubr.bf16.mxu0 %v11736_v45  ;;  %5040 = vmatprep.mubr.bf16.mxu1 %v11736_v45 }
 0xb25   :  { %7887 = vmatpush1.bf16.msk.msra.mxu0 %vm12204_vm2, %v8806_v6  ;;  %7935 = vmatpush1.bf16.msk.msra.mxu1 %vm12205_vm10, %v8997_v19  ;;  %vm12208_vm2 = vnez %v11559_v53  ;;  %vm12209_vm10 = vnez %v11584_v58 }
 0xb26   :  { %7890 = vmatprep.subr.msk.bf16.mxu0 %vm12206_vm15, %v8838_v18  ;;  %7938 = vmatprep.subr.msk.bf16.mxu1 %vm12207_vm5, %v9075_v62  ;;  %vm12210_vm15 = vnez %v11561_v59  ;;  %vm12211_vm5 = vnez %v11586_v4 }
 0xb29   :  { %7893 = vmatpush1.bf16.msk.msra.mxu0 %vm11926_vm7, %v8861_v26  ;;  %7941 = vmatpush1.bf16.msk.msra.mxu1 %vm12160_vm6, %v9090_v7 }
 0xb2a   :  { %7896 = vmatprep.subr.msk.bf16.mxu0 %vm12208_vm2, %v8934_v54  ;;  %7944 = vmatprep.subr.msk.bf16.mxu1 %vm12209_vm10, %v9170_v60  ;;  %vm12212_vm10 = vnez %v11602_v41 }
 0xb2d   :  { %7899 = vmatpush1.bf16.msk.msra.mxu0 %vm12210_vm15, %v8956_v3  ;;  %7947 = vmatpush1.bf16.msk.msra.mxu1 %vm12211_vm5, %v9194_v12  ;;  %vm12213_vm15 = vnez %v11577_v28  ;;  %vm12214_vm5 = vnez %v11606_v24 }
 0xb2e   :  { %7902 = vmatprep.subr.msk.bf16.mxu0 %vm11883_vm12, %v9023_v30  ;;  %7950 = vmatprep.subr.msk.bf16.mxu1 %vm12117_vm1, %v9246_v1 }
 0xb31   :  { %7905 = vmatpush1.bf16.msk.msra.mxu0 %vm12165_vm9, %v9049_v44  ;;  %7953 = vmatpush1.bf16.msk.msra.mxu1 %vm12212_vm10, %v9292_v42 }
 0xb32   :  { %7908 = vmatprep.subr.msk.bf16.mxu0 %vm12213_vm15, %v9127_v31  ;;  %7956 = vmatprep.subr.msk.bf16.mxu1 %vm12214_vm5, %v9318_v25  ;;  %vm12226_vm5 = vnez %v12225_v55  ;;  %v12241_v55 = vld [vmem:[#allocation13_spill] sm:$0xff] }
 0xb35   :  { %7911 = vmatpush1.bf16.msk.msra.mxu0 %vm11841_vm11, %v9142_v40  ;;  %7959 = vmatpush1.bf16.msk.msra.mxu1 %vm12077_vm13, %v12216_v46  ;;  %vm12231_vm13 = vnez %v12230_v34  ;;  %v12244_v34 = vld [vmem:[#allocation73_spill] sm:$0xff] }
 0xb36   :  { %7914 = vmatprep.subr.msk.bf16.mxu0 %vm12127_vm0, %v12218_v14  ;;  %7962 = vmatprep.subr.msk.bf16.mxu1 %vm12176_vm4, %v12220_v56  ;;  %vm12234_vm0 = vnez %v12233_v21  ;;  %vm12237_vm4 = vnez %v12236_v50 }
 0xb39   :  { %7917 = vmatpush1.bf16.msk.msra.mxu0 %vm12179_vm14, %v12222_v32  ;;  %7965 = vmatpush1.bf16.msk.msra.mxu1 %vm12226_vm5, %v12224_v15  ;;  %vm12240_vm14 = vnez %v12239_v36  ;;  %v12242_v15 = vld [vmem:[#allocation12_spill] sm:$0xff] }
 0xb3a   :  { %7920 = vmatprep.subr.msk.bf16.mxu0 %vm11810_vm3, %v12227_v49  ;;  %7968 = vmatprep.subr.msk.bf16.mxu1 %vm12231_vm13, %v12229_v20  ;;  %vm12243_vm5 = vnez %v12242_v15  ;;  %v12247_v15 = vld [vmem:[#allocation74_spill] sm:$0xff] }
 0xb3d   :  { %7923 = vmatpush1.bf16.msk.msra.mxu0 %vm12234_vm0, %v12232_v47  ;;  %7971 = vmatpush1.bf16.msk.msra.mxu1 %vm12237_vm4, %v12235_v11  ;;  %v12245_v47 = vld [vmem:[#allocation75_spill] sm:$0xff]  ;;  %vm12250_vm4 = vnez %v11545_v63  ;;  %vm12251_vm0 = vnez %v11547_v2  ;;  %v12383_v2 = vld [vmem:[#allocation92_spill] sm:$0xff] }
 0xb3e   :  { %7974 = vmatprep.subr.msk.bf16.mxu0 %vm12240_vm14, %v12238_v51  ;;  %8022 = vmatprep.subr.msk.bf16.mxu1 %vm12243_vm5, %v12241_v55  ;;  %v12246_v51 = vld [vmem:[#allocation76_spill] sm:$0xff]  ;;  %vm12248_vm5 = vnez %v11543_v57  ;;  %vm12249_vm14 = vnez %v11557_v35 }
 0xbe0   :  { %v4693_v9 = vpop.f32.mrf.mxu0  ;;  %v4734_v49 = vpop.f32.mrf.mxu1 }
 0xbe1   :  { %v4741_v20 = vadd.f32 %v4693_v9, %v12244_v34  ;;  %v4743_v55 = vadd.f32 %v4734_v49, %v12247_v15  ;;  %v12263_v49 = vld [vmem:[#allocation16_spill] sm:$0xff] }
 0xbe2   :  { %v4695_v27 = vpop.f32.mrf.mxu0  ;;  %v4736_v32 = vpop.f32.mrf.mxu1 }
 0xbe3   :  { %v6517_v21 = vmul.f32 -1.442695, %v4741_v20  ;;  %v4742_v39 = vadd.f32 %v4695_v27, %v12245_v47  ;;  %v4744_v14 = vadd.f32 %v4736_v32, %v12246_v51  ;;  %v12267_v51 = vld [vmem:[#allocation23_spill] sm:$0xff] }
 0xbe4   :  { %v4697_v56 = vpop.f32.mrf.mxu0  ;;  %v4738_v50 = vpop.f32.mrf.mxu1 }
 0xbe5   :  { %8440 = vpow2.f32 %v6517_v21  ;;  %v6518_v11 = vmul.f32 -1.442695, %v4742_v39  ;;  %v6519_v33 = vmul.f32 -1.442695, %v4744_v14  ;;  %v12266_v50 = vld [vmem:[#allocation24_spill] sm:$0xff] }
 0xbe6   :  { %v4698_v37 = vpop.f32.mrf.mxu0  ;;  %v4739_v36 = vpop.f32.mrf.mxu1 }
 0xbe7   :  { %8442 = vpow2.f32 %v6518_v11  ;;  %v12264_v11 = vld [vmem:[#allocation15_spill] sm:$0xff]  ;;  %v12269_v36 = vld [vmem:[#allocation18_spill] sm:$0xff] }
 0xbe8   :  { %8444 = vtanh.f32 %v4743_v55  ;;  %v12261_v55 = vld [vmem:[#allocation19_spill] sm:$0xff] }
 0xbe9   :  { %8446 = vpow2.f32 %v6519_v33  ;;  %v12260_v33 = vld [vmem:[#allocation20_spill] sm:$0xff] }
 0xbf2   :  { %v8441_v46 = vpop.eup %8440 }
 0xbf3   :  { %v4748_v10 = vadd.f32 1.0, %v8441_v46 }
 0xbf4   :  { %v8443_v9 = vpop.eup %8442 }
 0xbf5   :  { %8448 = vrcp.f32 %v4748_v10  ;;  %v4754_v20 = vadd.f32 1.0, %v8443_v9  ;;  %v8445_v56 = vpop.eup %8444  ;;  %v12270_v9 = vld [vmem:[#allocation17_spill] sm:$0xff] }
 0xbf6   :  { %v8447_v27 = vpop.eup %8446 }
 0xbf7   :  { %8450 = vrcp.f32 %v4754_v20  ;;  %v4761_v47 = vadd.f32 1.0, %v8447_v27  ;;  %v12272_v20 = vld [vmem:[#allocation28_spill] sm:$0xff]  ;;  %v12275_v27 = vld [vmem:[#allocation22_spill] sm:$0xff] }
 0xbf9   :  { %8452 = vrcp.f32 %v4761_v47  ;;  %v12279_v47 = vld [vmem:[#allocation26_spill] sm:$0xff] }
 0xc02   :  { %v8449_v34 = vpop.eup %8448 }
 0xc03   :  { %v4765_v39 = vmul.f32 %v8449_v34, %v8445_v56  ;;  %v12273_v56 = vld [vmem:[#allocation27_spill] sm:$0xff] }
 0xc04   :  { %v8451_v37 = vpop.eup %8450 }
 0xc05   :  { %v4764_v21 = vmul.f32 %v8451_v37, %v10898_v23  ;;  %v12291_v37 = vld [vmem:[#allocation77_spill] sm:$0xff] }
 0xc06   :  { %v8453_v46 = vpop.eup %8452 }
 0xc07   :  { %v11007_v32 = vadd.f32 %v4765_v39, %v4764_v21  ;;  %v12277_v39 = vld [vmem:[#allocation30_spill] sm:$0xff]  ;;  %v12280_v21 = vld [vmem:[#allocation25_spill] sm:$0xff] }
 0xc09   :  { %8454 = vtanh.f32 %v11007_v32 }
 0xc16   :  { %v8455_v14 = vpop.eup %8454 }
 0xc17   :  { %v4768_v15 = vmul.f32 %v8455_v14, %v8453_v46  ;;  %v12282_v46 = vld [vmem:[#allocation32_spill] sm:$0xff]  ;;  %v12283_v14 = vld [vmem:[#allocation31_spill] sm:$0xff] }
 0xc19   :  { %4769 = vst [vmem:[%s11349_s5 + $0x58] sm:$0xff] %v4768_v15  ;;  %v4774_v10 = vpack.c.bf16 %v4768_v15, %v4768_v15  ;;  %v12285_v15 = vld [vmem:[#allocation11_spill] sm:$0xff] }
 0xc1b   :  { %5000 = vmatmul.mubr.bf16.vlgmr.msra.gmra.mxu0 %v4774_v10  ;;  %5041 = vmatmul.mubr.bf16.vlgmr.msra.gmra.mxu1 %v4774_v10  ;;  %v12286_v10 = vld [vmem:[#allocation10_spill] sm:$0xff] }
 0xc1c   :  { %7977 = vmatpush1.bf16.msk.msra.mxu0 %vm12248_vm5, %v8749_v52  ;;  %8025 = vmatpush1.bf16.msk.msra.mxu1 %vm12249_vm14, %v8898_v38  ;;  %vm12252_vm5 = vnez %v11565_v16  ;;  %vm12253_vm14 = vnez %v11549_v17 }
 0xc1d   :  { %7980 = vmatprep.subr.msk.bf16.mxu0 %vm12250_vm4, %v8783_v0  ;;  %8028 = vmatprep.subr.msk.bf16.mxu1 %vm12203_vm8, %v8970_v8  ;;  %vm12254_vm4 = vnez %v11571_v61 }
 0xc1e   :  { %5307 = vmatprep.mubr.bf16.mxu0 %v11736_v45  ;;  %5348 = vmatprep.mubr.bf16.mxu1 %v11736_v45 }
 0xc20   :  { %7983 = vmatpush1.bf16.msk.msra.mxu0 %vm12251_vm0, %v8806_v6  ;;  %8031 = vmatpush1.bf16.msk.msra.mxu1 %vm12252_vm5, %v8997_v19  ;;  %vm12255_vm5 = vnez %v11584_v58 }
 0xc21   :  { %7986 = vmatprep.subr.msk.bf16.mxu0 %vm12253_vm14, %v8838_v18  ;;  %8034 = vmatprep.subr.msk.bf16.mxu1 %vm12254_vm4, %v9075_v62  ;;  %vm12256_vm14 = vnez %v11561_v59  ;;  %vm12257_vm4 = vnez %v11586_v4 }
 0xc24   :  { %7989 = vmatpush1.bf16.msk.msra.mxu0 %vm11926_vm7, %v8861_v26  ;;  %8037 = vmatpush1.bf16.msk.msra.mxu1 %vm12160_vm6, %v9090_v7 }
 0xc25   :  { %7992 = vmatprep.subr.msk.bf16.mxu0 %vm12208_vm2, %v8934_v54  ;;  %8040 = vmatprep.subr.msk.bf16.mxu1 %vm12255_vm5, %v9170_v60 }
 0xc28   :  { %7995 = vmatpush1.bf16.msk.msra.mxu0 %vm12256_vm14, %v8956_v3  ;;  %8043 = vmatpush1.bf16.msk.msra.mxu1 %vm12257_vm4, %v9194_v12  ;;  %vm12258_vm4 = vnez %v11606_v24 }
 0xc29   :  { %7998 = vmatprep.subr.msk.bf16.mxu0 %vm11883_vm12, %v9023_v30  ;;  %8046 = vmatprep.subr.msk.bf16.mxu1 %vm12117_vm1, %v9246_v1  ;;  %vm12262_vm1 = vnez %v12261_v55 }
 0xc2c   :  { %8001 = vmatpush1.bf16.msk.msra.mxu0 %vm12165_vm9, %v9049_v44  ;;  %8049 = vmatpush1.bf16.msk.msra.mxu1 %vm12212_vm10, %v9292_v42  ;;  %vm12265_vm9 = vnez %v12264_v11  ;;  %vm12268_vm10 = vnez %v12267_v51 }
 0xc2d   :  { %8004 = vmatprep.subr.msk.bf16.mxu0 %vm12213_vm15, %v9127_v31  ;;  %8052 = vmatprep.subr.msk.bf16.mxu1 %vm12258_vm4, %v9318_v25  ;;  %vm12271_vm15 = vnez %v12270_v9  ;;  %vm12274_vm4 = vnez %v12273_v56  ;;  %v12288_v56 = vld [vmem:[#allocation13_spill] sm:$0xff] }
 0xc30   :  { %8007 = vmatpush1.bf16.msk.msra.mxu0 %vm11841_vm11, %v9142_v40  ;;  %8055 = vmatpush1.bf16.msk.msra.mxu1 %vm12262_vm1, %v12260_v33 }
 0xc31   :  { %8010 = vmatprep.subr.msk.bf16.mxu0 %vm12265_vm9, %v12263_v49  ;;  %8058 = vmatprep.subr.msk.bf16.mxu1 %vm12268_vm10, %v12266_v50  ;;  %vm12281_vm9 = vnez %v12280_v21  ;;  %vm12284_vm10 = vnez %v12283_v14 }
 0xc34   :  { %8013 = vmatpush1.bf16.msk.msra.mxu0 %vm12271_vm15, %v12269_v36  ;;  %8061 = vmatpush1.bf16.msk.msra.mxu1 %vm12274_vm4, %v12272_v20  ;;  %vm12287_vm15 = vnez %v12286_v10  ;;  %v12289_v20 = vld [vmem:[#allocation12_spill] sm:$0xff] }
 0xc35   :  { %8016 = vmatprep.subr.msk.bf16.mxu0 %vm11810_vm3, %v12275_v27  ;;  %8064 = vmatprep.subr.msk.bf16.mxu1 %vm12231_vm13, %v12277_v39  ;;  %vm12290_vm4 = vnez %v12289_v20  ;;  %v12294_v20 = vld [vmem:[#allocation78_spill] sm:$0xff] }
 0xc38   :  { %8019 = vmatpush1.bf16.msk.msra.mxu0 %vm12281_vm9, %v12279_v47  ;;  %8067 = vmatpush1.bf16.msk.msra.mxu1 %vm12284_vm10, %v12282_v46  ;;  %v12292_v47 = vld [vmem:[#allocation79_spill] sm:$0xff]  ;;  %vm12297_vm10 = vnez %v11545_v63 }
 0xc39   :  { %8070 = vmatprep.subr.msk.bf16.mxu0 %vm12287_vm15, %v12285_v15  ;;  %8118 = vmatprep.subr.msk.bf16.mxu1 %vm12290_vm4, %v12288_v56  ;;  %v12293_v15 = vld [vmem:[#allocation80_spill] sm:$0xff]  ;;  %vm12295_vm4 = vnez %v11543_v57  ;;  %vm12296_vm15 = vnez %v11557_v35 }
 0xcdb   :  { %v5001_v34 = vpop.f32.mrf.mxu0  ;;  %v5042_v27 = vpop.f32.mrf.mxu1 }
 0xcdc   :  { %v5049_v39 = vadd.f32 %v5001_v34, %v12291_v37  ;;  %v5051_v56 = vadd.f32 %v5042_v27, %v12294_v20  ;;  %v12310_v27 = vld [vmem:[#allocation16_spill] sm:$0xff] }
 0xcdd   :  { %v5003_v9 = vpop.f32.mrf.mxu0  ;;  %v5044_v36 = vpop.f32.mrf.mxu1 }
 0xcde   :  { %v6552_v21 = vmul.f32 -1.442695, %v5049_v39  ;;  %v5050_v51 = vadd.f32 %v5003_v9, %v12292_v47  ;;  %v5052_v49 = vadd.f32 %v5044_v36, %v12293_v15  ;;  %v12314_v15 = vld [vmem:[#allocation23_spill] sm:$0xff] }
 0xcdf   :  { %v5005_v50 = vpop.f32.mrf.mxu0  ;;  %v5046_v14 = vpop.f32.mrf.mxu1 }
 0xce0   :  { %8456 = vpow2.f32 %v6552_v21  ;;  %v6553_v46 = vmul.f32 -1.442695, %v5050_v51  ;;  %v6554_v55 = vmul.f32 -1.442695, %v5052_v49  ;;  %v12313_v14 = vld [vmem:[#allocation24_spill] sm:$0xff] }
 0xce1   :  { %v5006_v11 = vpop.f32.mrf.mxu0  ;;  %v5047_v10 = vpop.f32.mrf.mxu1 }
 0xce2   :  { %8458 = vpow2.f32 %v6553_v46  ;;  %v12311_v46 = vld [vmem:[#allocation15_spill] sm:$0xff]  ;;  %v12316_v10 = vld [vmem:[#allocation18_spill] sm:$0xff] }
 0xce3   :  { %8460 = vtanh.f32 %v5051_v56 }
 0xce4   :  { %8462 = vpow2.f32 %v6554_v55  ;;  %v12308_v55 = vld [vmem:[#allocation20_spill] sm:$0xff] }
 0xced   :  { %v8457_v33 = vpop.eup %8456 }
 0xcee   :  { %v5056_v23 = vadd.f32 1.0, %v8457_v33 }
 0xcef   :  { %v8459_v34 = vpop.eup %8458 }
 0xcf0   :  { %8464 = vrcp.f32 %v5056_v23  ;;  %v5062_v39 = vadd.f32 1.0, %v8459_v34  ;;  %v8461_v50 = vpop.eup %8460  ;;  %v12317_v34 = vld [vmem:[#allocation17_spill] sm:$0xff] }
 0xcf1   :  { %v8463_v9 = vpop.eup %8462 }
 0xcf2   :  { %8466 = vrcp.f32 %v5062_v39  ;;  %v5069_v47 = vadd.f32 1.0, %v8463_v9  ;;  %v12319_v39 = vld [vmem:[#allocation28_spill] sm:$0xff]  ;;  %v12322_v9 = vld [vmem:[#allocation22_spill] sm:$0xff] }
 0xcf4   :  { %8468 = vrcp.f32 %v5069_v47  ;;  %v12326_v47 = vld [vmem:[#allocation26_spill] sm:$0xff] }
 0xcfd   :  { %v8465_v37 = vpop.eup %8464 }
 0xcfe   :  { %v5073_v51 = vmul.f32 %v8465_v37, %v8461_v50  ;;  %v12320_v50 = vld [vmem:[#allocation27_spill] sm:$0xff] }
 0xcff   :  { %v8467_v11 = vpop.eup %8466 }
 0xd00   :  { %v5072_v21 = vmul.f32 %v8467_v11, %v11007_v32  ;;  %v12337_v11 = vld [vmem:[#allocation81_spill] sm:$0xff] }
 0xd01   :  { %v8469_v33 = vpop.eup %8468 }
 0xd02   :  { %v11116_v36 = vadd.f32 %v5073_v51, %v5072_v21  ;;  %v12324_v51 = vld [vmem:[#allocation30_spill] sm:$0xff] }
 0xd04   :  { %8470 = vtanh.f32 %v11116_v36 }
 0xd11   :  { %v8471_v49 = vpop.eup %8470 }
 0xd12   :  { %v5076_v20 = vmul.f32 %v8471_v49, %v8469_v33  ;;  %v12328_v33 = vld [vmem:[#allocation32_spill] sm:$0xff]  ;;  %v12329_v49 = vld [vmem:[#allocation31_spill] sm:$0xff] }
 0xd14   :  { %5077 = vst [vmem:[%s11349_s5 + $0x60] sm:$0xff] %v5076_v20  ;;  %v5082_v23 = vpack.c.bf16 %v5076_v20, %v5076_v20  ;;  %v12331_v20 = vld [vmem:[#allocation11_spill] sm:$0xff] }
 0xd16   :  { %5308 = vmatmul.mubr.bf16.vlgmr.msra.gmra.mxu0 %v5082_v23  ;;  %5349 = vmatmul.mubr.bf16.vlgmr.msra.gmra.mxu1 %v5082_v23  ;;  %v12332_v23 = vld [vmem:[#allocation10_spill] sm:$0xff] }
 0xd17   :  { %8073 = vmatpush1.bf16.msk.msra.mxu0 %vm12295_vm4, %v8749_v52  ;;  %8121 = vmatpush1.bf16.msk.msra.mxu1 %vm12296_vm15, %v8898_v38  ;;  %vm12298_vm4 = vnez %v11565_v16  ;;  %vm12299_vm15 = vnez %v11549_v17  ;;  %v12360_v17 = vld [vmem:[#allocation23_spill] sm:$0xff] }
 0xd18   :  { %8076 = vmatprep.subr.msk.bf16.mxu0 %vm12297_vm10, %v8783_v0  ;;  %8124 = vmatprep.subr.msk.bf16.mxu1 %vm12203_vm8, %v8970_v8  ;;  %vm12300_vm10 = vnez %v11571_v61  ;;  %v12375_v16 = vld [vmem:[#allocation31_spill] sm:$0xff] }
 0xd19   :  { %5615 = vmatprep.mubr.bf16.mxu0 %v11736_v45  ;;  %5656 = vmatprep.mubr.bf16.mxu1 %v11736_v45 }
 0xd1b   :  { %8079 = vmatpush1.bf16.msk.msra.mxu0 %vm12251_vm0, %v8806_v6  ;;  %8127 = vmatpush1.bf16.msk.msra.mxu1 %vm12298_vm4, %v8997_v19 }
 0xd1c   :  { %8082 = vmatprep.subr.msk.bf16.mxu0 %vm12299_vm15, %v8838_v18  ;;  %8130 = vmatprep.subr.msk.bf16.mxu1 %vm12300_vm10, %v9075_v62  ;;  %vm12301_vm10 = vnez %v11586_v4 }
 0xd1f   :  { %8085 = vmatpush1.bf16.msk.msra.mxu0 %vm11926_vm7, %v8861_v26  ;;  %8133 = vmatpush1.bf16.msk.msra.mxu1 %vm12160_vm6, %v9090_v7  ;;  %vm12302_vm6 = vnez %v11594_v48  ;;  %v12380_v48 = vld [vmem:[#allocation86_spill] sm:$0xff] }
 0xd20   :  { %8088 = vmatprep.subr.msk.bf16.mxu0 %vm12208_vm2, %v8934_v54  ;;  %8136 = vmatprep.subr.msk.bf16.mxu1 %vm12255_vm5, %v9170_v60  ;;  %vm12303_vm2 = vnez %v11569_v43  ;;  %vm12304_vm5 = vnez %v11602_v41 }
 0xd23   :  { %8091 = vmatpush1.bf16.msk.msra.mxu0 %vm12256_vm14, %v8956_v3  ;;  %8139 = vmatpush1.bf16.msk.msra.mxu1 %vm12301_vm10, %v9194_v12  ;;  %vm12305_vm14 = vnez %v11577_v28  ;;  %vm12306_vm10 = vnez %v11606_v24 }
 0xd24   :  { %8094 = vmatprep.subr.msk.bf16.mxu0 %vm11883_vm12, %v9023_v30  ;;  %8142 = vmatprep.subr.msk.bf16.mxu1 %vm12302_vm6, %v9246_v1 }
 0xd27   :  { %8097 = vmatpush1.bf16.msk.msra.mxu0 %vm12303_vm2, %v9049_v44  ;;  %8145 = vmatpush1.bf16.msk.msra.mxu1 %vm12304_vm5, %v9292_v42  ;;  %vm12312_vm2 = vnez %v12311_v46  ;;  %vm12315_vm5 = vnez %v12314_v15 }
 0xd28   :  { %8100 = vmatprep.subr.msk.bf16.mxu0 %vm12305_vm14, %v9127_v31  ;;  %8148 = vmatprep.subr.msk.bf16.mxu1 %vm12306_vm10, %v9318_v25  ;;  %vm12318_vm14 = vnez %v12317_v34  ;;  %vm12321_vm10 = vnez %v12320_v50  ;;  %v12334_v50 = vld [vmem:[#allocation13_spill] sm:$0xff] }
 0xd2b   :  { %8103 = vmatpush1.bf16.msk.msra.mxu0 %vm11841_vm11, %v9142_v40  ;;  %8151 = vmatpush1.bf16.msk.msra.mxu1 %vm12262_vm1, %v12308_v55 }
 0xd2c   :  { %8106 = vmatprep.subr.msk.bf16.mxu0 %vm12312_vm2, %v12310_v27  ;;  %8154 = vmatprep.subr.msk.bf16.mxu1 %vm12315_vm5, %v12313_v14  ;;  %vm12330_vm5 = vnez %v12329_v49 }
 0xd2f   :  { %8109 = vmatpush1.bf16.msk.msra.mxu0 %vm12318_vm14, %v12316_v10  ;;  %8157 = vmatpush1.bf16.msk.msra.mxu1 %vm12321_vm10, %v12319_v39  ;;  %vm12333_vm14 = vnez %v12332_v23  ;;  %v12335_v39 = vld [vmem:[#allocation12_spill] sm:$0xff] }
 0xd30   :  { %8112 = vmatprep.subr.msk.bf16.mxu0 %vm11810_vm3, %v12322_v9  ;;  %8160 = vmatprep.subr.msk.bf16.mxu1 %vm12231_vm13, %v12324_v51  ;;  %vm12336_vm10 = vnez %v12335_v39  ;;  %v12340_v39 = vld [vmem:[#allocation82_spill] sm:$0xff] }
 0xd33   :  { %8115 = vmatpush1.bf16.msk.msra.mxu0 %vm12281_vm9, %v12326_v47  ;;  %8163 = vmatpush1.bf16.msk.msra.mxu1 %vm12330_vm5, %v12328_v33  ;;  %v12338_v47 = vld [vmem:[#allocation83_spill] sm:$0xff]  ;;  %vm12343_vm5 = vnez %v11545_v63 }
 0xd34   :  { %8166 = vmatprep.subr.msk.bf16.mxu0 %vm12333_vm14, %v12331_v20  ;;  %8214 = vmatprep.subr.msk.bf16.mxu1 %vm12336_vm10, %v12334_v50  ;;  %v12339_v20 = vld [vmem:[#allocation84_spill] sm:$0xff]  ;;  %vm12341_vm10 = vnez %v11543_v57  ;;  %vm12342_vm14 = vnez %v11557_v35  ;;  %v12366_v35 = vld [vmem:[#allocation27_spill] sm:$0xff] }
 0xd35   :  { %v12355_v57 = vld [vmem:[#allocation20_spill] sm:$0xff] }
 0xdd6   :  { %v5309_v37 = vpop.f32.mrf.mxu0  ;;  %v5350_v9 = vpop.f32.mrf.mxu1 }
 0xdd7   :  { %v5357_v51 = vadd.f32 %v5309_v37, %v12337_v11  ;;  %v5359_v50 = vadd.f32 %v5350_v9, %v12340_v39 }
 0xdd8   :  { %v5311_v34 = vpop.f32.mrf.mxu0  ;;  %v5352_v10 = vpop.f32.mrf.mxu1 }
 0xdd9   :  { %v6587_v21 = vmul.f32 -1.442695, %v5357_v51  ;;  %v5358_v15 = vadd.f32 %v5311_v34, %v12338_v47  ;;  %v5360_v27 = vadd.f32 %v5352_v10, %v12339_v20 }
 0xdda   :  { %v5313_v14 = vpop.f32.mrf.mxu0  ;;  %v5354_v49 = vpop.f32.mrf.mxu1 }
 0xddb   :  { %8472 = vpow2.f32 %v6587_v21  ;;  %v6588_v33 = vmul.f32 -1.442695, %v5358_v15  ;;  %v6589_v56 = vmul.f32 -1.442695, %v5360_v27 }
 0xddc   :  { %v5314_v46 = vpop.f32.mrf.mxu0  ;;  %v5355_v23 = vpop.f32.mrf.mxu1 }
 0xddd   :  { %8474 = vpow2.f32 %v6588_v33 }
 0xdde   :  { %8476 = vtanh.f32 %v5359_v50 }
 0xddf   :  { %8478 = vpow2.f32 %v6589_v56 }
 0xde8   :  { %v8473_v55 = vpop.eup %8472 }
 0xde9   :  { %v5364_v32 = vadd.f32 1.0, %v8473_v55 }
 0xdea   :  { %v8475_v37 = vpop.eup %8474 }
 0xdeb   :  { %8480 = vrcp.f32 %v5364_v32  ;;  %v5370_v51 = vadd.f32 1.0, %v8475_v37  ;;  %v8477_v14 = vpop.eup %8476 }
 0xdec   :  { %v8479_v34 = vpop.eup %8478 }
 0xded   :  { %8482 = vrcp.f32 %v5370_v51  ;;  %v5377_v47 = vadd.f32 1.0, %v8479_v34 }
 0xdef   :  { %8484 = vrcp.f32 %v5377_v47 }
 0xdf8   :  { %v8481_v11 = vpop.eup %8480 }
 0xdf9   :  { %v5381_v15 = vmul.f32 %v8481_v11, %v8477_v14 }
 0xdfa   :  { %v8483_v46 = vpop.eup %8482 }
 0xdfb   :  { %v5380_v21 = vmul.f32 %v8483_v46, %v11116_v36  ;;  %v12381_v46 = vld [vmem:[#allocation89_spill] sm:$0xff] }
 0xdfc   :  { %v8485_v55 = vpop.eup %8484 }
 0xdfd   :  { %v11225_v10 = vadd.f32 %v5381_v15, %v5380_v21 }
 0xdff   :  { %8486 = vtanh.f32 %v11225_v10 }
 0xe0c   :  { %v8487_v27 = vpop.eup %8486 }
 0xe0d   :  { %v5384_v9 = vmul.f32 %v8487_v27, %v8485_v55  ;;  %v12382_v27 = vld [vmem:[#allocation91_spill] sm:$0xff] }
 0xe0f   :  { %5385 = vst [vmem:[%s11349_s5 + $0x68] sm:$0xff] %v5384_v9  ;;  %v5390_v32 = vpack.c.bf16 %v5384_v9, %v5384_v9 }
 0xe11   :  { %5616 = vmatmul.mubr.bf16.vlgmr.msra.gmra.mxu0 %v5390_v32  ;;  %5657 = vmatmul.mubr.bf16.vlgmr.msra.gmra.mxu1 %v5390_v32 }
 0xe12   :  { %8169 = vmatpush1.bf16.msk.msra.mxu0 %vm12341_vm10, %v8749_v52  ;;  %8217 = vmatpush1.bf16.msk.msra.mxu1 %vm12342_vm14, %v8898_v38  ;;  %vm12349_vm10 = vnez %v11586_v4  ;;  %vm12351_vm14 = vnez %v11602_v41  ;;  %v12368_v38 = vld [vmem:[#allocation22_spill] sm:$0xff]  ;;  %v12379_v4 = vld [vmem:[#allocation88_spill] sm:$0xff] }
 0xe13   :  { %8172 = vmatprep.subr.msk.bf16.mxu0 %vm12343_vm5, %v8783_v0  ;;  %8220 = vmatprep.subr.msk.bf16.mxu1 %vm12203_vm8, %v8970_v8  ;;  %vm12344_vm5 = vnez %v11571_v61  ;;  %vm12345_vm8 = vnez %v11573_v5  ;;  %v12357_v0 = vld [vmem:[#allocation16_spill] sm:$0xff]  ;;  %v12378_v5 = vld [vmem:[#allocation87_spill] sm:$0xff] }
 0xe14   :  { %5923 = vmatprep.mubr.bf16.mxu0 %v11736_v45  ;;  %5964 = vmatprep.mubr.bf16.mxu1 %v11736_v45 }
 0xe16   :  { %8175 = vmatpush1.bf16.msk.msra.mxu0 %vm12251_vm0, %v8806_v6  ;;  %8223 = vmatpush1.bf16.msk.msra.mxu1 %vm12298_vm4, %v8997_v19  ;;  %vm12346_vm0 = vnez %v11559_v53  ;;  %vm12347_vm4 = vnez %v11584_v58  ;;  %v12359_v6 = vld [vmem:[#allocation24_spill] sm:$0xff] }
 0xe17   :  { %8178 = vmatprep.subr.msk.bf16.mxu0 %vm12299_vm15, %v8838_v18  ;;  %8226 = vmatprep.subr.msk.bf16.mxu1 %vm12344_vm5, %v9075_v62  ;;  %vm12348_vm15 = vnez %v11561_v59  ;;  %vm12352_vm5 = vnez %v11577_v28  ;;  %v12362_v18 = vld [vmem:[#allocation18_spill] sm:$0xff] }
 0xe1a   :  { %8181 = vmatpush1.bf16.msk.msra.mxu0 %vm11926_vm7, %v8861_v26  ;;  %8229 = vmatpush1.bf16.msk.msra.mxu1 %vm12345_vm8, %v9090_v7  ;;  %vm12350_vm7 = vnez %v11569_v43  ;;  %vm12353_vm8 = vnez %v11606_v24  ;;  %v12365_v26 = vld [vmem:[#allocation28_spill] sm:$0xff] }
 0xe1b   :  { %8184 = vmatprep.subr.msk.bf16.mxu0 %vm12346_vm0, %v8934_v54  ;;  %8232 = vmatprep.subr.msk.bf16.mxu1 %vm12347_vm4, %v9170_v60  ;;  %vm12367_vm0 = vnez %v12366_v35  ;;  %v12370_v54 = vld [vmem:[#allocation30_spill] sm:$0xff] }
 0xe1e   :  { %8187 = vmatpush1.bf16.msk.msra.mxu0 %vm12348_vm15, %v8956_v3  ;;  %8235 = vmatpush1.bf16.msk.msra.mxu1 %vm12349_vm10, %v9194_v12  ;;  %v12372_v3 = vld [vmem:[#allocation26_spill] sm:$0xff] }
 0xe1f   :  { %8190 = vmatprep.subr.msk.bf16.mxu0 %vm11883_vm12, %v9023_v30  ;;  %8238 = vmatprep.subr.msk.bf16.mxu1 %vm12302_vm6, %v9246_v1  ;;  %vm12361_vm12 = vnez %v12360_v17  ;;  %vm12364_vm6 = vnez %v12363_v22  ;;  %v12377_v30 = vld [vmem:[#allocation85_spill] sm:$0xff]  ;;  %v12384_v17 = vld [vmem:[#allocation90_spill] sm:$0xff] }
 0xe22   :  { %8193 = vmatpush1.bf16.msk.msra.mxu0 %vm12350_vm7, %v9049_v44  ;;  %8241 = vmatpush1.bf16.msk.msra.mxu1 %vm12351_vm14, %v9292_v42 }
 0xe23   :  { %8196 = vmatprep.subr.msk.bf16.mxu0 %vm12352_vm5, %v9127_v31  ;;  %8244 = vmatprep.subr.msk.bf16.mxu1 %vm12353_vm8, %v9318_v25 }
 0xe26   :  { %8199 = vmatpush1.bf16.msk.msra.mxu0 %vm11841_vm11, %v9142_v40  ;;  %8247 = vmatpush1.bf16.msk.msra.mxu1 %vm12262_vm1, %v12355_v57  ;;  %vm12376_vm1 = vnez %v12375_v16 }
 0xe27   :  { %8202 = vmatprep.subr.msk.bf16.mxu0 %vm12312_vm2, %v12357_v0  ;;  %8250 = vmatprep.subr.msk.bf16.mxu1 %vm12361_vm12, %v12359_v6 }
 0xe2a   :  { %8205 = vmatpush1.bf16.msk.msra.mxu0 %vm12364_vm6, %v12362_v18  ;;  %8253 = vmatpush1.bf16.msk.msra.mxu1 %vm12367_vm0, %v12365_v26 }
 0xe2b   :  { %8208 = vmatprep.subr.msk.bf16.mxu0 %vm11810_vm3, %v12368_v38  ;;  %8256 = vmatprep.subr.msk.bf16.mxu1 %vm12231_vm13, %v12370_v54 }
 0xe2e   :  { %8211 = vmatpush1.bf16.msk.msra.mxu0 %vm12281_vm9, %v12372_v3  ;;  %8259 = vmatpush1.bf16.msk.msra.mxu1 %vm12376_vm1, %v12374_v13 }
 0xed1   :  { %v5617_v19 = vpop.f32.mrf.mxu0  ;;  %v5658_v29 = vpop.f32.mrf.mxu1 }
 0xed2   :  { %v5665_v43 = vadd.f32 %v5617_v19, %v12377_v30  ;;  %v5667_v1 = vadd.f32 %v5658_v29, %v12380_v48 }
 0xed3   :  { %v5619_v44 = vpop.f32.mrf.mxu0  ;;  %v5660_v61 = vpop.f32.mrf.mxu1 }
 0xed4   :  { %v6622_v62 = vmul.f32 -1.442695, %v5665_v43  ;;  %v5666_v7 = vadd.f32 %v5619_v44, %v12378_v5  ;;  %v5668_v12 = vadd.f32 %v5660_v61, %v12379_v4 }
 0xed5   :  { %v5621_v28 = vpop.f32.mrf.mxu0  ;;  %v5662_v31 = vpop.f32.mrf.mxu1 }
 0xed6   :  { %8488 = vpow2.f32 %v6622_v62  ;;  %v6623_v40 = vmul.f32 -1.442695, %v5666_v7  ;;  %v6624_v41 = vmul.f32 -1.442695, %v5668_v12 }
 0xed7   :  { %v5622_v58 = vpop.f32.mrf.mxu0  ;;  %v5663_v60 = vpop.f32.mrf.mxu1 }
 0xed8   :  { %8490 = vpow2.f32 %v6623_v40 }
 0xed9   :  { %8492 = vtanh.f32 %v5667_v1 }
 0xeda   :  { %8494 = vpow2.f32 %v6624_v41 }
 0xee3   :  { %v8489_v42 = vpop.eup %8488 }
 0xee4   :  { %v5672_v24 = vadd.f32 1.0, %v8489_v42 }
 0xee5   :  { %v8491_v25 = vpop.eup %8490 }
 0xee6   :  { %8496 = vrcp.f32 %v5672_v24  ;;  %v5678_v45 = vadd.f32 1.0, %v8491_v25  ;;  %v8493_v36 = vpop.eup %8492 }
 0xee7   :  { %v8495_v56 = vpop.eup %8494 }
 0xee8   :  { %8498 = vrcp.f32 %v5678_v45  ;;  %v5685_v20 = vadd.f32 1.0, %v8495_v56 }
 0xeea   :  { %8500 = vrcp.f32 %v5685_v20 }
 0xef3   :  { %v8497_v33 = vpop.eup %8496 }
 0xef4   :  { %v5689_v49 = vmul.f32 %v8497_v33, %v8493_v36 }
 0xef5   :  { %v8499_v23 = vpop.eup %8498 }
 0xef6   :  { %v5688_v39 = vmul.f32 %v8499_v23, %v11225_v10 }
 0xef7   :  { %v8501_v37 = vpop.eup %8500 }
 0xef8   :  { %v5690_v50 = vadd.f32 %v5689_v49, %v5688_v39 }
 0xefa   :  { %8502 = vtanh.f32 %v5690_v50 }
 0xf07   :  { %v8503_v51 = vpop.eup %8502 }
 0xf08   :  { %v5692_v14 = vmul.f32 %v8503_v51, %v8501_v37 }
 0xf0a   :  { %5693 = vst [vmem:[%s11349_s5 + $0x70] sm:$0xff] %v5692_v14  ;;  %v5698_v34 = vpack.c.bf16 %v5692_v14, %v5692_v14 }
 0xf0c   :  { %5924 = vmatmul.mubr.bf16.vlgmr.msra.gmra.mxu0 %v5698_v34  ;;  %5965 = vmatmul.mubr.bf16.vlgmr.msra.gmra.mxu1 %v5698_v34 }
 0xfcc   :  { %v5925_v11 = vpop.f32.mrf.mxu0  ;;  %v5966_v15 = vpop.f32.mrf.mxu1 }
 0xfcd   :  { %v5973_v47 = vadd.f32 %v5925_v11, %v12381_v46  ;;  %v5975_v18 = vadd.f32 %v5966_v15, %v12384_v17 }
 0xfce   :  { %v5927_v21 = vpop.f32.mrf.mxu0  ;;  %v5968_v55 = vpop.f32.mrf.mxu1 }
 0xfcf   :  { %v6657_v10 = vmul.f32 -1.442695, %v5973_v47  ;;  %v5974_v9 = vadd.f32 %v5927_v21, %v12382_v27  ;;  %v5976_v6 = vadd.f32 %v5968_v55, %v12383_v2 }
 0xfd0   :  { %v5929_v32 = vpop.f32.mrf.mxu0  ;;  %v5970_v52 = vpop.f32.mrf.mxu1 }
 0xfd1   :  { %8504 = vpow2.f32 %v6657_v10  ;;  %v6658_v57 = vmul.f32 -1.442695, %v5974_v9  ;;  %v6659_v22 = vmul.f32 -1.442695, %v5976_v6 }
 0xfd2   :  { %v5930_v63 = vpop.f32.mrf.mxu0  ;;  %v5971_v0 = vpop.f32.mrf.mxu1 }
 0xfd3   :  { %8506 = vpow2.f32 %v6658_v57 }
 0xfd4   :  { %8508 = vtanh.f32 %v5975_v18 }
 0xfd5   :  { %8510 = vpow2.f32 %v6659_v22 }
 0xfde   :  { %v8505_v26 = vpop.eup %8504 }
 0xfdf   :  { %v5980_v35 = vadd.f32 1.0, %v8505_v26 }
 0xfe0   :  { %v8507_v38 = vpop.eup %8506 }
 0xfe1   :  { %8512 = vrcp.f32 %v5980_v35  ;;  %v5986_v53 = vadd.f32 1.0, %v8507_v38  ;;  %v8509_v54 = vpop.eup %8508 }
 0xfe2   :  { %v8511_v59 = vpop.eup %8510 }
 0xfe3   :  { %8514 = vrcp.f32 %v5986_v53  ;;  %v5993_v16 = vadd.f32 1.0, %v8511_v59 }
 0xfe5   :  { %8516 = vrcp.f32 %v5993_v16 }
 0xfee   :  { %v8513_v3 = vpop.eup %8512 }
 0xfef   :  { %v5997_v8 = vmul.f32 %v8513_v3, %v8509_v54 }
 0xff0   :  { %v8515_v13 = vpop.eup %8514 }
 0xff1   :  { %v5996_v19 = vmul.f32 %v8515_v13, %v5690_v50 }
 0xff3   :  { %v5998_v29 = vadd.f32 %v5997_v8, %v5996_v19 }
 0xff5   :  { %8518 = vtanh.f32 %v5998_v29  ;;  %6003 = vst [vmem:[#allocation6] sm:$0xff] %v5998_v29 }
 0xff6   :  { %8531 = shalt.err (!%p8528_p4)
}
 0xff7   :  { %6025 = dma.vmem_to_hbm [thread:$0]  %s6023_s20, 128, %s11351_s7, [#allocation7]   ;;  %v8517_v30 = vpop.eup %8516 }
 0xff8   :  { %s8567_s24 = smov [#allocation4]  }
 0xff9   :  { %s6012_s25 = sshll.u32 %s8567_s24, 4  ;;  %s6013_s25 = int_to_ptr.vmem [resolvable:$true] %s6012_s25 }
 0xffa   :  { %s8540_s28 = scalar_lea.vmem %s6013_s25, 128  ;;  %p8545_p6 = scmp.lt.s32.totalorder %s6013_s25, %s6013_s25 }
 0xffb   :  { %p8541_p5 = scmp.ne.s32.totalorder %s6013_s25, %s8540_s28  ;;  %p8546_p7 = scmp.lt.s32.totalorder %s8540_s28, %s8540_s28 }
 0xffd   :  { %p8547_p8 = por %p8546_p7, %p8545_p6 }
 0xfff   :  { %p8548_p9 = pnand %p8547_p8, %p8541_p5 }
0x1002   :  { %v8519_v43 = vpop.eup %8518 }
0x1003   :  { %v6000_v44 = vmul.f32 %v8519_v43, %v8517_v30 }
0x1005   :  { %6001 = vst [vmem:[%s11349_s5 + $0x78] sm:$0xff] %v6000_v44  ;;  %6002 = vst [vmem:[#allocation4] sm:$0xff] %v6000_v44 }
0x1006   :  { %8551 = shalt.err (!%p8548_p9)
}
0x1007   :  { %6015 = dma.vmem_to_hbm [thread:$0]  %s6013_s25, 128, %s11350_s6, [#allocation5]  }
0x1008   :  { %8560 = dma.done.wait [#allocation5], 128  }
0x1009   :  { %8561 = vsyncadd [#allocation5], 4294967168 }
0x100a   :  { %8562 = dma.done.wait [#allocation7], 128  }
0x100b   :  { %8563 = vsyncadd [#allocation7], 4294967168 }
0x100c   :  { %6034 = vsyncpa [#allocation5], 1 }
0x100d   :  { %6035 = vsyncpa [#allocation7], 1 }

</bundles_post_ra>
